<compile_context>
chip_gen: v6e
topology: v6e:2x2x1
jax: 0.10.0
libtpu: 0.0.40
codegen_flags: <defaults>
</compile_context>

<pallas_src>
import functools

import jax
import jax.numpy as jnp
import numpy as np
from jax.experimental import pallas as pl
from jax.experimental.pallas import tpu as pltpu


# ----------------------------------------------------------------------------- helpers
def _round_up(n, m):
    return ((n + m - 1) // m) * m


def _choose_batch_tile(B, max_tile):
    # Aim for >= 2 batch tiles so v7x's second TensorCore is not idle on small batches.
    if B <= 8:
        return _round_up(max(B, 1), 8)
    tb = _round_up(-(-B // 2), 8)          # cdiv(B, 2) rounded up to a sublane multiple
    return max(8, min(max_tile, tb))


# ----------------------------------------------------------------------------- kernel
def _lstm_kernel(T, TB, H, H_pad, num_layers, hoist_whh, unroll, *refs):
    x_ref = refs[0]                                   # (T*TB, D) bf16, time-major tile
    layer_refs = refs[1:1 + 3 * num_layers]           # per layer: Wih, Whh, bias(1,4H)
    out_ref = refs[1 + 3 * num_layers]                # (TB, H) f32
    xg_ref = refs[2 + 3 * num_layers]                 # (T*TB, 4H) f32 or bf16 scratch
    hseq_ref = refs[3 + 3 * num_layers] if num_layers > 1 else None

    f32, bf16 = jnp.float32, jnp.bfloat16
    zpad = (jnp.zeros((TB, H_pad - H), bf16)
            if (num_layers > 1 and H_pad > H) else None)   # hoisted (not inside the loop)

    def run_layer(layer, inp):
        wih_ref = layer_refs[3 * layer + 0]
        whh_ref = layer_refs[3 * layer + 1]
        b_ref = layer_refs[3 * layer + 2]
        store_seq = layer + 1 < num_layers

        # Input->gate projection for ALL T time steps in ONE MXU matmul (M = T*TB, N = 4H),
        # f32 accumulation, bias folded in; stored in xg_ref (f32 or bf16 per VMEM budget).
        xg_ref[...] = (jnp.dot(inp, wih_ref[...], preferred_element_type=f32)
                       + b_ref[...]).astype(xg_ref.dtype)

        whh = whh_ref[...] if hoist_whh else None     # keep W_hh vreg-resident when small

        def step(t, carry):
            c, h_bf, h = carry
            row = pl.multiple_of(t * TB, TB)          # TB is a multiple of 8 (sublane aligned)
            g = xg_ref[pl.ds(row, TB), :].astype(f32) + jnp.dot(
                h_bf, whh if hoist_whh else whh_ref[...],
                preferred_element_type=f32)
            # gate columns pre-permuted to [i, f, o, g]: one sigmoid slab + one tanh slab
            sig = jax.nn.sigmoid(g[:, :3 * H])
            cand = jnp.tanh(g[:, 3 * H:])
            c = sig[:, H:2 * H] * c + sig[:, :H] * cand
            h = sig[:, 2 * H:3 * H] * jnp.tanh(c)
            h_bf = h.astype(bf16)                     # single bf16 cast per step
            if store_seq:                             # feeds the next layer's projection
                v = h_bf if zpad is None else jnp.concatenate([h_bf, zpad], axis=1)
                hseq_ref[pl.ds(row, TB), :] = v       # lane-dense (H_pad-wide) store
            return (c, h_bf, h)

        init = (jnp.zeros((TB, H), f32),
                jnp.zeros((TB, H), bf16),
                jnp.zeros((TB, H), f32))
        _, _, h_last = jax.lax.fori_loop(0, T, step, init, unroll=unroll)
        return h_last

    h_last = run_layer(0, x_ref[...])
    for layer in range(1, num_layers):
        h_last = run_layer(layer, hseq_ref[...])

    out_ref[...] = h_last                             # lane-dense (TB, H) tile output


# ----------------------------------------------------------------------------- wrapper
def longitudinal_lstm_forward(x, params, *, batch_tile=None, max_batch_tile=128,
                              time_unroll=8):
    """x: (B, T, D) float32. Returns classification logits (B, 2), matching
    LongitudinalLSTM.forward (eval mode, unidirectional)."""
    B, T, D = x.shape
    num_layers = len(params["wih"])
    H = params["whh"][0].shape[0]
    H_pad = _round_up(H, 128)

    TB = batch_tile if batch_tile is not None else _choose_batch_tile(B, max_batch_tile)
    B_pad = _round_up(B, TB)
    ntiles = B_pad // TB

    # xg scratch dtype: keep f32 unless it would threaten v7x's 64 MiB VMEM budget.
    xg_dtype = jnp.float32 if (T * TB * 4 * H * 4) <= (24 << 20) else jnp.bfloat16

    # time-major, bf16, batch padded to the tile size, grouped per batch-tile so each grid
    # step reads one contiguous (T*TB, D) slab (all in-kernel tensors stay 2-D).
    xt = jnp.transpose(x, (1, 0, 2)).astype(jnp.bfloat16)          # (T, B, D)
    if B_pad != B:
        xt = jnp.pad(xt, ((0, 0), (0, B_pad - B), (0, 0)))
    x_tiles = (xt.reshape(T, ntiles, TB, D)
                 .transpose(1, 0, 2, 3)
                 .reshape(ntiles, T * TB, D))

    # VMEM budget: 2x input block + 2x output block + weights(+margin) + scratch + headroom.
    w_bytes = sum(int(np.prod(a.shape)) * a.dtype.itemsize
                  for l in range(num_layers)
                  for a in (params["wih"][l], params["whh"][l], params["bias"][l]))
    vmem_bytes = (2 * T * TB * D * 2
                  + 2 * TB * H * 4
                  + 2 * w_bytes
                  + T * TB * 4 * H * jnp.dtype(xg_dtype).itemsize
                  + (T * TB * H_pad * 2 if num_layers > 1 else 0))
    vmem_limit = int(min(max(int(vmem_bytes * 1.3) + (2 << 20), 32 << 20), 96 << 20))

    hoist_whh = (H * 4 * H * 2) <= (96 * 1024)        # bf16 W_hh small enough for vregs
    unroll = max(1, min(time_unroll, T))
    squeeze0 = pl.Squeezed() if hasattr(pl, "Squeezed") else None

    def build_and_run(single_buffer_weights):
        wkw = ({"pipeline_mode": pl.Buffered(1)}
               if (single_buffer_weights and hasattr(pl, "Buffered")) else {})

        ins = [x_tiles]
        in_specs = [pl.BlockSpec((squeeze0, T * TB, D), lambda b: (b, 0, 0))]
        for l in range(num_layers):
            for a in (params["wih"][l], params["whh"][l], params["bias"][l]):
                ins.append(a)
                in_specs.append(pl.BlockSpec(a.shape, lambda b: (0, 0), **wkw))

        scratch = [pltpu.VMEM((T * TB, 4 * H), xg_dtype)]       # per-layer gate projections
        if num_layers > 1:
            scratch.append(pltpu.VMEM((T * TB, H_pad), jnp.bfloat16))  # hidden seq -> next layer

        return pl.pallas_call(
            functools.partial(_lstm_kernel, T, TB, H, H_pad, num_layers, hoist_whh, unroll),
            out_shape=jax.ShapeDtypeStruct((B_pad, H), jnp.float32),
            grid_spec=pltpu.PrefetchScalarGridSpec(
                num_scalar_prefetch=0,
                grid=(ntiles,),
                in_specs=in_specs,
                out_specs=pl.BlockSpec((TB, H), lambda b: (b, 0)),
                scratch_shapes=scratch),
            compiler_params=pltpu.CompilerParams(
                dimension_semantics=("parallel",),
                vmem_limit_bytes=vmem_limit),
        )(*ins)

    try:
        feat = build_and_run(single_buffer_weights=True)
    except Exception:
        # Defensive fallback if this Pallas build rejects single-buffered constant operands.
        feat = build_and_run(single_buffer_weights=False)

    feat = feat[:B]                                    # drop batch padding  (B, H) f32
    logits = feat @ params["wc"].T + params["bc"]      # 2-wide classifier head in plain XLA
    return logits


# ----------------------------------------------------------------------------- params
def make_params(key, input_dim, hidden_dim, num_layers=2):
    keys = iter(jax.random.split(key, 4 * num_layers + 2))
    bound = 1.0 / float(np.sqrt(hidden_dim))           # PyTorch nn.LSTM default init

    def uni(shape):
        return jax.random.uniform(next(keys), shape, dtype=jnp.float32,
                                  minval=-bound, maxval=bound)

    raw_layers = []
    for l in range(num_layers):
        in_dim = input_dim if l == 0 else hidden_dim
        raw_layers.append(dict(
            wih=uni((4 * hidden_dim, in_dim)),
            whh=uni((4 * hidden_dim, hidden_dim)),
            bih=uni((4 * hidden_dim,)),
            bhh=uni((4 * hidden_dim,)),
        ))
    wc, bc = uni((2, hidden_dim)), uni((2,))
    raw = dict(layers=raw_layers, wc=wc, bc=bc)

    # Kernel-side params: weights transposed to (in, 4H), gate columns permuted from
    # PyTorch's [i,f,g,o] to [i,f,o,g] (one sigmoid slab + one tanh slab in the kernel),
    # layer>=1 W_ih zero-row-padded to the lane-padded hseq width, bf16 weights, fp32 bias.
    H = hidden_dim
    H_pad = _round_up(H, 128)

    def permute_gates(w):                               # columns [i,f,g,o] -> [i,f,o,g]
        i, f, g, o = jnp.split(w, 4, axis=-1)
        return jnp.concatenate([i, f, o, g], axis=-1)

    wih_k, whh_k, bias_k = [], [], []
    for l, p in enumerate(raw_layers):
        wih = permute_gates(jnp.transpose(p["wih"]))    # (in_dim, 4H)
        if l > 0 and H_pad > H:
            wih = jnp.pad(wih, ((0, H_pad - H), (0, 0)))
        whh = permute_gates(jnp.transpose(p["whh"]))    # (H, 4H)
        b = permute_gates((p["bih"] + p["bhh"]).reshape(1, -1))
        wih_k.append(wih.astype(jnp.bfloat16))
        whh_k.append(whh.astype(jnp.bfloat16))
        bias_k.append(b)                                # fp32
    kern = dict(wih=wih_k, whh=whh_k, bias=bias_k, wc=wc, bc=bc)
    return raw, kern


# ----------------------------------------------------------------------------- pure-JAX reference (mirrors the PyTorch eval forward)
def reference_forward(x, raw):
    B, T, D = x.shape
    seq = x
    h = None
    for p in raw["layers"]:
        H = p["whh"].shape[1]

        def step(carry, xt, p=p, H=H):
            h, c = carry
            g = xt @ p["wih"].T + p["bih"] + h @ p["whh"].T + p["bhh"]
            i = jax.nn.sigmoid(g[:, 0 * H:1 * H])
            f = jax.nn.sigmoid(g[:, 1 * H:2 * H])
            cand = jnp.tanh(g[:, 2 * H:3 * H])
            o = jax.nn.sigmoid(g[:, 3 * H:4 * H])
            c = f * c + i * cand
            h = o * jnp.tanh(c)
            return (h, c), h

        init = (jnp.zeros((B, H), jnp.float32), jnp.zeros((B, H), jnp.float32))
        (h, _), hs = jax.lax.scan(step, init, jnp.transpose(seq, (1, 0, 2)))
        seq = jnp.transpose(hs, (1, 0, 2))              # inter-layer dropout: identity (eval)
    return h @ raw["wc"].T + raw["bc"]                  # classifier on last layer's final hidden


# ----------------------------------------------------------------------------- main
if __name__ == "__main__":
    key = jax.random.PRNGKey(0)

    # Test 1: nominal small config (2 layers, single batch tile, lane-padded hseq path)
    B, T, D, H, L = 2, 8, 4, 32, 2
    kx, kp = jax.random.split(key)
    x = jax.random.normal(kx, (B, T, D), dtype=jnp.float32)
    raw, kern = make_params(kp, D, H, num_layers=L)
    logits = jax.block_until_ready(longitudinal_lstm_forward(x, kern))
    np.testing.assert_allclose(np.asarray(logits), np.asarray(reference_forward(x, raw)),
                               rtol=2e-2, atol=2e-2)

    # Test 2: multi-tile batch (exercises ntiles>=2 "parallel" grid + batch padding)
    B2 = 20
    kx2, kp2 = jax.random.split(kp)
    x2 = jax.random.normal(kx2, (B2, T, D), dtype=jnp.float32)
    raw2, kern2 = make_params(kp2, D, H, num_layers=L)
    logits2 = jax.block_until_ready(longitudinal_lstm_forward(x2, kern2))
    np.testing.assert_allclose(np.asarray(logits2), np.asarray(reference_forward(x2, raw2)),
                               rtol=2e-2, atol=2e-2)

    # Test 3: single-layer config (no hseq scratch allocated)
    raw3, kern3 = make_params(kp2, D, H, num_layers=1)
    logits3 = jax.block_until_ready(longitudinal_lstm_forward(x, kern3))
    np.testing.assert_allclose(np.asarray(logits3), np.asarray(reference_forward(x, raw3)),
                               rtol=2e-2, atol=2e-2)

    print("KERNEL_OK")
</pallas_src>

<mosaic_0001>
module attributes {stable_mosaic.version = 11 : i64} {
  func.func @_lstm_kernel(%arg0: i32, %arg1: memref<1x64x4xbf16, #tpu.memory_space<vmem>>, %arg2: memref<4x128xbf16, #tpu.memory_space<vmem>>, %arg3: memref<32x128xbf16, #tpu.memory_space<vmem>>, %arg4: memref<1x128xf32, #tpu.memory_space<vmem>>, %arg5: memref<128x128xbf16, #tpu.memory_space<vmem>>, %arg6: memref<32x128xbf16, #tpu.memory_space<vmem>>, %arg7: memref<1x128xf32, #tpu.memory_space<vmem>>, %arg8: memref<8x32xf32, #tpu.memory_space<vmem>>, %arg9: memref<64x128xf32, #tpu.memory_space<vmem>>, %arg10: memref<64x128xbf16, #tpu.memory_space<vmem>>) attributes {dimension_semantics = [#tpu.dimension_semantics<parallel>], iteration_bounds = array<i64: 1>, scalar_prefetch = 0 : i64, scratch_operands = 2 : i64, tpu.core_type = #tpu.core_type<tc>, window_params = [{transform_indices = @transform_0, window_bounds = array<i64: 1, 64, 4>}, {pipeline_mode = #tpu.pipeline_mode<synchronous>, transform_indices = @transform_1, window_bounds = array<i64: 4, 128>}, {pipeline_mode = #tpu.pipeline_mode<synchronous>, transform_indices = @transform_2, window_bounds = array<i64: 32, 128>}, {pipeline_mode = #tpu.pipeline_mode<synchronous>, transform_indices = @transform_3, window_bounds = array<i64: 1, 128>}, {pipeline_mode = #tpu.pipeline_mode<synchronous>, transform_indices = @transform_4, window_bounds = array<i64: 128, 128>}, {pipeline_mode = #tpu.pipeline_mode<synchronous>, transform_indices = @transform_5, window_bounds = array<i64: 32, 128>}, {pipeline_mode = #tpu.pipeline_mode<synchronous>, transform_indices = @transform_6, window_bounds = array<i64: 1, 128>}, {transform_indices = @transform_7, window_bounds = array<i64: 8, 32>}]} {
    %cst = arith.constant 0.000000e+00 : bf16
    %0 = vector.broadcast %cst : bf16 to vector<8x96xbf16>
    %c0 = arith.constant 0 : index
    %c0_0 = arith.constant 0 : index
    %c0_1 = arith.constant 0 : index
    %1 = vector.load %arg1[%c0, %c0_0, %c0_1] : memref<1x64x4xbf16, #tpu.memory_space<vmem>>, vector<1x64x4xbf16>
    %2 = vector.shape_cast %1 : vector<1x64x4xbf16> to vector<64x4xbf16>
    %c0_2 = arith.constant 0 : index
    %c0_3 = arith.constant 0 : index
    %3 = vector.load %arg2[%c0_2, %c0_3] : memref<4x128xbf16, #tpu.memory_space<vmem>>, vector<4x128xbf16>
    %cst_4 = arith.constant dense<0.000000e+00> : vector<64x128xf32>
    %4 = tpu.matmul %2, %3, %cst_4 {dimension_numbers = #tpu.dot_dimension_numbers<[1], [0], [0], [1], [0, 0, 1, 1], [], []>} : vector<64x4xbf16>, vector<4x128xbf16>, vector<64x128xf32> -> vector<64x128xf32>
    %c0_5 = arith.constant 0 : index
    %c0_6 = arith.constant 0 : index
    %5 = vector.load %arg4[%c0_5, %c0_6] : memref<1x128xf32, #tpu.memory_space<vmem>>, vector<1x128xf32>
    %6 = vector.broadcast %5 : vector<1x128xf32> to vector<64x128xf32>
    %7 = arith.addf %4, %6 : vector<64x128xf32>
    %c0_7 = arith.constant 0 : index
    %c0_8 = arith.constant 0 : index
    %8 = vector.load %arg9[%c0_7, %c0_8] : memref<64x128xf32, #tpu.memory_space<vmem>>, vector<64x128xf32>
    tpu.vector_store %arg9[%c0_7, %c0_8], %7 {strides = array<i32>} : memref<64x128xf32, #tpu.memory_space<vmem>>, vector<64x128xf32>,
    %c0_9 = arith.constant 0 : index
    %c0_10 = arith.constant 0 : index
    %9 = vector.load %arg3[%c0_9, %c0_10] : memref<32x128xbf16, #tpu.memory_space<vmem>>, vector<32x128xbf16>
    %cst_11 = arith.constant 0.000000e+00 : f32
    %10 = vector.broadcast %cst_11 : f32 to vector<8x32xf32>
    %cst_12 = arith.constant 0.000000e+00 : bf16
    %11 = vector.broadcast %cst_12 : bf16 to vector<8x32xbf16>
    %c0_i32 = arith.constant 0 : i32
    %c8_i32 = arith.constant 8 : i32
    %12 = arith.muli %c0_i32, %c8_i32 : i32
    %13 = tpu.assume_multiple %12, 8 : i32
    %14 = arith.index_cast %13 : i32 to index
    %c0_13 = arith.constant 0 : index
    %15 = vector.load %arg9[%14, %c0_13] : memref<64x128xf32, #tpu.memory_space<vmem>>, vector<8x128xf32>
    %cst_14 = arith.constant dense<0.000000e+00> : vector<8x128xf32>
    %16 = tpu.matmul %11, %9, %cst_14 {dimension_numbers = #tpu.dot_dimension_numbers<[1], [0], [0], [1], [0, 0, 1, 1], [], []>} : vector<8x32xbf16>, vector<32x128xbf16>, vector<8x128xf32> -> vector<8x128xf32>
    %17 = arith.addf %15, %16 : vector<8x128xf32>
    %18 = vector.extract_strided_slice %17 {offsets = [0, 0], sizes = [8, 96], strides = [1, 1]} : vector<8x128xf32> to vector<8x96xf32>
    %19 = arith.negf %18 : vector<8x96xf32>
    %20 = math.exp %19 : vector<8x96xf32>
    %cst_15 = arith.constant 1.000000e+00 : f32
    %21 = vector.broadcast %cst_15 : f32 to vector<8x96xf32>
    %22 = arith.addf %21, %20 : vector<8x96xf32>
    %23 = arith.divf %21, %22 : vector<8x96xf32>
    %24 = vector.extract_strided_slice %17 {offsets = [0, 96], sizes = [8, 32], strides = [1, 1]} : vector<8x128xf32> to vector<8x32xf32>
    %25 = math.tanh %24 : vector<8x32xf32>
    %26 = vector.extract_strided_slice %23 {offsets = [0, 32], sizes = [8, 32], strides = [1, 1]} : vector<8x96xf32> to vector<8x32xf32>
    %27 = arith.mulf %26, %10 : vector<8x32xf32>
    %28 = vector.extract_strided_slice %23 {offsets = [0, 0], sizes = [8, 32], strides = [1, 1]} : vector<8x96xf32> to vector<8x32xf32>
    %29 = arith.mulf %28, %25 : vector<8x32xf32>
    %30 = arith.addf %27, %29 : vector<8x32xf32>
    %31 = vector.extract_strided_slice %23 {offsets = [0, 64], sizes = [8, 32], strides = [1, 1]} : vector<8x96xf32> to vector<8x32xf32>
    %32 = math.tanh %30 : vector<8x32xf32>
    %33 = arith.mulf %31, %32 : vector<8x32xf32>
    %34 = arith.truncf %33 : vector<8x32xf32> to vector<8x32xbf16>
    %35 = tpu.concatenate %34, %0 in 1 : vector<8x32xbf16>, vector<8x96xbf16> -> vector<8x128xbf16>
    %36 = arith.index_cast %13 : i32 to index
    %c0_16 = arith.constant 0 : index
    %37 = vector.load %arg10[%36, %c0_16] : memref<64x128xbf16, #tpu.memory_space<vmem>>, vector<8x128xbf16>
    tpu.vector_store %arg10[%36, %c0_16], %35 {strides = array<i32>} : memref<64x128xbf16, #tpu.memory_space<vmem>>, vector<8x128xbf16>,
    %c1_i32 = arith.constant 1 : i32
    %c8_i32_17 = arith.constant 8 : i32
    %38 = arith.muli %c1_i32, %c8_i32_17 : i32
    %39 = tpu.assume_multiple %38, 8 : i32
    %40 = arith.index_cast %39 : i32 to index
    %c0_18 = arith.constant 0 : index
    %41 = vector.load %arg9[%40, %c0_18] : memref<64x128xf32, #tpu.memory_space<vmem>>, vector<8x128xf32>
    %cst_19 = arith.constant dense<0.000000e+00> : vector<8x128xf32>
    %42 = tpu.matmul %34, %9, %cst_19 {dimension_numbers = #tpu.dot_dimension_numbers<[1], [0], [0], [1], [0, 0, 1, 1], [], []>} : vector<8x32xbf16>, vector<32x128xbf16>, vector<8x128xf32> -> vector<8x128xf32>
    %43 = arith.addf %41, %42 : vector<8x128xf32>
    %44 = vector.extract_strided_slice %43 {offsets = [0, 0], sizes = [8, 96], strides = [1, 1]} : vector<8x128xf32> to vector<8x96xf32>
    %45 = arith.negf %44 : vector<8x96xf32>
    %46 = math.exp %45 : vector<8x96xf32>
    %cst_20 = arith.constant 1.000000e+00 : f32
    %47 = vector.broadcast %cst_20 : f32 to vector<8x96xf32>
    %48 = arith.addf %47, %46 : vector<8x96xf32>
    %49 = arith.divf %47, %48 : vector<8x96xf32>
    %50 = vector.extract_strided_slice %43 {offsets = [0, 96], sizes = [8, 32], strides = [1, 1]} : vector<8x128xf32> to vector<8x32xf32>
    %51 = math.tanh %50 : vector<8x32xf32>
    %52 = vector.extract_strided_slice %49 {offsets = [0, 32], sizes = [8, 32], strides = [1, 1]} : vector<8x96xf32> to vector<8x32xf32>
    %53 = arith.mulf %52, %30 : vector<8x32xf32>
    %54 = vector.extract_strided_slice %49 {offsets = [0, 0], sizes = [8, 32], strides = [1, 1]} : vector<8x96xf32> to vector<8x32xf32>
    %55 = arith.mulf %54, %51 : vector<8x32xf32>
    %56 = arith.addf %53, %55 : vector<8x32xf32>
    %57 = vector.extract_strided_slice %49 {offsets = [0, 64], sizes = [8, 32], strides = [1, 1]} : vector<8x96xf32> to vector<8x32xf32>
    %58 = math.tanh %56 : vector<8x32xf32>
    %59 = arith.mulf %57, %58 : vector<8x32xf32>
    %60 = arith.truncf %59 : vector<8x32xf32> to vector<8x32xbf16>
    %61 = tpu.concatenate %60, %0 in 1 : vector<8x32xbf16>, vector<8x96xbf16> -> vector<8x128xbf16>
    %62 = arith.index_cast %39 : i32 to index
    %c0_21 = arith.constant 0 : index
    %63 = vector.load %arg10[%62, %c0_21] : memref<64x128xbf16, #tpu.memory_space<vmem>>, vector<8x128xbf16>
    tpu.vector_store %arg10[%62, %c0_21], %61 {strides = array<i32>} : memref<64x128xbf16, #tpu.memory_space<vmem>>, vector<8x128xbf16>,
    %c2_i32 = arith.constant 2 : i32
    %c8_i32_22 = arith.constant 8 : i32
    %64 = arith.muli %c2_i32, %c8_i32_22 : i32
    %65 = tpu.assume_multiple %64, 8 : i32
    %66 = arith.index_cast %65 : i32 to index
    %c0_23 = arith.constant 0 : index
    %67 = vector.load %arg9[%66, %c0_23] : memref<64x128xf32, #tpu.memory_space<vmem>>, vector<8x128xf32>
    %cst_24 = arith.constant dense<0.000000e+00> : vector<8x128xf32>
    %68 = tpu.matmul %60, %9, %cst_24 {dimension_numbers = #tpu.dot_dimension_numbers<[1], [0], [0], [1], [0, 0, 1, 1], [], []>} : vector<8x32xbf16>, vector<32x128xbf16>, vector<8x128xf32> -> vector<8x128xf32>
    %69 = arith.addf %67, %68 : vector<8x128xf32>
    %70 = vector.extract_strided_slice %69 {offsets = [0, 0], sizes = [8, 96], strides = [1, 1]} : vector<8x128xf32> to vector<8x96xf32>
    %71 = arith.negf %70 : vector<8x96xf32>
    %72 = math.exp %71 : vector<8x96xf32>
    %cst_25 = arith.constant 1.000000e+00 : f32
    %73 = vector.broadcast %cst_25 : f32 to vector<8x96xf32>
    %74 = arith.addf %73, %72 : vector<8x96xf32>
    %75 = arith.divf %73, %74 : vector<8x96xf32>
    %76 = vector.extract_strided_slice %69 {offsets = [0, 96], sizes = [8, 32], strides = [1, 1]} : vector<8x128xf32> to vector<8x32xf32>
    %77 = math.tanh %76 : vector<8x32xf32>
    %78 = vector.extract_strided_slice %75 {offsets = [0, 32], sizes = [8, 32], strides = [1, 1]} : vector<8x96xf32> to vector<8x32xf32>
    %79 = arith.mulf %78, %56 : vector<8x32xf32>
    %80 = vector.extract_strided_slice %75 {offsets = [0, 0], sizes = [8, 32], strides = [1, 1]} : vector<8x96xf32> to vector<8x32xf32>
    %81 = arith.mulf %80, %77 : vector<8x32xf32>
    %82 = arith.addf %79, %81 : vector<8x32xf32>
    %83 = vector.extract_strided_slice %75 {offsets = [0, 64], sizes = [8, 32], strides = [1, 1]} : vector<8x96xf32> to vector<8x32xf32>
    %84 = math.tanh %82 : vector<8x32xf32>
    %85 = arith.mulf %83, %84 : vector<8x32xf32>
    %86 = arith.truncf %85 : vector<8x32xf32> to vector<8x32xbf16>
    %87 = tpu.concatenate %86, %0 in 1 : vector<8x32xbf16>, vector<8x96xbf16> -> vector<8x128xbf16>
    %88 = arith.index_cast %65 : i32 to index
    %c0_26 = arith.constant 0 : index
    %89 = vector.load %arg10[%88, %c0_26] : memref<64x128xbf16, #tpu.memory_space<vmem>>, vector<8x128xbf16>
    tpu.vector_store %arg10[%88, %c0_26], %87 {strides = array<i32>} : memref<64x128xbf16, #tpu.memory_space<vmem>>, vector<8x128xbf16>,
    %c3_i32 = arith.constant 3 : i32
    %c8_i32_27 = arith.constant 8 : i32
    %90 = arith.muli %c3_i32, %c8_i32_27 : i32
    %91 = tpu.assume_multiple %90, 8 : i32
    %92 = arith.index_cast %91 : i32 to index
    %c0_28 = arith.constant 0 : index
    %93 = vector.load %arg9[%92, %c0_28] : memref<64x128xf32, #tpu.memory_space<vmem>>, vector<8x128xf32>
    %cst_29 = arith.constant dense<0.000000e+00> : vector<8x128xf32>
    %94 = tpu.matmul %86, %9, %cst_29 {dimension_numbers = #tpu.dot_dimension_numbers<[1], [0], [0], [1], [0, 0, 1, 1], [], []>} : vector<8x32xbf16>, vector<32x128xbf16>, vector<8x128xf32> -> vector<8x128xf32>
    %95 = arith.addf %93, %94 : vector<8x128xf32>
    %96 = vector.extract_strided_slice %95 {offsets = [0, 0], sizes = [8, 96], strides = [1, 1]} : vector<8x128xf32> to vector<8x96xf32>
    %97 = arith.negf %96 : vector<8x96xf32>
    %98 = math.exp %97 : vector<8x96xf32>
    %cst_30 = arith.constant 1.000000e+00 : f32
    %99 = vector.broadcast %cst_30 : f32 to vector<8x96xf32>
    %100 = arith.addf %99, %98 : vector<8x96xf32>
    %101 = arith.divf %99, %100 : vector<8x96xf32>
    %102 = vector.extract_strided_slice %95 {offsets = [0, 96], sizes = [8, 32], strides = [1, 1]} : vector<8x128xf32> to vector<8x32xf32>
    %103 = math.tanh %102 : vector<8x32xf32>
    %104 = vector.extract_strided_slice %101 {offsets = [0, 32], sizes = [8, 32], strides = [1, 1]} : vector<8x96xf32> to vector<8x32xf32>
    %105 = arith.mulf %104, %82 : vector<8x32xf32>
    %106 = vector.extract_strided_slice %101 {offsets = [0, 0], sizes = [8, 32], strides = [1, 1]} : vector<8x96xf32> to vector<8x32xf32>
    %107 = arith.mulf %106, %103 : vector<8x32xf32>
    %108 = arith.addf %105, %107 : vector<8x32xf32>
    %109 = vector.extract_strided_slice %101 {offsets = [0, 64], sizes = [8, 32], strides = [1, 1]} : vector<8x96xf32> to vector<8x32xf32>
    %110 = math.tanh %108 : vector<8x32xf32>
    %111 = arith.mulf %109, %110 : vector<8x32xf32>
    %112 = arith.truncf %111 : vector<8x32xf32> to vector<8x32xbf16>
    %113 = tpu.concatenate %112, %0 in 1 : vector<8x32xbf16>, vector<8x96xbf16> -> vector<8x128xbf16>
    %114 = arith.index_cast %91 : i32 to index
    %c0_31 = arith.constant 0 : index
    %115 = vector.load %arg10[%114, %c0_31] : memref<64x128xbf16, #tpu.memory_space<vmem>>, vector<8x128xbf16>
    tpu.vector_store %arg10[%114, %c0_31], %113 {strides = array<i32>} : memref<64x128xbf16, #tpu.memory_space<vmem>>, vector<8x128xbf16>,
    %c4_i32 = arith.constant 4 : i32
    %c8_i32_32 = arith.constant 8 : i32
    %116 = arith.muli %c4_i32, %c8_i32_32 : i32
    %117 = tpu.assume_multiple %116, 8 : i32
    %118 = arith.index_cast %117 : i32 to index
    %c0_33 = arith.constant 0 : index
    %119 = vector.load %arg9[%118, %c0_33] : memref<64x128xf32, #tpu.memory_space<vmem>>, vector<8x128xf32>
    %cst_34 = arith.constant dense<0.000000e+00> : vector<8x128xf32>
    %120 = tpu.matmul %112, %9, %cst_34 {dimension_numbers = #tpu.dot_dimension_numbers<[1], [0], [0], [1], [0, 0, 1, 1], [], []>} : vector<8x32xbf16>, vector<32x128xbf16>, vector<8x128xf32> -> vector<8x128xf32>
    %121 = arith.addf %119, %120 : vector<8x128xf32>
    %122 = vector.extract_strided_slice %121 {offsets = [0, 0], sizes = [8, 96], strides = [1, 1]} : vector<8x128xf32> to vector<8x96xf32>
    %123 = arith.negf %122 : vector<8x96xf32>
    %124 = math.exp %123 : vector<8x96xf32>
    %cst_35 = arith.constant 1.000000e+00 : f32
    %125 = vector.broadcast %cst_35 : f32 to vector<8x96xf32>
    %126 = arith.addf %125, %124 : vector<8x96xf32>
    %127 = arith.divf %125, %126 : vector<8x96xf32>
    %128 = vector.extract_strided_slice %121 {offsets = [0, 96], sizes = [8, 32], strides = [1, 1]} : vector<8x128xf32> to vector<8x32xf32>
    %129 = math.tanh %128 : vector<8x32xf32>
    %130 = vector.extract_strided_slice %127 {offsets = [0, 32], sizes = [8, 32], strides = [1, 1]} : vector<8x96xf32> to vector<8x32xf32>
    %131 = arith.mulf %130, %108 : vector<8x32xf32>
    %132 = vector.extract_strided_slice %127 {offsets = [0, 0], sizes = [8, 32], strides = [1, 1]} : vector<8x96xf32> to vector<8x32xf32>
    %133 = arith.mulf %132, %129 : vector<8x32xf32>
    %134 = arith.addf %131, %133 : vector<8x32xf32>
    %135 = vector.extract_strided_slice %127 {offsets = [0, 64], sizes = [8, 32], strides = [1, 1]} : vector<8x96xf32> to vector<8x32xf32>
    %136 = math.tanh %134 : vector<8x32xf32>
    %137 = arith.mulf %135, %136 : vector<8x32xf32>
    %138 = arith.truncf %137 : vector<8x32xf32> to vector<8x32xbf16>
    %139 = tpu.concatenate %138, %0 in 1 : vector<8x32xbf16>, vector<8x96xbf16> -> vector<8x128xbf16>
    %140 = arith.index_cast %117 : i32 to index
    %c0_36 = arith.constant 0 : index
    %141 = vector.load %arg10[%140, %c0_36] : memref<64x128xbf16, #tpu.memory_space<vmem>>, vector<8x128xbf16>
    tpu.vector_store %arg10[%140, %c0_36], %139 {strides = array<i32>} : memref<64x128xbf16, #tpu.memory_space<vmem>>, vector<8x128xbf16>,
    %c5_i32 = arith.constant 5 : i32
    %c8_i32_37 = arith.constant 8 : i32
    %142 = arith.muli %c5_i32, %c8_i32_37 : i32
    %143 = tpu.assume_multiple %142, 8 : i32
    %144 = arith.index_cast %143 : i32 to index
    %c0_38 = arith.constant 0 : index
    %145 = vector.load %arg9[%144, %c0_38] : memref<64x128xf32, #tpu.memory_space<vmem>>, vector<8x128xf32>
    %cst_39 = arith.constant dense<0.000000e+00> : vector<8x128xf32>
    %146 = tpu.matmul %138, %9, %cst_39 {dimension_numbers = #tpu.dot_dimension_numbers<[1], [0], [0], [1], [0, 0, 1, 1], [], []>} : vector<8x32xbf16>, vector<32x128xbf16>, vector<8x128xf32> -> vector<8x128xf32>
    %147 = arith.addf %145, %146 : vector<8x128xf32>
    %148 = vector.extract_strided_slice %147 {offsets = [0, 0], sizes = [8, 96], strides = [1, 1]} : vector<8x128xf32> to vector<8x96xf32>
    %149 = arith.negf %148 : vector<8x96xf32>
    %150 = math.exp %149 : vector<8x96xf32>
    %cst_40 = arith.constant 1.000000e+00 : f32
    %151 = vector.broadcast %cst_40 : f32 to vector<8x96xf32>
    %152 = arith.addf %151, %150 : vector<8x96xf32>
    %153 = arith.divf %151, %152 : vector<8x96xf32>
    %154 = vector.extract_strided_slice %147 {offsets = [0, 96], sizes = [8, 32], strides = [1, 1]} : vector<8x128xf32> to vector<8x32xf32>
    %155 = math.tanh %154 : vector<8x32xf32>
    %156 = vector.extract_strided_slice %153 {offsets = [0, 32], sizes = [8, 32], strides = [1, 1]} : vector<8x96xf32> to vector<8x32xf32>
    %157 = arith.mulf %156, %134 : vector<8x32xf32>
    %158 = vector.extract_strided_slice %153 {offsets = [0, 0], sizes = [8, 32], strides = [1, 1]} : vector<8x96xf32> to vector<8x32xf32>
    %159 = arith.mulf %158, %155 : vector<8x32xf32>
    %160 = arith.addf %157, %159 : vector<8x32xf32>
    %161 = vector.extract_strided_slice %153 {offsets = [0, 64], sizes = [8, 32], strides = [1, 1]} : vector<8x96xf32> to vector<8x32xf32>
    %162 = math.tanh %160 : vector<8x32xf32>
    %163 = arith.mulf %161, %162 : vector<8x32xf32>
    %164 = arith.truncf %163 : vector<8x32xf32> to vector<8x32xbf16>
    %165 = tpu.concatenate %164, %0 in 1 : vector<8x32xbf16>, vector<8x96xbf16> -> vector<8x128xbf16>
    %166 = arith.index_cast %143 : i32 to index
    %c0_41 = arith.constant 0 : index
    %167 = vector.load %arg10[%166, %c0_41] : memref<64x128xbf16, #tpu.memory_space<vmem>>, vector<8x128xbf16>
    tpu.vector_store %arg10[%166, %c0_41], %165 {strides = array<i32>} : memref<64x128xbf16, #tpu.memory_space<vmem>>, vector<8x128xbf16>,
    %c6_i32 = arith.constant 6 : i32
    %c8_i32_42 = arith.constant 8 : i32
    %168 = arith.muli %c6_i32, %c8_i32_42 : i32
    %169 = tpu.assume_multiple %168, 8 : i32
    %170 = arith.index_cast %169 : i32 to index
    %c0_43 = arith.constant 0 : index
    %171 = vector.load %arg9[%170, %c0_43] : memref<64x128xf32, #tpu.memory_space<vmem>>, vector<8x128xf32>
    %cst_44 = arith.constant dense<0.000000e+00> : vector<8x128xf32>
    %172 = tpu.matmul %164, %9, %cst_44 {dimension_numbers = #tpu.dot_dimension_numbers<[1], [0], [0], [1], [0, 0, 1, 1], [], []>} : vector<8x32xbf16>, vector<32x128xbf16>, vector<8x128xf32> -> vector<8x128xf32>
    %173 = arith.addf %171, %172 : vector<8x128xf32>
    %174 = vector.extract_strided_slice %173 {offsets = [0, 0], sizes = [8, 96], strides = [1, 1]} : vector<8x128xf32> to vector<8x96xf32>
    %175 = arith.negf %174 : vector<8x96xf32>
    %176 = math.exp %175 : vector<8x96xf32>
    %cst_45 = arith.constant 1.000000e+00 : f32
    %177 = vector.broadcast %cst_45 : f32 to vector<8x96xf32>
    %178 = arith.addf %177, %176 : vector<8x96xf32>
    %179 = arith.divf %177, %178 : vector<8x96xf32>
    %180 = vector.extract_strided_slice %173 {offsets = [0, 96], sizes = [8, 32], strides = [1, 1]} : vector<8x128xf32> to vector<8x32xf32>
    %181 = math.tanh %180 : vector<8x32xf32>
    %182 = vector.extract_strided_slice %179 {offsets = [0, 32], sizes = [8, 32], strides = [1, 1]} : vector<8x96xf32> to vector<8x32xf32>
    %183 = arith.mulf %182, %160 : vector<8x32xf32>
    %184 = vector.extract_strided_slice %179 {offsets = [0, 0], sizes = [8, 32], strides = [1, 1]} : vector<8x96xf32> to vector<8x32xf32>
    %185 = arith.mulf %184, %181 : vector<8x32xf32>
    %186 = arith.addf %183, %185 : vector<8x32xf32>
    %187 = vector.extract_strided_slice %179 {offsets = [0, 64], sizes = [8, 32], strides = [1, 1]} : vector<8x96xf32> to vector<8x32xf32>
    %188 = math.tanh %186 : vector<8x32xf32>
    %189 = arith.mulf %187, %188 : vector<8x32xf32>
    %190 = arith.truncf %189 : vector<8x32xf32> to vector<8x32xbf16>
    %191 = tpu.concatenate %190, %0 in 1 : vector<8x32xbf16>, vector<8x96xbf16> -> vector<8x128xbf16>
    %192 = arith.index_cast %169 : i32 to index
    %c0_46 = arith.constant 0 : index
    %193 = vector.load %arg10[%192, %c0_46] : memref<64x128xbf16, #tpu.memory_space<vmem>>, vector<8x128xbf16>
    tpu.vector_store %arg10[%192, %c0_46], %191 {strides = array<i32>} : memref<64x128xbf16, #tpu.memory_space<vmem>>, vector<8x128xbf16>,
    %c7_i32 = arith.constant 7 : i32
    %c8_i32_47 = arith.constant 8 : i32
    %194 = arith.muli %c7_i32, %c8_i32_47 : i32
    %195 = tpu.assume_multiple %194, 8 : i32
    %196 = arith.index_cast %195 : i32 to index
    %c0_48 = arith.constant 0 : index
    %197 = vector.load %arg9[%196, %c0_48] : memref<64x128xf32, #tpu.memory_space<vmem>>, vector<8x128xf32>
    %cst_49 = arith.constant dense<0.000000e+00> : vector<8x128xf32>
    %198 = tpu.matmul %190, %9, %cst_49 {dimension_numbers = #tpu.dot_dimension_numbers<[1], [0], [0], [1], [0, 0, 1, 1], [], []>} : vector<8x32xbf16>, vector<32x128xbf16>, vector<8x128xf32> -> vector<8x128xf32>
    %199 = arith.addf %197, %198 : vector<8x128xf32>
    %200 = vector.extract_strided_slice %199 {offsets = [0, 0], sizes = [8, 96], strides = [1, 1]} : vector<8x128xf32> to vector<8x96xf32>
    %201 = arith.negf %200 : vector<8x96xf32>
    %202 = math.exp %201 : vector<8x96xf32>
    %cst_50 = arith.constant 1.000000e+00 : f32
    %203 = vector.broadcast %cst_50 : f32 to vector<8x96xf32>
    %204 = arith.addf %203, %202 : vector<8x96xf32>
    %205 = arith.divf %203, %204 : vector<8x96xf32>
    %206 = vector.extract_strided_slice %199 {offsets = [0, 96], sizes = [8, 32], strides = [1, 1]} : vector<8x128xf32> to vector<8x32xf32>
    %207 = math.tanh %206 : vector<8x32xf32>
    %208 = vector.extract_strided_slice %205 {offsets = [0, 32], sizes = [8, 32], strides = [1, 1]} : vector<8x96xf32> to vector<8x32xf32>
    %209 = arith.mulf %208, %186 : vector<8x32xf32>
    %210 = vector.extract_strided_slice %205 {offsets = [0, 0], sizes = [8, 32], strides = [1, 1]} : vector<8x96xf32> to vector<8x32xf32>
    %211 = arith.mulf %210, %207 : vector<8x32xf32>
    %212 = arith.addf %209, %211 : vector<8x32xf32>
    %213 = vector.extract_strided_slice %205 {offsets = [0, 64], sizes = [8, 32], strides = [1, 1]} : vector<8x96xf32> to vector<8x32xf32>
    %214 = math.tanh %212 : vector<8x32xf32>
    %215 = arith.mulf %213, %214 : vector<8x32xf32>
    %216 = arith.truncf %215 : vector<8x32xf32> to vector<8x32xbf16>
    %217 = tpu.concatenate %216, %0 in 1 : vector<8x32xbf16>, vector<8x96xbf16> -> vector<8x128xbf16>
    %218 = arith.index_cast %195 : i32 to index
    %c0_51 = arith.constant 0 : index
    %219 = vector.load %arg10[%218, %c0_51] : memref<64x128xbf16, #tpu.memory_space<vmem>>, vector<8x128xbf16>
    tpu.vector_store %arg10[%218, %c0_51], %217 {strides = array<i32>} : memref<64x128xbf16, #tpu.memory_space<vmem>>, vector<8x128xbf16>,
    %c8_i32_52 = arith.constant 8 : i32
    %c0_53 = arith.constant 0 : index
    %c0_54 = arith.constant 0 : index
    %220 = vector.load %arg10[%c0_53, %c0_54] : memref<64x128xbf16, #tpu.memory_space<vmem>>, vector<64x128xbf16>
    %c0_55 = arith.constant 0 : index
    %c0_56 = arith.constant 0 : index
    %221 = vector.load %arg5[%c0_55, %c0_56] : memref<128x128xbf16, #tpu.memory_space<vmem>>, vector<128x128xbf16>
    %cst_57 = arith.constant dense<0.000000e+00> : vector<64x128xf32>
    %222 = tpu.matmul %220, %221, %cst_57 {dimension_numbers = #tpu.dot_dimension_numbers<[1], [0], [0], [1], [0, 0, 1, 1], [], []>} : vector<64x128xbf16>, vector<128x128xbf16>, vector<64x128xf32> -> vector<64x128xf32>
    %c0_58 = arith.constant 0 : index
    %c0_59 = arith.constant 0 : index
    %223 = vector.load %arg7[%c0_58, %c0_59] : memref<1x128xf32, #tpu.memory_space<vmem>>, vector<1x128xf32>
    %224 = vector.broadcast %223 : vector<1x128xf32> to vector<64x128xf32>
    %225 = arith.addf %222, %224 : vector<64x128xf32>
    %c0_60 = arith.constant 0 : index
    %c0_61 = arith.constant 0 : index
    %226 = vector.load %arg9[%c0_60, %c0_61] : memref<64x128xf32, #tpu.memory_space<vmem>>, vector<64x128xf32>
    tpu.vector_store %arg9[%c0_60, %c0_61], %225 {strides = array<i32>} : memref<64x128xf32, #tpu.memory_space<vmem>>, vector<64x128xf32>,
    %c0_62 = arith.constant 0 : index
    %c0_63 = arith.constant 0 : index
    %227 = vector.load %arg6[%c0_62, %c0_63] : memref<32x128xbf16, #tpu.memory_space<vmem>>, vector<32x128xbf16>
    %cst_64 = arith.constant 0.000000e+00 : f32
    %228 = vector.broadcast %cst_64 : f32 to vector<8x32xf32>
    %cst_65 = arith.constant 0.000000e+00 : bf16
    %229 = vector.broadcast %cst_65 : bf16 to vector<8x32xbf16>
    %cst_66 = arith.constant 0.000000e+00 : f32
    %230 = vector.broadcast %cst_66 : f32 to vector<8x32xf32>
    %c0_i32_67 = arith.constant 0 : i32
    %c8_i32_68 = arith.constant 8 : i32
    %231 = arith.muli %c0_i32_67, %c8_i32_68 : i32
    %232 = tpu.assume_multiple %231, 8 : i32
    %233 = arith.index_cast %232 : i32 to index
    %c0_69 = arith.constant 0 : index
    %234 = vector.load %arg9[%233, %c0_69] : memref<64x128xf32, #tpu.memory_space<vmem>>, vector<8x128xf32>
    %cst_70 = arith.constant dense<0.000000e+00> : vector<8x128xf32>
    %235 = tpu.matmul %229, %227, %cst_70 {dimension_numbers = #tpu.dot_dimension_numbers<[1], [0], [0], [1], [0, 0, 1, 1], [], []>} : vector<8x32xbf16>, vector<32x128xbf16>, vector<8x128xf32> -> vector<8x128xf32>
    %236 = arith.addf %234, %235 : vector<8x128xf32>
    %237 = vector.extract_strided_slice %236 {offsets = [0, 0], sizes = [8, 96], strides = [1, 1]} : vector<8x128xf32> to vector<8x96xf32>
    %238 = arith.negf %237 : vector<8x96xf32>
    %239 = math.exp %238 : vector<8x96xf32>
    %cst_71 = arith.constant 1.000000e+00 : f32
    %240 = vector.broadcast %cst_71 : f32 to vector<8x96xf32>
    %241 = arith.addf %240, %239 : vector<8x96xf32>
    %242 = arith.divf %240, %241 : vector<8x96xf32>
    %243 = vector.extract_strided_slice %236 {offsets = [0, 96], sizes = [8, 32], strides = [1, 1]} : vector<8x128xf32> to vector<8x32xf32>
    %244 = math.tanh %243 : vector<8x32xf32>
    %245 = vector.extract_strided_slice %242 {offsets = [0, 32], sizes = [8, 32], strides = [1, 1]} : vector<8x96xf32> to vector<8x32xf32>
    %246 = arith.mulf %245, %228 : vector<8x32xf32>
    %247 = vector.extract_strided_slice %242 {offsets = [0, 0], sizes = [8, 32], strides = [1, 1]} : vector<8x96xf32> to vector<8x32xf32>
    %248 = arith.mulf %247, %244 : vector<8x32xf32>
    %249 = arith.addf %246, %248 : vector<8x32xf32>
    %250 = vector.extract_strided_slice %242 {offsets = [0, 64], sizes = [8, 32], strides = [1, 1]} : vector<8x96xf32> to vector<8x32xf32>
    %251 = math.tanh %249 : vector<8x32xf32>
    %252 = arith.mulf %250, %251 : vector<8x32xf32>
    %253 = arith.truncf %252 : vector<8x32xf32> to vector<8x32xbf16>
    %c1_i32_72 = arith.constant 1 : i32
    %c8_i32_73 = arith.constant 8 : i32
    %254 = arith.muli %c1_i32_72, %c8_i32_73 : i32
    %255 = tpu.assume_multiple %254, 8 : i32
    %256 = arith.index_cast %255 : i32 to index
    %c0_74 = arith.constant 0 : index
    %257 = vector.load %arg9[%256, %c0_74] : memref<64x128xf32, #tpu.memory_space<vmem>>, vector<8x128xf32>
    %cst_75 = arith.constant dense<0.000000e+00> : vector<8x128xf32>
    %258 = tpu.matmul %253, %227, %cst_75 {dimension_numbers = #tpu.dot_dimension_numbers<[1], [0], [0], [1], [0, 0, 1, 1], [], []>} : vector<8x32xbf16>, vector<32x128xbf16>, vector<8x128xf32> -> vector<8x128xf32>
    %259 = arith.addf %257, %258 : vector<8x128xf32>
    %260 = vector.extract_strided_slice %259 {offsets = [0, 0], sizes = [8, 96], strides = [1, 1]} : vector<8x128xf32> to vector<8x96xf32>
    %261 = arith.negf %260 : vector<8x96xf32>
    %262 = math.exp %261 : vector<8x96xf32>
    %cst_76 = arith.constant 1.000000e+00 : f32
    %263 = vector.broadcast %cst_76 : f32 to vector<8x96xf32>
    %264 = arith.addf %263, %262 : vector<8x96xf32>
    %265 = arith.divf %263, %264 : vector<8x96xf32>
    %266 = vector.extract_strided_slice %259 {offsets = [0, 96], sizes = [8, 32], strides = [1, 1]} : vector<8x128xf32> to vector<8x32xf32>
    %267 = math.tanh %266 : vector<8x32xf32>
    %268 = vector.extract_strided_slice %265 {offsets = [0, 32], sizes = [8, 32], strides = [1, 1]} : vector<8x96xf32> to vector<8x32xf32>
    %269 = arith.mulf %268, %249 : vector<8x32xf32>
    %270 = vector.extract_strided_slice %265 {offsets = [0, 0], sizes = [8, 32], strides = [1, 1]} : vector<8x96xf32> to vector<8x32xf32>
    %271 = arith.mulf %270, %267 : vector<8x32xf32>
    %272 = arith.addf %269, %271 : vector<8x32xf32>
    %273 = vector.extract_strided_slice %265 {offsets = [0, 64], sizes = [8, 32], strides = [1, 1]} : vector<8x96xf32> to vector<8x32xf32>
    %274 = math.tanh %272 : vector<8x32xf32>
    %275 = arith.mulf %273, %274 : vector<8x32xf32>
    %276 = arith.truncf %275 : vector<8x32xf32> to vector<8x32xbf16>
    %c2_i32_77 = arith.constant 2 : i32
    %c8_i32_78 = arith.constant 8 : i32
    %277 = arith.muli %c2_i32_77, %c8_i32_78 : i32
    %278 = tpu.assume_multiple %277, 8 : i32
    %279 = arith.index_cast %278 : i32 to index
    %c0_79 = arith.constant 0 : index
    %280 = vector.load %arg9[%279, %c0_79] : memref<64x128xf32, #tpu.memory_space<vmem>>, vector<8x128xf32>
    %cst_80 = arith.constant dense<0.000000e+00> : vector<8x128xf32>
    %281 = tpu.matmul %276, %227, %cst_80 {dimension_numbers = #tpu.dot_dimension_numbers<[1], [0], [0], [1], [0, 0, 1, 1], [], []>} : vector<8x32xbf16>, vector<32x128xbf16>, vector<8x128xf32> -> vector<8x128xf32>
    %282 = arith.addf %280, %281 : vector<8x128xf32>
    %283 = vector.extract_strided_slice %282 {offsets = [0, 0], sizes = [8, 96], strides = [1, 1]} : vector<8x128xf32> to vector<8x96xf32>
    %284 = arith.negf %283 : vector<8x96xf32>
    %285 = math.exp %284 : vector<8x96xf32>
    %cst_81 = arith.constant 1.000000e+00 : f32
    %286 = vector.broadcast %cst_81 : f32 to vector<8x96xf32>
    %287 = arith.addf %286, %285 : vector<8x96xf32>
    %288 = arith.divf %286, %287 : vector<8x96xf32>
    %289 = vector.extract_strided_slice %282 {offsets = [0, 96], sizes = [8, 32], strides = [1, 1]} : vector<8x128xf32> to vector<8x32xf32>
    %290 = math.tanh %289 : vector<8x32xf32>
    %291 = vector.extract_strided_slice %288 {offsets = [0, 32], sizes = [8, 32], strides = [1, 1]} : vector<8x96xf32> to vector<8x32xf32>
    %292 = arith.mulf %291, %272 : vector<8x32xf32>
    %293 = vector.extract_strided_slice %288 {offsets = [0, 0], sizes = [8, 32], strides = [1, 1]} : vector<8x96xf32> to vector<8x32xf32>
    %294 = arith.mulf %293, %290 : vector<8x32xf32>
    %295 = arith.addf %292, %294 : vector<8x32xf32>
    %296 = vector.extract_strided_slice %288 {offsets = [0, 64], sizes = [8, 32], strides = [1, 1]} : vector<8x96xf32> to vector<8x32xf32>
    %297 = math.tanh %295 : vector<8x32xf32>
    %298 = arith.mulf %296, %297 : vector<8x32xf32>
    %299 = arith.truncf %298 : vector<8x32xf32> to vector<8x32xbf16>
    %c3_i32_82 = arith.constant 3 : i32
    %c8_i32_83 = arith.constant 8 : i32
    %300 = arith.muli %c3_i32_82, %c8_i32_83 : i32
    %301 = tpu.assume_multiple %300, 8 : i32
    %302 = arith.index_cast %301 : i32 to index
    %c0_84 = arith.constant 0 : index
    %303 = vector.load %arg9[%302, %c0_84] : memref<64x128xf32, #tpu.memory_space<vmem>>, vector<8x128xf32>
    %cst_85 = arith.constant dense<0.000000e+00> : vector<8x128xf32>
    %304 = tpu.matmul %299, %227, %cst_85 {dimension_numbers = #tpu.dot_dimension_numbers<[1], [0], [0], [1], [0, 0, 1, 1], [], []>} : vector<8x32xbf16>, vector<32x128xbf16>, vector<8x128xf32> -> vector<8x128xf32>
    %305 = arith.addf %303, %304 : vector<8x128xf32>
    %306 = vector.extract_strided_slice %305 {offsets = [0, 0], sizes = [8, 96], strides = [1, 1]} : vector<8x128xf32> to vector<8x96xf32>
    %307 = arith.negf %306 : vector<8x96xf32>
    %308 = math.exp %307 : vector<8x96xf32>
    %cst_86 = arith.constant 1.000000e+00 : f32
    %309 = vector.broadcast %cst_86 : f32 to vector<8x96xf32>
    %310 = arith.addf %309, %308 : vector<8x96xf32>
    %311 = arith.divf %309, %310 : vector<8x96xf32>
    %312 = vector.extract_strided_slice %305 {offsets = [0, 96], sizes = [8, 32], strides = [1, 1]} : vector<8x128xf32> to vector<8x32xf32>
    %313 = math.tanh %312 : vector<8x32xf32>
    %314 = vector.extract_strided_slice %311 {offsets = [0, 32], sizes = [8, 32], strides = [1, 1]} : vector<8x96xf32> to vector<8x32xf32>
    %315 = arith.mulf %314, %295 : vector<8x32xf32>
    %316 = vector.extract_strided_slice %311 {offsets = [0, 0], sizes = [8, 32], strides = [1, 1]} : vector<8x96xf32> to vector<8x32xf32>
    %317 = arith.mulf %316, %313 : vector<8x32xf32>
    %318 = arith.addf %315, %317 : vector<8x32xf32>
    %319 = vector.extract_strided_slice %311 {offsets = [0, 64], sizes = [8, 32], strides = [1, 1]} : vector<8x96xf32> to vector<8x32xf32>
    %320 = math.tanh %318 : vector<8x32xf32>
    %321 = arith.mulf %319, %320 : vector<8x32xf32>
    %322 = arith.truncf %321 : vector<8x32xf32> to vector<8x32xbf16>
    %c4_i32_87 = arith.constant 4 : i32
    %c8_i32_88 = arith.constant 8 : i32
    %323 = arith.muli %c4_i32_87, %c8_i32_88 : i32
    %324 = tpu.assume_multiple %323, 8 : i32
    %325 = arith.index_cast %324 : i32 to index
    %c0_89 = arith.constant 0 : index
    %326 = vector.load %arg9[%325, %c0_89] : memref<64x128xf32, #tpu.memory_space<vmem>>, vector<8x128xf32>
    %cst_90 = arith.constant dense<0.000000e+00> : vector<8x128xf32>
    %327 = tpu.matmul %322, %227, %cst_90 {dimension_numbers = #tpu.dot_dimension_numbers<[1], [0], [0], [1], [0, 0, 1, 1], [], []>} : vector<8x32xbf16>, vector<32x128xbf16>, vector<8x128xf32> -> vector<8x128xf32>
    %328 = arith.addf %326, %327 : vector<8x128xf32>
    %329 = vector.extract_strided_slice %328 {offsets = [0, 0], sizes = [8, 96], strides = [1, 1]} : vector<8x128xf32> to vector<8x96xf32>
    %330 = arith.negf %329 : vector<8x96xf32>
    %331 = math.exp %330 : vector<8x96xf32>
    %cst_91 = arith.constant 1.000000e+00 : f32
    %332 = vector.broadcast %cst_91 : f32 to vector<8x96xf32>
    %333 = arith.addf %332, %331 : vector<8x96xf32>
    %334 = arith.divf %332, %333 : vector<8x96xf32>
    %335 = vector.extract_strided_slice %328 {offsets = [0, 96], sizes = [8, 32], strides = [1, 1]} : vector<8x128xf32> to vector<8x32xf32>
    %336 = math.tanh %335 : vector<8x32xf32>
    %337 = vector.extract_strided_slice %334 {offsets = [0, 32], sizes = [8, 32], strides = [1, 1]} : vector<8x96xf32> to vector<8x32xf32>
    %338 = arith.mulf %337, %318 : vector<8x32xf32>
    %339 = vector.extract_strided_slice %334 {offsets = [0, 0], sizes = [8, 32], strides = [1, 1]} : vector<8x96xf32> to vector<8x32xf32>
    %340 = arith.mulf %339, %336 : vector<8x32xf32>
    %341 = arith.addf %338, %340 : vector<8x32xf32>
    %342 = vector.extract_strided_slice %334 {offsets = [0, 64], sizes = [8, 32], strides = [1, 1]} : vector<8x96xf32> to vector<8x32xf32>
    %343 = math.tanh %341 : vector<8x32xf32>
    %344 = arith.mulf %342, %343 : vector<8x32xf32>
    %345 = arith.truncf %344 : vector<8x32xf32> to vector<8x32xbf16>
    %c5_i32_92 = arith.constant 5 : i32
    %c8_i32_93 = arith.constant 8 : i32
    %346 = arith.muli %c5_i32_92, %c8_i32_93 : i32
    %347 = tpu.assume_multiple %346, 8 : i32
    %348 = arith.index_cast %347 : i32 to index
    %c0_94 = arith.constant 0 : index
    %349 = vector.load %arg9[%348, %c0_94] : memref<64x128xf32, #tpu.memory_space<vmem>>, vector<8x128xf32>
    %cst_95 = arith.constant dense<0.000000e+00> : vector<8x128xf32>
    %350 = tpu.matmul %345, %227, %cst_95 {dimension_numbers = #tpu.dot_dimension_numbers<[1], [0], [0], [1], [0, 0, 1, 1], [], []>} : vector<8x32xbf16>, vector<32x128xbf16>, vector<8x128xf32> -> vector<8x128xf32>
    %351 = arith.addf %349, %350 : vector<8x128xf32>
    %352 = vector.extract_strided_slice %351 {offsets = [0, 0], sizes = [8, 96], strides = [1, 1]} : vector<8x128xf32> to vector<8x96xf32>
    %353 = arith.negf %352 : vector<8x96xf32>
    %354 = math.exp %353 : vector<8x96xf32>
    %cst_96 = arith.constant 1.000000e+00 : f32
    %355 = vector.broadcast %cst_96 : f32 to vector<8x96xf32>
    %356 = arith.addf %355, %354 : vector<8x96xf32>
    %357 = arith.divf %355, %356 : vector<8x96xf32>
    %358 = vector.extract_strided_slice %351 {offsets = [0, 96], sizes = [8, 32], strides = [1, 1]} : vector<8x128xf32> to vector<8x32xf32>
    %359 = math.tanh %358 : vector<8x32xf32>
    %360 = vector.extract_strided_slice %357 {offsets = [0, 32], sizes = [8, 32], strides = [1, 1]} : vector<8x96xf32> to vector<8x32xf32>
    %361 = arith.mulf %360, %341 : vector<8x32xf32>
    %362 = vector.extract_strided_slice %357 {offsets = [0, 0], sizes = [8, 32], strides = [1, 1]} : vector<8x96xf32> to vector<8x32xf32>
    %363 = arith.mulf %362, %359 : vector<8x32xf32>
    %364 = arith.addf %361, %363 : vector<8x32xf32>
    %365 = vector.extract_strided_slice %357 {offsets = [0, 64], sizes = [8, 32], strides = [1, 1]} : vector<8x96xf32> to vector<8x32xf32>
    %366 = math.tanh %364 : vector<8x32xf32>
    %367 = arith.mulf %365, %366 : vector<8x32xf32>
    %368 = arith.truncf %367 : vector<8x32xf32> to vector<8x32xbf16>
    %c6_i32_97 = arith.constant 6 : i32
    %c8_i32_98 = arith.constant 8 : i32
    %369 = arith.muli %c6_i32_97, %c8_i32_98 : i32
    %370 = tpu.assume_multiple %369, 8 : i32
    %371 = arith.index_cast %370 : i32 to index
    %c0_99 = arith.constant 0 : index
    %372 = vector.load %arg9[%371, %c0_99] : memref<64x128xf32, #tpu.memory_space<vmem>>, vector<8x128xf32>
    %cst_100 = arith.constant dense<0.000000e+00> : vector<8x128xf32>
    %373 = tpu.matmul %368, %227, %cst_100 {dimension_numbers = #tpu.dot_dimension_numbers<[1], [0], [0], [1], [0, 0, 1, 1], [], []>} : vector<8x32xbf16>, vector<32x128xbf16>, vector<8x128xf32> -> vector<8x128xf32>
    %374 = arith.addf %372, %373 : vector<8x128xf32>
    %375 = vector.extract_strided_slice %374 {offsets = [0, 0], sizes = [8, 96], strides = [1, 1]} : vector<8x128xf32> to vector<8x96xf32>
    %376 = arith.negf %375 : vector<8x96xf32>
    %377 = math.exp %376 : vector<8x96xf32>
    %cst_101 = arith.constant 1.000000e+00 : f32
    %378 = vector.broadcast %cst_101 : f32 to vector<8x96xf32>
    %379 = arith.addf %378, %377 : vector<8x96xf32>
    %380 = arith.divf %378, %379 : vector<8x96xf32>
    %381 = vector.extract_strided_slice %374 {offsets = [0, 96], sizes = [8, 32], strides = [1, 1]} : vector<8x128xf32> to vector<8x32xf32>
    %382 = math.tanh %381 : vector<8x32xf32>
    %383 = vector.extract_strided_slice %380 {offsets = [0, 32], sizes = [8, 32], strides = [1, 1]} : vector<8x96xf32> to vector<8x32xf32>
    %384 = arith.mulf %383, %364 : vector<8x32xf32>
    %385 = vector.extract_strided_slice %380 {offsets = [0, 0], sizes = [8, 32], strides = [1, 1]} : vector<8x96xf32> to vector<8x32xf32>
    %386 = arith.mulf %385, %382 : vector<8x32xf32>
    %387 = arith.addf %384, %386 : vector<8x32xf32>
    %388 = vector.extract_strided_slice %380 {offsets = [0, 64], sizes = [8, 32], strides = [1, 1]} : vector<8x96xf32> to vector<8x32xf32>
    %389 = math.tanh %387 : vector<8x32xf32>
    %390 = arith.mulf %388, %389 : vector<8x32xf32>
    %391 = arith.truncf %390 : vector<8x32xf32> to vector<8x32xbf16>
    %c7_i32_102 = arith.constant 7 : i32
    %c8_i32_103 = arith.constant 8 : i32
    %392 = arith.muli %c7_i32_102, %c8_i32_103 : i32
    %393 = tpu.assume_multiple %392, 8 : i32
    %394 = arith.index_cast %393 : i32 to index
    %c0_104 = arith.constant 0 : index
    %395 = vector.load %arg9[%394, %c0_104] : memref<64x128xf32, #tpu.memory_space<vmem>>, vector<8x128xf32>
    %cst_105 = arith.constant dense<0.000000e+00> : vector<8x128xf32>
    %396 = tpu.matmul %391, %227, %cst_105 {dimension_numbers = #tpu.dot_dimension_numbers<[1], [0], [0], [1], [0, 0, 1, 1], [], []>} : vector<8x32xbf16>, vector<32x128xbf16>, vector<8x128xf32> -> vector<8x128xf32>
    %397 = arith.addf %395, %396 : vector<8x128xf32>
    %398 = vector.extract_strided_slice %397 {offsets = [0, 0], sizes = [8, 96], strides = [1, 1]} : vector<8x128xf32> to vector<8x96xf32>
    %399 = arith.negf %398 : vector<8x96xf32>
    %400 = math.exp %399 : vector<8x96xf32>
    %cst_106 = arith.constant 1.000000e+00 : f32
    %401 = vector.broadcast %cst_106 : f32 to vector<8x96xf32>
    %402 = arith.addf %401, %400 : vector<8x96xf32>
    %403 = arith.divf %401, %402 : vector<8x96xf32>
    %404 = vector.extract_strided_slice %397 {offsets = [0, 96], sizes = [8, 32], strides = [1, 1]} : vector<8x128xf32> to vector<8x32xf32>
    %405 = math.tanh %404 : vector<8x32xf32>
    %406 = vector.extract_strided_slice %403 {offsets = [0, 32], sizes = [8, 32], strides = [1, 1]} : vector<8x96xf32> to vector<8x32xf32>
    %407 = arith.mulf %406, %387 : vector<8x32xf32>
    %408 = vector.extract_strided_slice %403 {offsets = [0, 0], sizes = [8, 32], strides = [1, 1]} : vector<8x96xf32> to vector<8x32xf32>
    %409 = arith.mulf %408, %405 : vector<8x32xf32>
    %410 = arith.addf %407, %409 : vector<8x32xf32>
    %411 = vector.extract_strided_slice %403 {offsets = [0, 64], sizes = [8, 32], strides = [1, 1]} : vector<8x96xf32> to vector<8x32xf32>
    %412 = math.tanh %410 : vector<8x32xf32>
    %413 = arith.mulf %411, %412 : vector<8x32xf32>
    %414 = arith.truncf %413 : vector<8x32xf32> to vector<8x32xbf16>
    %c8_i32_107 = arith.constant 8 : i32
    %c0_108 = arith.constant 0 : index
    %c0_109 = arith.constant 0 : index
    %415 = vector.load %arg8[%c0_108, %c0_109] : memref<8x32xf32, #tpu.memory_space<vmem>>, vector<8x32xf32>
    tpu.vector_store %arg8[%c0_108, %c0_109], %413 {strides = array<i32>} : memref<8x32xf32, #tpu.memory_space<vmem>>, vector<8x32xf32>,
    return
  }
  func.func @transform_0(%arg0: i32) -> (i32, i32, i32) {
    %c0_i32 = arith.constant 0 : i32
    %c0_i32_0 = arith.constant 0 : i32
    %c0_i32_1 = arith.constant 0 : i32
    return %arg0, %c0_i32, %c0_i32_0 : i32, i32, i32
  }
  func.func @transform_1(%arg0: i32) -> (i32, i32) {
    %c0_i32 = arith.constant 0 : i32
    %c0_i32_0 = arith.constant 0 : i32
    %c0_i32_1 = arith.constant 0 : i32
    return %c0_i32, %c0_i32_0 : i32, i32
  }
  func.func @transform_2(%arg0: i32) -> (i32, i32) {
    %c0_i32 = arith.constant 0 : i32
    %c0_i32_0 = arith.constant 0 : i32
    %c0_i32_1 = arith.constant 0 : i32
    return %c0_i32, %c0_i32_0 : i32, i32
  }
  func.func @transform_3(%arg0: i32) -> (i32, i32) {
    %c0_i32 = arith.constant 0 : i32
    %c0_i32_0 = arith.constant 0 : i32
    %c0_i32_1 = arith.constant 0 : i32
    return %c0_i32, %c0_i32_0 : i32, i32
  }
  func.func @transform_4(%arg0: i32) -> (i32, i32) {
    %c0_i32 = arith.constant 0 : i32
    %c0_i32_0 = arith.constant 0 : i32
    %c0_i32_1 = arith.constant 0 : i32
    return %c0_i32, %c0_i32_0 : i32, i32
  }
  func.func @transform_5(%arg0: i32) -> (i32, i32) {
    %c0_i32 = arith.constant 0 : i32
    %c0_i32_0 = arith.constant 0 : i32
    %c0_i32_1 = arith.constant 0 : i32
    return %c0_i32, %c0_i32_0 : i32, i32
  }
  func.func @transform_6(%arg0: i32) -> (i32, i32) {
    %c0_i32 = arith.constant 0 : i32
    %c0_i32_0 = arith.constant 0 : i32
    %c0_i32_1 = arith.constant 0 : i32
    return %c0_i32, %c0_i32_0 : i32, i32
  }
  func.func @transform_7(%arg0: i32) -> (i32, i32) {
    %c0_i32 = arith.constant 0 : i32
    %c0_i32_0 = arith.constant 0 : i32
    return %arg0, %c0_i32 : i32, i32
  }
}

module attributes {stable_mosaic.version = 11 : i64} {
  func.func @_lstm_kernel(%arg0: i32, %arg1: memref<1x64x4xbf16, #tpu.memory_space<vmem>>, %arg2: memref<4x128xbf16, #tpu.memory_space<vmem>>, %arg3: memref<32x128xbf16, #tpu.memory_space<vmem>>, %arg4: memref<1x128xf32, #tpu.memory_space<vmem>>, %arg5: memref<128x128xbf16, #tpu.memory_space<vmem>>, %arg6: memref<32x128xbf16, #tpu.memory_space<vmem>>, %arg7: memref<1x128xf32, #tpu.memory_space<vmem>>, %arg8: memref<8x32xf32, #tpu.memory_space<vmem>>, %arg9: memref<64x128xf32, #tpu.memory_space<vmem>>, %arg10: memref<64x128xbf16, #tpu.memory_space<vmem>>) attributes {dimension_semantics = [#tpu.dimension_semantics<parallel>], iteration_bounds = array<i64: 1>, scalar_prefetch = 0 : i64, scratch_operands = 2 : i64, tpu.core_type = #tpu.core_type<tc>, window_params = [{transform_indices = @transform_0, window_bounds = array<i64: 1, 64, 4>}, {pipeline_mode = #tpu.pipeline_mode<synchronous>, transform_indices = @transform_1, window_bounds = array<i64: 4, 128>}, {pipeline_mode = #tpu.pipeline_mode<synchronous>, transform_indices = @transform_2, window_bounds = array<i64: 32, 128>}, {pipeline_mode = #tpu.pipeline_mode<synchronous>, transform_indices = @transform_3, window_bounds = array<i64: 1, 128>}, {pipeline_mode = #tpu.pipeline_mode<synchronous>, transform_indices = @transform_4, window_bounds = array<i64: 128, 128>}, {pipeline_mode = #tpu.pipeline_mode<synchronous>, transform_indices = @transform_5, window_bounds = array<i64: 32, 128>}, {pipeline_mode = #tpu.pipeline_mode<synchronous>, transform_indices = @transform_6, window_bounds = array<i64: 1, 128>}, {transform_indices = @transform_7, window_bounds = array<i64: 8, 32>}]} {
    %cst = arith.constant 0.000000e+00 : bf16
    %0 = vector.broadcast %cst : bf16 to vector<8x96xbf16>
    %c0 = arith.constant 0 : index
    %c0_0 = arith.constant 0 : index
    %c0_1 = arith.constant 0 : index
    %1 = vector.load %arg1[%c0, %c0_0, %c0_1] : memref<1x64x4xbf16, #tpu.memory_space<vmem>>, vector<1x64x4xbf16>
    %2 = vector.shape_cast %1 : vector<1x64x4xbf16> to vector<64x4xbf16>
    %c0_2 = arith.constant 0 : index
    %c0_3 = arith.constant 0 : index
    %3 = vector.load %arg2[%c0_2, %c0_3] : memref<4x128xbf16, #tpu.memory_space<vmem>>, vector<4x128xbf16>
    %cst_4 = arith.constant dense<0.000000e+00> : vector<64x128xf32>
    %4 = tpu.matmul %2, %3, %cst_4 {dimension_numbers = #tpu.dot_dimension_numbers<[1], [0], [0], [1], [0, 0, 1, 1], [], []>} : vector<64x4xbf16>, vector<4x128xbf16>, vector<64x128xf32> -> vector<64x128xf32>
    %c0_5 = arith.constant 0 : index
    %c0_6 = arith.constant 0 : index
    %5 = vector.load %arg4[%c0_5, %c0_6] : memref<1x128xf32, #tpu.memory_space<vmem>>, vector<1x128xf32>
    %6 = vector.broadcast %5 : vector<1x128xf32> to vector<64x128xf32>
    %7 = arith.addf %4, %6 : vector<64x128xf32>
    %c0_7 = arith.constant 0 : index
    %c0_8 = arith.constant 0 : index
    %8 = vector.load %arg9[%c0_7, %c0_8] : memref<64x128xf32, #tpu.memory_space<vmem>>, vector<64x128xf32>
    tpu.vector_store %arg9[%c0_7, %c0_8], %7 {strides = array<i32>} : memref<64x128xf32, #tpu.memory_space<vmem>>, vector<64x128xf32>,
    %c0_9 = arith.constant 0 : index
    %c0_10 = arith.constant 0 : index
    %9 = vector.load %arg3[%c0_9, %c0_10] : memref<32x128xbf16, #tpu.memory_space<vmem>>, vector<32x128xbf16>
    %cst_11 = arith.constant 0.000000e+00 : f32
    %10 = vector.broadcast %cst_11 : f32 to vector<8x32xf32>
    %cst_12 = arith.constant 0.000000e+00 : bf16
    %11 = vector.broadcast %cst_12 : bf16 to vector<8x32xbf16>
    %c0_i32 = arith.constant 0 : i32
    %c8_i32 = arith.constant 8 : i32
    %12 = arith.muli %c0_i32, %c8_i32 : i32
    %13 = tpu.assume_multiple %12, 8 : i32
    %14 = arith.index_cast %13 : i32 to index
    %c0_13 = arith.constant 0 : index
    %15 = vector.load %arg9[%14, %c0_13] : memref<64x128xf32, #tpu.memory_space<vmem>>, vector<8x128xf32>
    %cst_14 = arith.constant dense<0.000000e+00> : vector<8x128xf32>
    %16 = tpu.matmul %11, %9, %cst_14 {dimension_numbers = #tpu.dot_dimension_numbers<[1], [0], [0], [1], [0, 0, 1, 1], [], []>} : vector<8x32xbf16>, vector<32x128xbf16>, vector<8x128xf32> -> vector<8x128xf32>
    %17 = arith.addf %15, %16 : vector<8x128xf32>
    %18 = vector.extract_strided_slice %17 {offsets = [0, 0], sizes = [8, 96], strides = [1, 1]} : vector<8x128xf32> to vector<8x96xf32>
    %19 = arith.negf %18 : vector<8x96xf32>
    %20 = math.exp %19 : vector<8x96xf32>
    %cst_15 = arith.constant 1.000000e+00 : f32
    %21 = vector.broadcast %cst_15 : f32 to vector<8x96xf32>
    %22 = arith.addf %21, %20 : vector<8x96xf32>
    %23 = arith.divf %21, %22 : vector<8x96xf32>
    %24 = vector.extract_strided_slice %17 {offsets = [0, 96], sizes = [8, 32], strides = [1, 1]} : vector<8x128xf32> to vector<8x32xf32>
    %25 = math.tanh %24 : vector<8x32xf32>
    %26 = vector.extract_strided_slice %23 {offsets = [0, 32], sizes = [8, 32], strides = [1, 1]} : vector<8x96xf32> to vector<8x32xf32>
    %27 = arith.mulf %26, %10 : vector<8x32xf32>
    %28 = vector.extract_strided_slice %23 {offsets = [0, 0], sizes = [8, 32], strides = [1, 1]} : vector<8x96xf32> to vector<8x32xf32>
    %29 = arith.mulf %28, %25 : vector<8x32xf32>
    %30 = arith.addf %27, %29 : vector<8x32xf32>
    %31 = vector.extract_strided_slice %23 {offsets = [0, 64], sizes = [8, 32], strides = [1, 1]} : vector<8x96xf32> to vector<8x32xf32>
    %32 = math.tanh %30 : vector<8x32xf32>
    %33 = arith.mulf %31, %32 : vector<8x32xf32>
    %34 = arith.truncf %33 : vector<8x32xf32> to vector<8x32xbf16>
    %35 = tpu.concatenate %34, %0 in 1 : vector<8x32xbf16>, vector<8x96xbf16> -> vector<8x128xbf16>
    %36 = arith.index_cast %13 : i32 to index
    %c0_16 = arith.constant 0 : index
    %37 = vector.load %arg10[%36, %c0_16] : memref<64x128xbf16, #tpu.memory_space<vmem>>, vector<8x128xbf16>
    tpu.vector_store %arg10[%36, %c0_16], %35 {strides = array<i32>} : memref<64x128xbf16, #tpu.memory_space<vmem>>, vector<8x128xbf16>,
    %c1_i32 = arith.constant 1 : i32
    %c8_i32_17 = arith.constant 8 : i32
    %38 = arith.muli %c1_i32, %c8_i32_17 : i32
    %39 = tpu.assume_multiple %38, 8 : i32
    %40 = arith.index_cast %39 : i32 to index
    %c0_18 = arith.constant 0 : index
    %41 = vector.load %arg9[%40, %c0_18] : memref<64x128xf32, #tpu.memory_space<vmem>>, vector<8x128xf32>
    %cst_19 = arith.constant dense<0.000000e+00> : vector<8x128xf32>
    %42 = tpu.matmul %34, %9, %cst_19 {dimension_numbers = #tpu.dot_dimension_numbers<[1], [0], [0], [1], [0, 0, 1, 1], [], []>} : vector<8x32xbf16>, vector<32x128xbf16>, vector<8x128xf32> -> vector<8x128xf32>
    %43 = arith.addf %41, %42 : vector<8x128xf32>
    %44 = vector.extract_strided_slice %43 {offsets = [0, 0], sizes = [8, 96], strides = [1, 1]} : vector<8x128xf32> to vector<8x96xf32>
    %45 = arith.negf %44 : vector<8x96xf32>
    %46 = math.exp %45 : vector<8x96xf32>
    %cst_20 = arith.constant 1.000000e+00 : f32
    %47 = vector.broadcast %cst_20 : f32 to vector<8x96xf32>
    %48 = arith.addf %47, %46 : vector<8x96xf32>
    %49 = arith.divf %47, %48 : vector<8x96xf32>
    %50 = vector.extract_strided_slice %43 {offsets = [0, 96], sizes = [8, 32], strides = [1, 1]} : vector<8x128xf32> to vector<8x32xf32>
    %51 = math.tanh %50 : vector<8x32xf32>
    %52 = vector.extract_strided_slice %49 {offsets = [0, 32], sizes = [8, 32], strides = [1, 1]} : vector<8x96xf32> to vector<8x32xf32>
    %53 = arith.mulf %52, %30 : vector<8x32xf32>
    %54 = vector.extract_strided_slice %49 {offsets = [0, 0], sizes = [8, 32], strides = [1, 1]} : vector<8x96xf32> to vector<8x32xf32>
    %55 = arith.mulf %54, %51 : vector<8x32xf32>
    %56 = arith.addf %53, %55 : vector<8x32xf32>
    %57 = vector.extract_strided_slice %49 {offsets = [0, 64], sizes = [8, 32], strides = [1, 1]} : vector<8x96xf32> to vector<8x32xf32>
    %58 = math.tanh %56 : vector<8x32xf32>
    %59 = arith.mulf %57, %58 : vector<8x32xf32>
    %60 = arith.truncf %59 : vector<8x32xf32> to vector<8x32xbf16>
    %61 = tpu.concatenate %60, %0 in 1 : vector<8x32xbf16>, vector<8x96xbf16> -> vector<8x128xbf16>
    %62 = arith.index_cast %39 : i32 to index
    %c0_21 = arith.constant 0 : index
    %63 = vector.load %arg10[%62, %c0_21] : memref<64x128xbf16, #tpu.memory_space<vmem>>, vector<8x128xbf16>
    tpu.vector_store %arg10[%62, %c0_21], %61 {strides = array<i32>} : memref<64x128xbf16, #tpu.memory_space<vmem>>, vector<8x128xbf16>,
    %c2_i32 = arith.constant 2 : i32
    %c8_i32_22 = arith.constant 8 : i32
    %64 = arith.muli %c2_i32, %c8_i32_22 : i32
    %65 = tpu.assume_multiple %64, 8 : i32
    %66 = arith.index_cast %65 : i32 to index
    %c0_23 = arith.constant 0 : index
    %67 = vector.load %arg9[%66, %c0_23] : memref<64x128xf32, #tpu.memory_space<vmem>>, vector<8x128xf32>
    %cst_24 = arith.constant dense<0.000000e+00> : vector<8x128xf32>
    %68 = tpu.matmul %60, %9, %cst_24 {dimension_numbers = #tpu.dot_dimension_numbers<[1], [0], [0], [1], [0, 0, 1, 1], [], []>} : vector<8x32xbf16>, vector<32x128xbf16>, vector<8x128xf32> -> vector<8x128xf32>
    %69 = arith.addf %67, %68 : vector<8x128xf32>
    %70 = vector.extract_strided_slice %69 {offsets = [0, 0], sizes = [8, 96], strides = [1, 1]} : vector<8x128xf32> to vector<8x96xf32>
    %71 = arith.negf %70 : vector<8x96xf32>
    %72 = math.exp %71 : vector<8x96xf32>
    %cst_25 = arith.constant 1.000000e+00 : f32
    %73 = vector.broadcast %cst_25 : f32 to vector<8x96xf32>
    %74 = arith.addf %73, %72 : vector<8x96xf32>
    %75 = arith.divf %73, %74 : vector<8x96xf32>
    %76 = vector.extract_strided_slice %69 {offsets = [0, 96], sizes = [8, 32], strides = [1, 1]} : vector<8x128xf32> to vector<8x32xf32>
    %77 = math.tanh %76 : vector<8x32xf32>
    %78 = vector.extract_strided_slice %75 {offsets = [0, 32], sizes = [8, 32], strides = [1, 1]} : vector<8x96xf32> to vector<8x32xf32>
    %79 = arith.mulf %78, %56 : vector<8x32xf32>
    %80 = vector.extract_strided_slice %75 {offsets = [0, 0], sizes = [8, 32], strides = [1, 1]} : vector<8x96xf32> to vector<8x32xf32>
    %81 = arith.mulf %80, %77 : vector<8x32xf32>
    %82 = arith.addf %79, %81 : vector<8x32xf32>
    %83 = vector.extract_strided_slice %75 {offsets = [0, 64], sizes = [8, 32], strides = [1, 1]} : vector<8x96xf32> to vector<8x32xf32>
    %84 = math.tanh %82 : vector<8x32xf32>
    %85 = arith.mulf %83, %84 : vector<8x32xf32>
    %86 = arith.truncf %85 : vector<8x32xf32> to vector<8x32xbf16>
    %87 = tpu.concatenate %86, %0 in 1 : vector<8x32xbf16>, vector<8x96xbf16> -> vector<8x128xbf16>
    %88 = arith.index_cast %65 : i32 to index
    %c0_26 = arith.constant 0 : index
    %89 = vector.load %arg10[%88, %c0_26] : memref<64x128xbf16, #tpu.memory_space<vmem>>, vector<8x128xbf16>
    tpu.vector_store %arg10[%88, %c0_26], %87 {strides = array<i32>} : memref<64x128xbf16, #tpu.memory_space<vmem>>, vector<8x128xbf16>,
    %c3_i32 = arith.constant 3 : i32
    %c8_i32_27 = arith.constant 8 : i32
    %90 = arith.muli %c3_i32, %c8_i32_27 : i32
    %91 = tpu.assume_multiple %90, 8 : i32
    %92 = arith.index_cast %91 : i32 to index
    %c0_28 = arith.constant 0 : index
    %93 = vector.load %arg9[%92, %c0_28] : memref<64x128xf32, #tpu.memory_space<vmem>>, vector<8x128xf32>
    %cst_29 = arith.constant dense<0.000000e+00> : vector<8x128xf32>
    %94 = tpu.matmul %86, %9, %cst_29 {dimension_numbers = #tpu.dot_dimension_numbers<[1], [0], [0], [1], [0, 0, 1, 1], [], []>} : vector<8x32xbf16>, vector<32x128xbf16>, vector<8x128xf32> -> vector<8x128xf32>
    %95 = arith.addf %93, %94 : vector<8x128xf32>
    %96 = vector.extract_strided_slice %95 {offsets = [0, 0], sizes = [8, 96], strides = [1, 1]} : vector<8x128xf32> to vector<8x96xf32>
    %97 = arith.negf %96 : vector<8x96xf32>
    %98 = math.exp %97 : vector<8x96xf32>
    %cst_30 = arith.constant 1.000000e+00 : f32
    %99 = vector.broadcast %cst_30 : f32 to vector<8x96xf32>
    %100 = arith.addf %99, %98 : vector<8x96xf32>
    %101 = arith.divf %99, %100 : vector<8x96xf32>
    %102 = vector.extract_strided_slice %95 {offsets = [0, 96], sizes = [8, 32], strides = [1, 1]} : vector<8x128xf32> to vector<8x32xf32>
    %103 = math.tanh %102 : vector<8x32xf32>
    %104 = vector.extract_strided_slice %101 {offsets = [0, 32], sizes = [8, 32], strides = [1, 1]} : vector<8x96xf32> to vector<8x32xf32>
    %105 = arith.mulf %104, %82 : vector<8x32xf32>
    %106 = vector.extract_strided_slice %101 {offsets = [0, 0], sizes = [8, 32], strides = [1, 1]} : vector<8x96xf32> to vector<8x32xf32>
    %107 = arith.mulf %106, %103 : vector<8x32xf32>
    %108 = arith.addf %105, %107 : vector<8x32xf32>
    %109 = vector.extract_strided_slice %101 {offsets = [0, 64], sizes = [8, 32], strides = [1, 1]} : vector<8x96xf32> to vector<8x32xf32>
    %110 = math.tanh %108 : vector<8x32xf32>
    %111 = arith.mulf %109, %110 : vector<8x32xf32>
    %112 = arith.truncf %111 : vector<8x32xf32> to vector<8x32xbf16>
    %113 = tpu.concatenate %112, %0 in 1 : vector<8x32xbf16>, vector<8x96xbf16> -> vector<8x128xbf16>
    %114 = arith.index_cast %91 : i32 to index
    %c0_31 = arith.constant 0 : index
    %115 = vector.load %arg10[%114, %c0_31] : memref<64x128xbf16, #tpu.memory_space<vmem>>, vector<8x128xbf16>
    tpu.vector_store %arg10[%114, %c0_31], %113 {strides = array<i32>} : memref<64x128xbf16, #tpu.memory_space<vmem>>, vector<8x128xbf16>,
    %c4_i32 = arith.constant 4 : i32
    %c8_i32_32 = arith.constant 8 : i32
    %116 = arith.muli %c4_i32, %c8_i32_32 : i32
    %117 = tpu.assume_multiple %116, 8 : i32
    %118 = arith.index_cast %117 : i32 to index
    %c0_33 = arith.constant 0 : index
    %119 = vector.load %arg9[%118, %c0_33] : memref<64x128xf32, #tpu.memory_space<vmem>>, vector<8x128xf32>
    %cst_34 = arith.constant dense<0.000000e+00> : vector<8x128xf32>
    %120 = tpu.matmul %112, %9, %cst_34 {dimension_numbers = #tpu.dot_dimension_numbers<[1], [0], [0], [1], [0, 0, 1, 1], [], []>} : vector<8x32xbf16>, vector<32x128xbf16>, vector<8x128xf32> -> vector<8x128xf32>
    %121 = arith.addf %119, %120 : vector<8x128xf32>
    %122 = vector.extract_strided_slice %121 {offsets = [0, 0], sizes = [8, 96], strides = [1, 1]} : vector<8x128xf32> to vector<8x96xf32>
    %123 = arith.negf %122 : vector<8x96xf32>
    %124 = math.exp %123 : vector<8x96xf32>
    %cst_35 = arith.constant 1.000000e+00 : f32
    %125 = vector.broadcast %cst_35 : f32 to vector<8x96xf32>
    %126 = arith.addf %125, %124 : vector<8x96xf32>
    %127 = arith.divf %125, %126 : vector<8x96xf32>
    %128 = vector.extract_strided_slice %121 {offsets = [0, 96], sizes = [8, 32], strides = [1, 1]} : vector<8x128xf32> to vector<8x32xf32>
    %129 = math.tanh %128 : vector<8x32xf32>
    %130 = vector.extract_strided_slice %127 {offsets = [0, 32], sizes = [8, 32], strides = [1, 1]} : vector<8x96xf32> to vector<8x32xf32>
    %131 = arith.mulf %130, %108 : vector<8x32xf32>
    %132 = vector.extract_strided_slice %127 {offsets = [0, 0], sizes = [8, 32], strides = [1, 1]} : vector<8x96xf32> to vector<8x32xf32>
    %133 = arith.mulf %132, %129 : vector<8x32xf32>
    %134 = arith.addf %131, %133 : vector<8x32xf32>
    %135 = vector.extract_strided_slice %127 {offsets = [0, 64], sizes = [8, 32], strides = [1, 1]} : vector<8x96xf32> to vector<8x32xf32>
    %136 = math.tanh %134 : vector<8x32xf32>
    %137 = arith.mulf %135, %136 : vector<8x32xf32>
    %138 = arith.truncf %137 : vector<8x32xf32> to vector<8x32xbf16>
    %139 = tpu.concatenate %138, %0 in 1 : vector<8x32xbf16>, vector<8x96xbf16> -> vector<8x128xbf16>
    %140 = arith.index_cast %117 : i32 to index
    %c0_36 = arith.constant 0 : index
    %141 = vector.load %arg10[%140, %c0_36] : memref<64x128xbf16, #tpu.memory_space<vmem>>, vector<8x128xbf16>
    tpu.vector_store %arg10[%140, %c0_36], %139 {strides = array<i32>} : memref<64x128xbf16, #tpu.memory_space<vmem>>, vector<8x128xbf16>,
    %c5_i32 = arith.constant 5 : i32
    %c8_i32_37 = arith.constant 8 : i32
    %142 = arith.muli %c5_i32, %c8_i32_37 : i32
    %143 = tpu.assume_multiple %142, 8 : i32
    %144 = arith.index_cast %143 : i32 to index
    %c0_38 = arith.constant 0 : index
    %145 = vector.load %arg9[%144, %c0_38] : memref<64x128xf32, #tpu.memory_space<vmem>>, vector<8x128xf32>
    %cst_39 = arith.constant dense<0.000000e+00> : vector<8x128xf32>
    %146 = tpu.matmul %138, %9, %cst_39 {dimension_numbers = #tpu.dot_dimension_numbers<[1], [0], [0], [1], [0, 0, 1, 1], [], []>} : vector<8x32xbf16>, vector<32x128xbf16>, vector<8x128xf32> -> vector<8x128xf32>
    %147 = arith.addf %145, %146 : vector<8x128xf32>
    %148 = vector.extract_strided_slice %147 {offsets = [0, 0], sizes = [8, 96], strides = [1, 1]} : vector<8x128xf32> to vector<8x96xf32>
    %149 = arith.negf %148 : vector<8x96xf32>
    %150 = math.exp %149 : vector<8x96xf32>
    %cst_40 = arith.constant 1.000000e+00 : f32
    %151 = vector.broadcast %cst_40 : f32 to vector<8x96xf32>
    %152 = arith.addf %151, %150 : vector<8x96xf32>
    %153 = arith.divf %151, %152 : vector<8x96xf32>
    %154 = vector.extract_strided_slice %147 {offsets = [0, 96], sizes = [8, 32], strides = [1, 1]} : vector<8x128xf32> to vector<8x32xf32>
    %155 = math.tanh %154 : vector<8x32xf32>
    %156 = vector.extract_strided_slice %153 {offsets = [0, 32], sizes = [8, 32], strides = [1, 1]} : vector<8x96xf32> to vector<8x32xf32>
    %157 = arith.mulf %156, %134 : vector<8x32xf32>
    %158 = vector.extract_strided_slice %153 {offsets = [0, 0], sizes = [8, 32], strides = [1, 1]} : vector<8x96xf32> to vector<8x32xf32>
    %159 = arith.mulf %158, %155 : vector<8x32xf32>
    %160 = arith.addf %157, %159 : vector<8x32xf32>
    %161 = vector.extract_strided_slice %153 {offsets = [0, 64], sizes = [8, 32], strides = [1, 1]} : vector<8x96xf32> to vector<8x32xf32>
    %162 = math.tanh %160 : vector<8x32xf32>
    %163 = arith.mulf %161, %162 : vector<8x32xf32>
    %164 = arith.truncf %163 : vector<8x32xf32> to vector<8x32xbf16>
    %165 = tpu.concatenate %164, %0 in 1 : vector<8x32xbf16>, vector<8x96xbf16> -> vector<8x128xbf16>
    %166 = arith.index_cast %143 : i32 to index
    %c0_41 = arith.constant 0 : index
    %167 = vector.load %arg10[%166, %c0_41] : memref<64x128xbf16, #tpu.memory_space<vmem>>, vector<8x128xbf16>
    tpu.vector_store %arg10[%166, %c0_41], %165 {strides = array<i32>} : memref<64x128xbf16, #tpu.memory_space<vmem>>, vector<8x128xbf16>,
    %c6_i32 = arith.constant 6 : i32
    %c8_i32_42 = arith.constant 8 : i32
    %168 = arith.muli %c6_i32, %c8_i32_42 : i32
    %169 = tpu.assume_multiple %168, 8 : i32
    %170 = arith.index_cast %169 : i32 to index
    %c0_43 = arith.constant 0 : index
    %171 = vector.load %arg9[%170, %c0_43] : memref<64x128xf32, #tpu.memory_space<vmem>>, vector<8x128xf32>
    %cst_44 = arith.constant dense<0.000000e+00> : vector<8x128xf32>
    %172 = tpu.matmul %164, %9, %cst_44 {dimension_numbers = #tpu.dot_dimension_numbers<[1], [0], [0], [1], [0, 0, 1, 1], [], []>} : vector<8x32xbf16>, vector<32x128xbf16>, vector<8x128xf32> -> vector<8x128xf32>
    %173 = arith.addf %171, %172 : vector<8x128xf32>
    %174 = vector.extract_strided_slice %173 {offsets = [0, 0], sizes = [8, 96], strides = [1, 1]} : vector<8x128xf32> to vector<8x96xf32>
    %175 = arith.negf %174 : vector<8x96xf32>
    %176 = math.exp %175 : vector<8x96xf32>
    %cst_45 = arith.constant 1.000000e+00 : f32
    %177 = vector.broadcast %cst_45 : f32 to vector<8x96xf32>
    %178 = arith.addf %177, %176 : vector<8x96xf32>
    %179 = arith.divf %177, %178 : vector<8x96xf32>
    %180 = vector.extract_strided_slice %173 {offsets = [0, 96], sizes = [8, 32], strides = [1, 1]} : vector<8x128xf32> to vector<8x32xf32>
    %181 = math.tanh %180 : vector<8x32xf32>
    %182 = vector.extract_strided_slice %179 {offsets = [0, 32], sizes = [8, 32], strides = [1, 1]} : vector<8x96xf32> to vector<8x32xf32>
    %183 = arith.mulf %182, %160 : vector<8x32xf32>
    %184 = vector.extract_strided_slice %179 {offsets = [0, 0], sizes = [8, 32], strides = [1, 1]} : vector<8x96xf32> to vector<8x32xf32>
    %185 = arith.mulf %184, %181 : vector<8x32xf32>
    %186 = arith.addf %183, %185 : vector<8x32xf32>
    %187 = vector.extract_strided_slice %179 {offsets = [0, 64], sizes = [8, 32], strides = [1, 1]} : vector<8x96xf32> to vector<8x32xf32>
    %188 = math.tanh %186 : vector<8x32xf32>
    %189 = arith.mulf %187, %188 : vector<8x32xf32>
    %190 = arith.truncf %189 : vector<8x32xf32> to vector<8x32xbf16>
    %191 = tpu.concatenate %190, %0 in 1 : vector<8x32xbf16>, vector<8x96xbf16> -> vector<8x128xbf16>
    %192 = arith.index_cast %169 : i32 to index
    %c0_46 = arith.constant 0 : index
    %193 = vector.load %arg10[%192, %c0_46] : memref<64x128xbf16, #tpu.memory_space<vmem>>, vector<8x128xbf16>
    tpu.vector_store %arg10[%192, %c0_46], %191 {strides = array<i32>} : memref<64x128xbf16, #tpu.memory_space<vmem>>, vector<8x128xbf16>,
    %c7_i32 = arith.constant 7 : i32
    %c8_i32_47 = arith.constant 8 : i32
    %194 = arith.muli %c7_i32, %c8_i32_47 : i32
    %195 = tpu.assume_multiple %194, 8 : i32
    %196 = arith.index_cast %195 : i32 to index
    %c0_48 = arith.constant 0 : index
    %197 = vector.load %arg9[%196, %c0_48] : memref<64x128xf32, #tpu.memory_space<vmem>>, vector<8x128xf32>
    %cst_49 = arith.constant dense<0.000000e+00> : vector<8x128xf32>
    %198 = tpu.matmul %190, %9, %cst_49 {dimension_numbers = #tpu.dot_dimension_numbers<[1], [0], [0], [1], [0, 0, 1, 1], [], []>} : vector<8x32xbf16>, vector<32x128xbf16>, vector<8x128xf32> -> vector<8x128xf32>
    %199 = arith.addf %197, %198 : vector<8x128xf32>
    %200 = vector.extract_strided_slice %199 {offsets = [0, 0], sizes = [8, 96], strides = [1, 1]} : vector<8x128xf32> to vector<8x96xf32>
    %201 = arith.negf %200 : vector<8x96xf32>
    %202 = math.exp %201 : vector<8x96xf32>
    %cst_50 = arith.constant 1.000000e+00 : f32
    %203 = vector.broadcast %cst_50 : f32 to vector<8x96xf32>
    %204 = arith.addf %203, %202 : vector<8x96xf32>
    %205 = arith.divf %203, %204 : vector<8x96xf32>
    %206 = vector.extract_strided_slice %199 {offsets = [0, 96], sizes = [8, 32], strides = [1, 1]} : vector<8x128xf32> to vector<8x32xf32>
    %207 = math.tanh %206 : vector<8x32xf32>
    %208 = vector.extract_strided_slice %205 {offsets = [0, 32], sizes = [8, 32], strides = [1, 1]} : vector<8x96xf32> to vector<8x32xf32>
    %209 = arith.mulf %208, %186 : vector<8x32xf32>
    %210 = vector.extract_strided_slice %205 {offsets = [0, 0], sizes = [8, 32], strides = [1, 1]} : vector<8x96xf32> to vector<8x32xf32>
    %211 = arith.mulf %210, %207 : vector<8x32xf32>
    %212 = arith.addf %209, %211 : vector<8x32xf32>
    %213 = vector.extract_strided_slice %205 {offsets = [0, 64], sizes = [8, 32], strides = [1, 1]} : vector<8x96xf32> to vector<8x32xf32>
    %214 = math.tanh %212 : vector<8x32xf32>
    %215 = arith.mulf %213, %214 : vector<8x32xf32>
    %216 = arith.truncf %215 : vector<8x32xf32> to vector<8x32xbf16>
    %217 = tpu.concatenate %216, %0 in 1 : vector<8x32xbf16>, vector<8x96xbf16> -> vector<8x128xbf16>
    %218 = arith.index_cast %195 : i32 to index
    %c0_51 = arith.constant 0 : index
    %219 = vector.load %arg10[%218, %c0_51] : memref<64x128xbf16, #tpu.memory_space<vmem>>, vector<8x128xbf16>
    tpu.vector_store %arg10[%218, %c0_51], %217 {strides = array<i32>} : memref<64x128xbf16, #tpu.memory_space<vmem>>, vector<8x128xbf16>,
    %c8_i32_52 = arith.constant 8 : i32
    %c0_53 = arith.constant 0 : index
    %c0_54 = arith.constant 0 : index
    %220 = vector.load %arg10[%c0_53, %c0_54] : memref<64x128xbf16, #tpu.memory_space<vmem>>, vector<64x128xbf16>
    %c0_55 = arith.constant 0 : index
    %c0_56 = arith.constant 0 : index
    %221 = vector.load %arg5[%c0_55, %c0_56] : memref<128x128xbf16, #tpu.memory_space<vmem>>, vector<128x128xbf16>
    %cst_57 = arith.constant dense<0.000000e+00> : vector<64x128xf32>
    %222 = tpu.matmul %220, %221, %cst_57 {dimension_numbers = #tpu.dot_dimension_numbers<[1], [0], [0], [1], [0, 0, 1, 1], [], []>} : vector<64x128xbf16>, vector<128x128xbf16>, vector<64x128xf32> -> vector<64x128xf32>
    %c0_58 = arith.constant 0 : index
    %c0_59 = arith.constant 0 : index
    %223 = vector.load %arg7[%c0_58, %c0_59] : memref<1x128xf32, #tpu.memory_space<vmem>>, vector<1x128xf32>
    %224 = vector.broadcast %223 : vector<1x128xf32> to vector<64x128xf32>
    %225 = arith.addf %222, %224 : vector<64x128xf32>
    %c0_60 = arith.constant 0 : index
    %c0_61 = arith.constant 0 : index
    %226 = vector.load %arg9[%c0_60, %c0_61] : memref<64x128xf32, #tpu.memory_space<vmem>>, vector<64x128xf32>
    tpu.vector_store %arg9[%c0_60, %c0_61], %225 {strides = array<i32>} : memref<64x128xf32, #tpu.memory_space<vmem>>, vector<64x128xf32>,
    %c0_62 = arith.constant 0 : index
    %c0_63 = arith.constant 0 : index
    %227 = vector.load %arg6[%c0_62, %c0_63] : memref<32x128xbf16, #tpu.memory_space<vmem>>, vector<32x128xbf16>
    %cst_64 = arith.constant 0.000000e+00 : f32
    %228 = vector.broadcast %cst_64 : f32 to vector<8x32xf32>
    %cst_65 = arith.constant 0.000000e+00 : bf16
    %229 = vector.broadcast %cst_65 : bf16 to vector<8x32xbf16>
    %cst_66 = arith.constant 0.000000e+00 : f32
    %230 = vector.broadcast %cst_66 : f32 to vector<8x32xf32>
    %c0_i32_67 = arith.constant 0 : i32
    %c8_i32_68 = arith.constant 8 : i32
    %231 = arith.muli %c0_i32_67, %c8_i32_68 : i32
    %232 = tpu.assume_multiple %231, 8 : i32
    %233 = arith.index_cast %232 : i32 to index
    %c0_69 = arith.constant 0 : index
    %234 = vector.load %arg9[%233, %c0_69] : memref<64x128xf32, #tpu.memory_space<vmem>>, vector<8x128xf32>
    %cst_70 = arith.constant dense<0.000000e+00> : vector<8x128xf32>
    %235 = tpu.matmul %229, %227, %cst_70 {dimension_numbers = #tpu.dot_dimension_numbers<[1], [0], [0], [1], [0, 0, 1, 1], [], []>} : vector<8x32xbf16>, vector<32x128xbf16>, vector<8x128xf32> -> vector<8x128xf32>
    %236 = arith.addf %234, %235 : vector<8x128xf32>
    %237 = vector.extract_strided_slice %236 {offsets = [0, 0], sizes = [8, 96], strides = [1, 1]} : vector<8x128xf32> to vector<8x96xf32>
    %238 = arith.negf %237 : vector<8x96xf32>
    %239 = math.exp %238 : vector<8x96xf32>
    %cst_71 = arith.constant 1.000000e+00 : f32
    %240 = vector.broadcast %cst_71 : f32 to vector<8x96xf32>
    %241 = arith.addf %240, %239 : vector<8x96xf32>
    %242 = arith.divf %240, %241 : vector<8x96xf32>
    %243 = vector.extract_strided_slice %236 {offsets = [0, 96], sizes = [8, 32], strides = [1, 1]} : vector<8x128xf32> to vector<8x32xf32>
    %244 = math.tanh %243 : vector<8x32xf32>
    %245 = vector.extract_strided_slice %242 {offsets = [0, 32], sizes = [8, 32], strides = [1, 1]} : vector<8x96xf32> to vector<8x32xf32>
    %246 = arith.mulf %245, %228 : vector<8x32xf32>
    %247 = vector.extract_strided_slice %242 {offsets = [0, 0], sizes = [8, 32], strides = [1, 1]} : vector<8x96xf32> to vector<8x32xf32>
    %248 = arith.mulf %247, %244 : vector<8x32xf32>
    %249 = arith.addf %246, %248 : vector<8x32xf32>
    %250 = vector.extract_strided_slice %242 {offsets = [0, 64], sizes = [8, 32], strides = [1, 1]} : vector<8x96xf32> to vector<8x32xf32>
    %251 = math.tanh %249 : vector<8x32xf32>
    %252 = arith.mulf %250, %251 : vector<8x32xf32>
    %253 = arith.truncf %252 : vector<8x32xf32> to vector<8x32xbf16>
    %c1_i32_72 = arith.constant 1 : i32
    %c8_i32_73 = arith.constant 8 : i32
    %254 = arith.muli %c1_i32_72, %c8_i32_73 : i32
    %255 = tpu.assume_multiple %254, 8 : i32
    %256 = arith.index_cast %255 : i32 to index
    %c0_74 = arith.constant 0 : index
    %257 = vector.load %arg9[%256, %c0_74] : memref<64x128xf32, #tpu.memory_space<vmem>>, vector<8x128xf32>
    %cst_75 = arith.constant dense<0.000000e+00> : vector<8x128xf32>
    %258 = tpu.matmul %253, %227, %cst_75 {dimension_numbers = #tpu.dot_dimension_numbers<[1], [0], [0], [1], [0, 0, 1, 1], [], []>} : vector<8x32xbf16>, vector<32x128xbf16>, vector<8x128xf32> -> vector<8x128xf32>
    %259 = arith.addf %257, %258 : vector<8x128xf32>
    %260 = vector.extract_strided_slice %259 {offsets = [0, 0], sizes = [8, 96], strides = [1, 1]} : vector<8x128xf32> to vector<8x96xf32>
    %261 = arith.negf %260 : vector<8x96xf32>
    %262 = math.exp %261 : vector<8x96xf32>
    %cst_76 = arith.constant 1.000000e+00 : f32
    %263 = vector.broadcast %cst_76 : f32 to vector<8x96xf32>
    %264 = arith.addf %263, %262 : vector<8x96xf32>
    %265 = arith.divf %263, %264 : vector<8x96xf32>
    %266 = vector.extract_strided_slice %259 {offsets = [0, 96], sizes = [8, 32], strides = [1, 1]} : vector<8x128xf32> to vector<8x32xf32>
    %267 = math.tanh %266 : vector<8x32xf32>
    %268 = vector.extract_strided_slice %265 {offsets = [0, 32], sizes = [8, 32], strides = [1, 1]} : vector<8x96xf32> to vector<8x32xf32>
    %269 = arith.mulf %268, %249 : vector<8x32xf32>
    %270 = vector.extract_strided_slice %265 {offsets = [0, 0], sizes = [8, 32], strides = [1, 1]} : vector<8x96xf32> to vector<8x32xf32>
    %271 = arith.mulf %270, %267 : vector<8x32xf32>
    %272 = arith.addf %269, %271 : vector<8x32xf32>
    %273 = vector.extract_strided_slice %265 {offsets = [0, 64], sizes = [8, 32], strides = [1, 1]} : vector<8x96xf32> to vector<8x32xf32>
    %274 = math.tanh %272 : vector<8x32xf32>
    %275 = arith.mulf %273, %274 : vector<8x32xf32>
    %276 = arith.truncf %275 : vector<8x32xf32> to vector<8x32xbf16>
    %c2_i32_77 = arith.constant 2 : i32
    %c8_i32_78 = arith.constant 8 : i32
    %277 = arith.muli %c2_i32_77, %c8_i32_78 : i32
    %278 = tpu.assume_multiple %277, 8 : i32
    %279 = arith.index_cast %278 : i32 to index
    %c0_79 = arith.constant 0 : index
    %280 = vector.load %arg9[%279, %c0_79] : memref<64x128xf32, #tpu.memory_space<vmem>>, vector<8x128xf32>
    %cst_80 = arith.constant dense<0.000000e+00> : vector<8x128xf32>
    %281 = tpu.matmul %276, %227, %cst_80 {dimension_numbers = #tpu.dot_dimension_numbers<[1], [0], [0], [1], [0, 0, 1, 1], [], []>} : vector<8x32xbf16>, vector<32x128xbf16>, vector<8x128xf32> -> vector<8x128xf32>
    %282 = arith.addf %280, %281 : vector<8x128xf32>
    %283 = vector.extract_strided_slice %282 {offsets = [0, 0], sizes = [8, 96], strides = [1, 1]} : vector<8x128xf32> to vector<8x96xf32>
    %284 = arith.negf %283 : vector<8x96xf32>
    %285 = math.exp %284 : vector<8x96xf32>
    %cst_81 = arith.constant 1.000000e+00 : f32
    %286 = vector.broadcast %cst_81 : f32 to vector<8x96xf32>
    %287 = arith.addf %286, %285 : vector<8x96xf32>
    %288 = arith.divf %286, %287 : vector<8x96xf32>
    %289 = vector.extract_strided_slice %282 {offsets = [0, 96], sizes = [8, 32], strides = [1, 1]} : vector<8x128xf32> to vector<8x32xf32>
    %290 = math.tanh %289 : vector<8x32xf32>
    %291 = vector.extract_strided_slice %288 {offsets = [0, 32], sizes = [8, 32], strides = [1, 1]} : vector<8x96xf32> to vector<8x32xf32>
    %292 = arith.mulf %291, %272 : vector<8x32xf32>
    %293 = vector.extract_strided_slice %288 {offsets = [0, 0], sizes = [8, 32], strides = [1, 1]} : vector<8x96xf32> to vector<8x32xf32>
    %294 = arith.mulf %293, %290 : vector<8x32xf32>
    %295 = arith.addf %292, %294 : vector<8x32xf32>
    %296 = vector.extract_strided_slice %288 {offsets = [0, 64], sizes = [8, 32], strides = [1, 1]} : vector<8x96xf32> to vector<8x32xf32>
    %297 = math.tanh %295 : vector<8x32xf32>
    %298 = arith.mulf %296, %297 : vector<8x32xf32>
    %299 = arith.truncf %298 : vector<8x32xf32> to vector<8x32xbf16>
    %c3_i32_82 = arith.constant 3 : i32
    %c8_i32_83 = arith.constant 8 : i32
    %300 = arith.muli %c3_i32_82, %c8_i32_83 : i32
    %301 = tpu.assume_multiple %300, 8 : i32
    %302 = arith.index_cast %301 : i32 to index
    %c0_84 = arith.constant 0 : index
    %303 = vector.load %arg9[%302, %c0_84] : memref<64x128xf32, #tpu.memory_space<vmem>>, vector<8x128xf32>
    %cst_85 = arith.constant dense<0.000000e+00> : vector<8x128xf32>
    %304 = tpu.matmul %299, %227, %cst_85 {dimension_numbers = #tpu.dot_dimension_numbers<[1], [0], [0], [1], [0, 0, 1, 1], [], []>} : vector<8x32xbf16>, vector<32x128xbf16>, vector<8x128xf32> -> vector<8x128xf32>
    %305 = arith.addf %303, %304 : vector<8x128xf32>
    %306 = vector.extract_strided_slice %305 {offsets = [0, 0], sizes = [8, 96], strides = [1, 1]} : vector<8x128xf32> to vector<8x96xf32>
    %307 = arith.negf %306 : vector<8x96xf32>
    %308 = math.exp %307 : vector<8x96xf32>
    %cst_86 = arith.constant 1.000000e+00 : f32
    %309 = vector.broadcast %cst_86 : f32 to vector<8x96xf32>
    %310 = arith.addf %309, %308 : vector<8x96xf32>
    %311 = arith.divf %309, %310 : vector<8x96xf32>
    %312 = vector.extract_strided_slice %305 {offsets = [0, 96], sizes = [8, 32], strides = [1, 1]} : vector<8x128xf32> to vector<8x32xf32>
    %313 = math.tanh %312 : vector<8x32xf32>
    %314 = vector.extract_strided_slice %311 {offsets = [0, 32], sizes = [8, 32], strides = [1, 1]} : vector<8x96xf32> to vector<8x32xf32>
    %315 = arith.mulf %314, %295 : vector<8x32xf32>
    %316 = vector.extract_strided_slice %311 {offsets = [0, 0], sizes = [8, 32], strides = [1, 1]} : vector<8x96xf32> to vector<8x32xf32>
    %317 = arith.mulf %316, %313 : vector<8x32xf32>
    %318 = arith.addf %315, %317 : vector<8x32xf32>
    %319 = vector.extract_strided_slice %311 {offsets = [0, 64], sizes = [8, 32], strides = [1, 1]} : vector<8x96xf32> to vector<8x32xf32>
    %320 = math.tanh %318 : vector<8x32xf32>
    %321 = arith.mulf %319, %320 : vector<8x32xf32>
    %322 = arith.truncf %321 : vector<8x32xf32> to vector<8x32xbf16>
    %c4_i32_87 = arith.constant 4 : i32
    %c8_i32_88 = arith.constant 8 : i32
    %323 = arith.muli %c4_i32_87, %c8_i32_88 : i32
    %324 = tpu.assume_multiple %323, 8 : i32
    %325 = arith.index_cast %324 : i32 to index
    %c0_89 = arith.constant 0 : index
    %326 = vector.load %arg9[%325, %c0_89] : memref<64x128xf32, #tpu.memory_space<vmem>>, vector<8x128xf32>
    %cst_90 = arith.constant dense<0.000000e+00> : vector<8x128xf32>
    %327 = tpu.matmul %322, %227, %cst_90 {dimension_numbers = #tpu.dot_dimension_numbers<[1], [0], [0], [1], [0, 0, 1, 1], [], []>} : vector<8x32xbf16>, vector<32x128xbf16>, vector<8x128xf32> -> vector<8x128xf32>
    %328 = arith.addf %326, %327 : vector<8x128xf32>
    %329 = vector.extract_strided_slice %328 {offsets = [0, 0], sizes = [8, 96], strides = [1, 1]} : vector<8x128xf32> to vector<8x96xf32>
    %330 = arith.negf %329 : vector<8x96xf32>
    %331 = math.exp %330 : vector<8x96xf32>
    %cst_91 = arith.constant 1.000000e+00 : f32
    %332 = vector.broadcast %cst_91 : f32 to vector<8x96xf32>
    %333 = arith.addf %332, %331 : vector<8x96xf32>
    %334 = arith.divf %332, %333 : vector<8x96xf32>
    %335 = vector.extract_strided_slice %328 {offsets = [0, 96], sizes = [8, 32], strides = [1, 1]} : vector<8x128xf32> to vector<8x32xf32>
    %336 = math.tanh %335 : vector<8x32xf32>
    %337 = vector.extract_strided_slice %334 {offsets = [0, 32], sizes = [8, 32], strides = [1, 1]} : vector<8x96xf32> to vector<8x32xf32>
    %338 = arith.mulf %337, %318 : vector<8x32xf32>
    %339 = vector.extract_strided_slice %334 {offsets = [0, 0], sizes = [8, 32], strides = [1, 1]} : vector<8x96xf32> to vector<8x32xf32>
    %340 = arith.mulf %339, %336 : vector<8x32xf32>
    %341 = arith.addf %338, %340 : vector<8x32xf32>
    %342 = vector.extract_strided_slice %334 {offsets = [0, 64], sizes = [8, 32], strides = [1, 1]} : vector<8x96xf32> to vector<8x32xf32>
    %343 = math.tanh %341 : vector<8x32xf32>
    %344 = arith.mulf %342, %343 : vector<8x32xf32>
    %345 = arith.truncf %344 : vector<8x32xf32> to vector<8x32xbf16>
    %c5_i32_92 = arith.constant 5 : i32
    %c8_i32_93 = arith.constant 8 : i32
    %346 = arith.muli %c5_i32_92, %c8_i32_93 : i32
    %347 = tpu.assume_multiple %346, 8 : i32
    %348 = arith.index_cast %347 : i32 to index
    %c0_94 = arith.constant 0 : index
    %349 = vector.load %arg9[%348, %c0_94] : memref<64x128xf32, #tpu.memory_space<vmem>>, vector<8x128xf32>
    %cst_95 = arith.constant dense<0.000000e+00> : vector<8x128xf32>
    %350 = tpu.matmul %345, %227, %cst_95 {dimension_numbers = #tpu.dot_dimension_numbers<[1], [0], [0], [1], [0, 0, 1, 1], [], []>} : vector<8x32xbf16>, vector<32x128xbf16>, vector<8x128xf32> -> vector<8x128xf32>
    %351 = arith.addf %349, %350 : vector<8x128xf32>
    %352 = vector.extract_strided_slice %351 {offsets = [0, 0], sizes = [8, 96], strides = [1, 1]} : vector<8x128xf32> to vector<8x96xf32>
    %353 = arith.negf %352 : vector<8x96xf32>
    %354 = math.exp %353 : vector<8x96xf32>
    %cst_96 = arith.constant 1.000000e+00 : f32
    %355 = vector.broadcast %cst_96 : f32 to vector<8x96xf32>
    %356 = arith.addf %355, %354 : vector<8x96xf32>
    %357 = arith.divf %355, %356 : vector<8x96xf32>
    %358 = vector.extract_strided_slice %351 {offsets = [0, 96], sizes = [8, 32], strides = [1, 1]} : vector<8x128xf32> to vector<8x32xf32>
    %359 = math.tanh %358 : vector<8x32xf32>
    %360 = vector.extract_strided_slice %357 {offsets = [0, 32], sizes = [8, 32], strides = [1, 1]} : vector<8x96xf32> to vector<8x32xf32>
    %361 = arith.mulf %360, %341 : vector<8x32xf32>
    %362 = vector.extract_strided_slice %357 {offsets = [0, 0], sizes = [8, 32], strides = [1, 1]} : vector<8x96xf32> to vector<8x32xf32>
    %363 = arith.mulf %362, %359 : vector<8x32xf32>
    %364 = arith.addf %361, %363 : vector<8x32xf32>
    %365 = vector.extract_strided_slice %357 {offsets = [0, 64], sizes = [8, 32], strides = [1, 1]} : vector<8x96xf32> to vector<8x32xf32>
    %366 = math.tanh %364 : vector<8x32xf32>
    %367 = arith.mulf %365, %366 : vector<8x32xf32>
    %368 = arith.truncf %367 : vector<8x32xf32> to vector<8x32xbf16>
    %c6_i32_97 = arith.constant 6 : i32
    %c8_i32_98 = arith.constant 8 : i32
    %369 = arith.muli %c6_i32_97, %c8_i32_98 : i32
    %370 = tpu.assume_multiple %369, 8 : i32
    %371 = arith.index_cast %370 : i32 to index
    %c0_99 = arith.constant 0 : index
    %372 = vector.load %arg9[%371, %c0_99] : memref<64x128xf32, #tpu.memory_space<vmem>>, vector<8x128xf32>
    %cst_100 = arith.constant dense<0.000000e+00> : vector<8x128xf32>
    %373 = tpu.matmul %368, %227, %cst_100 {dimension_numbers = #tpu.dot_dimension_numbers<[1], [0], [0], [1], [0, 0, 1, 1], [], []>} : vector<8x32xbf16>, vector<32x128xbf16>, vector<8x128xf32> -> vector<8x128xf32>
    %374 = arith.addf %372, %373 : vector<8x128xf32>
    %375 = vector.extract_strided_slice %374 {offsets = [0, 0], sizes = [8, 96], strides = [1, 1]} : vector<8x128xf32> to vector<8x96xf32>
    %376 = arith.negf %375 : vector<8x96xf32>
    %377 = math.exp %376 : vector<8x96xf32>
    %cst_101 = arith.constant 1.000000e+00 : f32
    %378 = vector.broadcast %cst_101 : f32 to vector<8x96xf32>
    %379 = arith.addf %378, %377 : vector<8x96xf32>
    %380 = arith.divf %378, %379 : vector<8x96xf32>
    %381 = vector.extract_strided_slice %374 {offsets = [0, 96], sizes = [8, 32], strides = [1, 1]} : vector<8x128xf32> to vector<8x32xf32>
    %382 = math.tanh %381 : vector<8x32xf32>
    %383 = vector.extract_strided_slice %380 {offsets = [0, 32], sizes = [8, 32], strides = [1, 1]} : vector<8x96xf32> to vector<8x32xf32>
    %384 = arith.mulf %383, %364 : vector<8x32xf32>
    %385 = vector.extract_strided_slice %380 {offsets = [0, 0], sizes = [8, 32], strides = [1, 1]} : vector<8x96xf32> to vector<8x32xf32>
    %386 = arith.mulf %385, %382 : vector<8x32xf32>
    %387 = arith.addf %384, %386 : vector<8x32xf32>
    %388 = vector.extract_strided_slice %380 {offsets = [0, 64], sizes = [8, 32], strides = [1, 1]} : vector<8x96xf32> to vector<8x32xf32>
    %389 = math.tanh %387 : vector<8x32xf32>
    %390 = arith.mulf %388, %389 : vector<8x32xf32>
    %391 = arith.truncf %390 : vector<8x32xf32> to vector<8x32xbf16>
    %c7_i32_102 = arith.constant 7 : i32
    %c8_i32_103 = arith.constant 8 : i32
    %392 = arith.muli %c7_i32_102, %c8_i32_103 : i32
    %393 = tpu.assume_multiple %392, 8 : i32
    %394 = arith.index_cast %393 : i32 to index
    %c0_104 = arith.constant 0 : index
    %395 = vector.load %arg9[%394, %c0_104] : memref<64x128xf32, #tpu.memory_space<vmem>>, vector<8x128xf32>
    %cst_105 = arith.constant dense<0.000000e+00> : vector<8x128xf32>
    %396 = tpu.matmul %391, %227, %cst_105 {dimension_numbers = #tpu.dot_dimension_numbers<[1], [0], [0], [1], [0, 0, 1, 1], [], []>} : vector<8x32xbf16>, vector<32x128xbf16>, vector<8x128xf32> -> vector<8x128xf32>
    %397 = arith.addf %395, %396 : vector<8x128xf32>
    %398 = vector.extract_strided_slice %397 {offsets = [0, 0], sizes = [8, 96], strides = [1, 1]} : vector<8x128xf32> to vector<8x96xf32>
    %399 = arith.negf %398 : vector<8x96xf32>
    %400 = math.exp %399 : vector<8x96xf32>
    %cst_106 = arith.constant 1.000000e+00 : f32
    %401 = vector.broadcast %cst_106 : f32 to vector<8x96xf32>
    %402 = arith.addf %401, %400 : vector<8x96xf32>
    %403 = arith.divf %401, %402 : vector<8x96xf32>
    %404 = vector.extract_strided_slice %397 {offsets = [0, 96], sizes = [8, 32], strides = [1, 1]} : vector<8x128xf32> to vector<8x32xf32>
    %405 = math.tanh %404 : vector<8x32xf32>
    %406 = vector.extract_strided_slice %403 {offsets = [0, 32], sizes = [8, 32], strides = [1, 1]} : vector<8x96xf32> to vector<8x32xf32>
    %407 = arith.mulf %406, %387 : vector<8x32xf32>
    %408 = vector.extract_strided_slice %403 {offsets = [0, 0], sizes = [8, 32], strides = [1, 1]} : vector<8x96xf32> to vector<8x32xf32>
    %409 = arith.mulf %408, %405 : vector<8x32xf32>
    %410 = arith.addf %407, %409 : vector<8x32xf32>
    %411 = vector.extract_strided_slice %403 {offsets = [0, 64], sizes = [8, 32], strides = [1, 1]} : vector<8x96xf32> to vector<8x32xf32>
    %412 = math.tanh %410 : vector<8x32xf32>
    %413 = arith.mulf %411, %412 : vector<8x32xf32>
    %414 = arith.truncf %413 : vector<8x32xf32> to vector<8x32xbf16>
    %c8_i32_107 = arith.constant 8 : i32
    %c0_108 = arith.constant 0 : index
    %c0_109 = arith.constant 0 : index
    %415 = vector.load %arg8[%c0_108, %c0_109] : memref<8x32xf32, #tpu.memory_space<vmem>>, vector<8x32xf32>
    tpu.vector_store %arg8[%c0_108, %c0_109], %413 {strides = array<i32>} : memref<8x32xf32, #tpu.memory_space<vmem>>, vector<8x32xf32>,
    return
  }
  func.func @transform_0(%arg0: i32) -> (i32, i32, i32) {
    %c0_i32 = arith.constant 0 : i32
    %c0_i32_0 = arith.constant 0 : i32
    %c0_i32_1 = arith.constant 0 : i32
    return %arg0, %c0_i32, %c0_i32_0 : i32, i32, i32
  }
  func.func @transform_1(%arg0: i32) -> (i32, i32) {
    %c0_i32 = arith.constant 0 : i32
    %c0_i32_0 = arith.constant 0 : i32
    %c0_i32_1 = arith.constant 0 : i32
    return %c0_i32, %c0_i32_0 : i32, i32
  }
  func.func @transform_2(%arg0: i32) -> (i32, i32) {
    %c0_i32 = arith.constant 0 : i32
    %c0_i32_0 = arith.constant 0 : i32
    %c0_i32_1 = arith.constant 0 : i32
    return %c0_i32, %c0_i32_0 : i32, i32
  }
  func.func @transform_3(%arg0: i32) -> (i32, i32) {
    %c0_i32 = arith.constant 0 : i32
    %c0_i32_0 = arith.constant 0 : i32
    %c0_i32_1 = arith.constant 0 : i32
    return %c0_i32, %c0_i32_0 : i32, i32
  }
  func.func @transform_4(%arg0: i32) -> (i32, i32) {
    %c0_i32 = arith.constant 0 : i32
    %c0_i32_0 = arith.constant 0 : i32
    %c0_i32_1 = arith.constant 0 : i32
    return %c0_i32, %c0_i32_0 : i32, i32
  }
  func.func @transform_5(%arg0: i32) -> (i32, i32) {
    %c0_i32 = arith.constant 0 : i32
    %c0_i32_0 = arith.constant 0 : i32
    %c0_i32_1 = arith.constant 0 : i32
    return %c0_i32, %c0_i32_0 : i32, i32
  }
  func.func @transform_6(%arg0: i32) -> (i32, i32) {
    %c0_i32 = arith.constant 0 : i32
    %c0_i32_0 = arith.constant 0 : i32
    %c0_i32_1 = arith.constant 0 : i32
    return %c0_i32, %c0_i32_0 : i32, i32
  }
  func.func @transform_7(%arg0: i32) -> (i32, i32) {
    %c0_i32 = arith.constant 0 : i32
    %c0_i32_0 = arith.constant 0 : i32
    return %arg0, %c0_i32 : i32, i32
  }
}

</mosaic_0001>

<bundles_post_ra>
// kernel: tpu_custom_call.1
= control target key start
LH: loop header
LB: loop body
LE: loop exit
PB: predicated region body
PF: predicated region fallthrough
CT: control target
= control target key end

     0   :  { %12 = vsyncpa [#allocation5], 0  ;;  %s2422_s0 = inlined_call_operand.vmem [shape: bf16[1,64,4], index: 0, kind: input, shape index: {}]   ;;  %s2423_s1 = inlined_call_operand.vmem [shape: bf16[4,128], index: 1, kind: input, shape index: {}]   ;;  %s2424_s2 = inlined_call_operand.vmem [shape: bf16[32,128], index: 2, kind: input, shape index: {}]   ;;  %s2425_s3 = inlined_call_operand.vmem [shape: f32[1,128], index: 3, kind: input, shape index: {}]   ;;  %s2426_s4 = inlined_call_operand.hbm [shape: bf16[128,128], index: 4, kind: input, shape index: {}]   ;;  %s2427_s5 = inlined_call_operand.vmem [shape: bf16[32,128], index: 5, kind: input, shape index: {}]   ;;  %s2428_s6 = inlined_call_operand.vmem [shape: f32[1,128], index: 6, kind: input, shape index: {}]   ;;  %s2429_s7 = inlined_call_operand.hbm [shape: f32[8,32], index: 7, kind: output, shape index: {}]  }
   0x1   :  { %13 = vsyncpa [#allocation6], 0  ;;  %s2081_s24 = smov [#allocation4]  }
   0x2   :  { %s27_s25 = sshll.u32 %s2081_s24, 4  ;;  %s28_s25 = int_to_ptr.vmem [resolvable:$true] %s27_s25 }
   0x3   :  { %s2045_s26 = scalar_lea.vmem %s28_s25, 1024  ;;  %p2050_p1 = scmp.lt.s32.totalorder %s28_s25, %s28_s25 }
   0x4   :  { %p2046_p0 = scmp.ne.s32.totalorder %s28_s25, %s2045_s26  ;;  %p2051_p2 = scmp.lt.s32.totalorder %s2045_s26, %s2045_s26 }
   0x6   :  { %p2052_p3 = por %p2051_p2, %p2050_p1 }
   0x8   :  { %p2053_p4 = pnand %p2052_p3, %p2046_p0 }
   0xa   :  { %2056 = shalt.err (!%p2053_p4)
}
   0xb   :  { %s2082_s27 = smov 64   ;;  %s2083_s28 = smov 4  }
   0xc   :  { %33 = dma.hbm_to_vmem [thread:$0]  %s2426_s4, 1024, %s28_s25, [#allocation5], %s2082_s27, %s2082_s27, %s2083_s28  }
   0xd   :  { %2077 = dma.done.wait [#allocation5], 1024  }
   0xe   :  { %2078 = vsyncadd [#allocation5], 4294966272  ;;  %v2084_v0 = vmov 0.0   ;;  %vm2085_vm0 = vmmov 0   ;;  %vm91_vm1 = vcmask 1041408   ;;  %vm78_vm2 = vcmask 31744  }
   0xf   :  { %1728 = vmatprep.subr.bf16.mxu1 %v2084_v0  ;;  %1732 = vmatprep.mubr.msk.bf16.mxu1 %vm2085_vm0, %v2084_v0  ;;  %v50_v1 = vld [vmem:[%s2423_s1] sm:$0x3]  ;;  %v2143_v3 = vld [vmem:[%s2424_s2 + $0x8] sm:$0xff]   ;;  %v2086_v7 = vmov 0   ;;  %s2087_s17 = smov 32   ;;  %vm185_vm3 = vcmask 261120  }
  0x10   :  { %1880 = vmatprep.subr.msk.bf16.mxu0 %vm91_vm1, %v50_v1  ;;  %v93_v2 = vsel %vm91_vm1, %v50_v1, 0  ;;  %v1890_v4 = vld [vmem:[%s2422_s0] sm:$0xff]   ;;  %1729 = vmatpush3.bf16.msra.mxu1 %v2143_v3  ;;  %v1891_v5 = vld [vmem:[%s2422_s0 + $0x8] sm:$0xff]   ;;  %v1893_v51 = vld [vmem:[%s2422_s0 + $0x10] sm:$0xff]  }
  0x11   :  { %1719 = vmatpush3.bf16.msra.mxu0 %v93_v2  ;;  %1720 = vmatprep.mubr.msk.bf16.mxu0 %vm78_vm2, %v1890_v4  ;;  %v2158_v6 = vld [vmem:[%s2424_s2] sm:$0xff]   ;;  %v1894_v52 = vld [vmem:[%s2422_s0 + $0x18] sm:$0xff]  }
  0x12   :  { %1744 = vmatprep.subr.bf16.mxu0 %v2084_v0  ;;  %1730 = vmatprep.subr.bf16.mxu1 %v2084_v0  ;;  %v2179_v9 = vld [vmem:[%s2425_s3] ss:$0 sm:$0xff] }
  0x14   :  { %1721 = vmatmul.mubr.msk.bf16.vlgmr.msra.gmra.mxu0 %vm78_vm2, %v1891_v5  ;;  %1731 = vmatpush3.bf16.msra.mxu1 %v2158_v6 }
  0x15   :  { %1745 = vmatpush3.bf16.msra.mxu0 %v2143_v3  ;;  %1736 = vmatprep.subr.bf16.mxu1 %v2084_v0 }
  0x16   :  { %1746 = vmatprep.subr.bf16.mxu0 %v2084_v0  ;;  %1724 = vmatprep.mubr.msk.bf16.mxu0 %vm78_vm2, %v1893_v51 }
  0x17   :  { %1733 = vmatmul.mubr.bf16.vlgmr.msra.gmra.mxu1 %v2086_v7 }
  0x18   :  { %1737 = vmatpush3.bf16.msra.mxu1 %v2143_v3  ;;  %1740 = vmatprep.mubr.msk.bf16.mxu1 %vm2085_vm0, %v2084_v0 }
  0x19   :  { %1747 = vmatpush3.bf16.msra.mxu0 %v2158_v6  ;;  %1738 = vmatprep.subr.bf16.mxu1 %v2084_v0 }
  0x1a   :  { %1760 = vmatprep.subr.bf16.mxu0 %v2084_v0 }
  0x1c   :  { %1739 = vmatpush3.bf16.msra.mxu1 %v2158_v6  ;;  %1725 = vmatmul.mubr.msk.bf16.gmra.mxu0 %vm78_vm2, %v1894_v52 }
  0x1d   :  { %1752 = vmatprep.subr.bf16.mxu1 %v2084_v0  ;;  %1748 = vmatprep.mubr.msk.bf16.mxu0 %vm2085_vm0, %v2084_v0 }
  0xd4   :  { %v2174_v8 = vpop.f32.mrf.mxu0 }
  0xd5   :  { %v138_v63 = vadd.f32 %v2174_v8, %v2179_v9 }
  0xd6   :  { %v129_v10 = vpop.f32.mrf.mxu0 }
  0xd7   :  { %v130_v11 = vadd.f32 %v2179_v9, %v129_v10  ;;  %v223_v12 = vpop.f32.mrf.mxu1 }
  0xd8   :  { %v2194_v33 = vpop.f32.mrf.mxu0 }
  0xd9   :  { %v229_v13 = vadd.f32 %v223_v12, %v130_v11  ;;  %v1734_v14 = vpop.f32.mrf.mxu1 }
  0xda   :  { %v132_v34 = vpop.f32.mrf.mxu0 }
  0xdb   :  { %1909 = vtanh.f32 %v229_v13  ;;  %v226_v15 = vpop.f32.mrf.mxu1  ;;  %v1608_v18 = vmul.f32 -1.442695, %v229_v13  ;;  %v133_v35 = vadd.f32 %v2179_v9, %v132_v34 }
  0xdc   :  { %v2219_v59 = vpop.f32.mrf.mxu0 }
  0xdd   :  { %v1735_v16 = vpop.f32.mrf.mxu1  ;;  %1911 = vpow2.f32 %v1608_v18 }
  0xde   :  { %v2221_v60 = vpop.f32.mrf.mxu0 }
  0xe0   :  { %v2223_v61 = vpop.f32.mrf.mxu0 }
  0xe2   :  { %v2225_v62 = vpop.f32.mrf.mxu0 }
  0xe8   :  { %v1910_v17 = vpop.eup %1909 }
  0xe9   :  { %239 = vrot.lane.b32.xlu0 %v1910_v17, %s2087_s17 }
  0xea   :  { %v1912_v19 = vpop.eup %1911 }
  0xeb   :  { %v233_v20 = vadd.f32 1.0, %v1912_v19 }
  0xed   :  { %1913 = vrcp.f32 %v233_v20 }
  0xfa   :  { %v1914_v21 = vpop.eup %1913 }
  0xfb   :  { %v237_v24 = vmul.f32 0.0, %v1914_v21 }
 0x15b   :  { %v240_v22 = vpop.permute.xlu0 %239 }
 0x15c   :  { %v242_v23 = vmul.f32 %v1914_v21, %v240_v22 }
 0x15e   :  { %244 = vrot.lane.b32.xlu0 %v242_v23, %s2087_s17 }
 0x1d0   :  { %v245_v25 = vpop.permute.xlu0 %244 }
 0x1d1   :  { %v247_v26 = vadd.f32 %v245_v25, %v237_v24 }
 0x1d3   :  { %1915 = vtanh.f32 %v247_v26 }
 0x1e0   :  { %v1916_v27 = vpop.eup %1915 }
 0x1e1   :  { %250 = vrot.lane.b32.xlu1 %v1916_v27, %s2087_s17 }
 0x253   :  { %v251_v28 = vpop.permute.xlu1 %250 }
 0x254   :  { %v253_v29 = vmul.f32 %v1914_v21, %v251_v28 }
 0x256   :  { %v254_v30 = vpack.c.bf16 %v253_v29, %v253_v29 }
 0x258   :  { %256 = vrot.lane.b32.xlu1 %v254_v30, %s2082_s27 }
 0x2ca   :  { %v257_v31 = vpop.permute.xlu1 %256 }
 0x2cb   :  { %v259_v32 = vsel %vm185_vm3, %v257_v31, 0  ;;  %1741 = vmatmul.mubr.msk.bf16.vlgmr.msra.gmra.mxu1 %vm185_vm3, %v257_v31 }
 0x2cc   :  { %261 = vst [vmem:[#allocation3] sm:$0xf] %v259_v32  ;;  %1753 = vmatpush3.bf16.msra.mxu1 %v2143_v3  ;;  %1756 = vmatprep.mubr.msk.bf16.mxu1 %vm2085_vm0, %v2084_v0 }
 0x2cd   :  { %1754 = vmatprep.subr.bf16.mxu1 %v2084_v0 }
 0x2d0   :  { %1755 = vmatpush3.bf16.msra.mxu1 %v2158_v6 }
 0x2d1   :  { %1768 = vmatprep.subr.bf16.mxu1 %v2084_v0 }
 0x38b   :  { %v300_v36 = vpop.f32.mrf.mxu1 }
 0x38c   :  { %v306_v37 = vadd.f32 %v300_v36, %v133_v35 }
 0x38d   :  { %v1742_v38 = vpop.f32.mrf.mxu1 }
 0x38e   :  { %1917 = vtanh.f32 %v306_v37  ;;  %v1610_v42 = vmul.f32 -1.442695, %v306_v37 }
 0x38f   :  { %v303_v39 = vpop.f32.mrf.mxu1 }
 0x390   :  { %1919 = vpow2.f32 %v1610_v42 }
 0x391   :  { %v1743_v40 = vpop.f32.mrf.mxu1 }
 0x39b   :  { %v1918_v41 = vpop.eup %1917 }
 0x39c   :  { %316 = vrot.lane.b32.xlu0 %v1918_v41, %s2087_s17 }
 0x39d   :  { %v1920_v43 = vpop.eup %1919 }
 0x39e   :  { %v310_v44 = vadd.f32 1.0, %v1920_v43 }
 0x3a0   :  { %1921 = vrcp.f32 %v310_v44 }
 0x3ad   :  { %v1922_v45 = vpop.eup %1921 }
 0x3ae   :  { %v314_v48 = vmul.f32 %v1922_v45, %v247_v26  ;;  %v141_v26 = vadd.f32 %v2194_v33, %v2179_v9 }
 0x40e   :  { %v317_v46 = vpop.permute.xlu0 %316 }
 0x40f   :  { %v319_v47 = vmul.f32 %v1922_v45, %v317_v46 }
 0x411   :  { %321 = vrot.lane.b32.xlu1 %v319_v47, %s2087_s17 }
 0x483   :  { %v322_v49 = vpop.permute.xlu1 %321 }
 0x484   :  { %v324_v50 = vadd.f32 %v322_v49, %v314_v48  ;;  %v146_v48 = vadd.f32 %v2179_v9, %v2221_v60 }
 0x486   :  { %1923 = vtanh.f32 %v324_v50 }
 0x493   :  { %v1924_v53 = vpop.eup %1923 }
 0x494   :  { %327 = vrot.lane.b32.xlu0 %v1924_v53, %s2087_s17 }
 0x506   :  { %v328_v54 = vpop.permute.xlu0 %327 }
 0x507   :  { %v330_v55 = vmul.f32 %v1922_v45, %v328_v54 }
 0x509   :  { %v331_v56 = vpack.c.bf16 %v330_v55, %v330_v55 }
 0x50b   :  { %333 = vrot.lane.b32.xlu1 %v331_v56, %s2082_s27 }
 0x57d   :  { %v334_v57 = vpop.permute.xlu1 %333 }
 0x57e   :  { %v336_v58 = vsel %vm185_vm3, %v334_v57, 0  ;;  %1749 = vmatmul.mubr.msk.bf16.vlgmr.msra.gmra.mxu0 %vm185_vm3, %v334_v57 }
 0x57f   :  { %339 = vst [vmem:[#allocation3 + $0x4] sm:$0xf] %v336_v58  ;;  %1761 = vmatpush3.bf16.msra.mxu0 %v2143_v3  ;;  %1764 = vmatprep.mubr.msk.bf16.mxu0 %vm2085_vm0, %v2084_v0 }
 0x580   :  { %1762 = vmatprep.subr.bf16.mxu0 %v2084_v0 }
 0x583   :  { %1763 = vmatpush3.bf16.msra.mxu0 %v2158_v6 }
 0x584   :  { %1776 = vmatprep.subr.bf16.mxu0 %v2084_v0 }
 0x63e   :  { %v378_v1 = vpop.f32.mrf.mxu0 }
 0x63f   :  { %v384_v2 = vadd.f32 %v378_v1, %v138_v63 }
 0x640   :  { %v1750_v4 = vpop.f32.mrf.mxu0 }
 0x641   :  { %1925 = vtanh.f32 %v384_v2  ;;  %v1612_v12 = vmul.f32 -1.442695, %v384_v2 }
 0x642   :  { %v381_v5 = vpop.f32.mrf.mxu0 }
 0x643   :  { %1927 = vpow2.f32 %v1612_v12 }
 0x644   :  { %v1751_v10 = vpop.f32.mrf.mxu0 }
 0x64e   :  { %v1926_v11 = vpop.eup %1925 }
 0x64f   :  { %394 = vrot.lane.b32.xlu0 %v1926_v11, %s2087_s17 }
 0x650   :  { %v1928_v13 = vpop.eup %1927 }
 0x651   :  { %v388_v14 = vadd.f32 1.0, %v1928_v13 }
 0x653   :  { %1929 = vrcp.f32 %v388_v14 }
 0x660   :  { %v1930_v15 = vpop.eup %1929 }
 0x661   :  { %v392_v8 = vmul.f32 %v1930_v15, %v324_v50 }
 0x6c1   :  { %v395_v16 = vpop.permute.xlu0 %394 }
 0x6c2   :  { %v397_v17 = vmul.f32 %v1930_v15, %v395_v16 }
 0x6c4   :  { %399 = vrot.lane.b32.xlu1 %v397_v17, %s2087_s17 }
 0x736   :  { %v400_v18 = vpop.permute.xlu1 %399 }
 0x737   :  { %v402_v19 = vadd.f32 %v400_v18, %v392_v8 }
 0x739   :  { %1931 = vtanh.f32 %v402_v19 }
 0x746   :  { %v1932_v20 = vpop.eup %1931 }
 0x747   :  { %405 = vrot.lane.b32.xlu0 %v1932_v20, %s2087_s17 }
 0x7b9   :  { %v406_v21 = vpop.permute.xlu0 %405 }
 0x7ba   :  { %v408_v22 = vmul.f32 %v1930_v15, %v406_v21  ;;  %v149_v15 = vadd.f32 %v2179_v9, %v2225_v62 }
 0x7bc   :  { %v409_v23 = vpack.c.bf16 %v408_v22, %v408_v22 }
 0x7be   :  { %411 = vrot.lane.b32.xlu1 %v409_v23, %s2082_s27 }
 0x830   :  { %v412_v24 = vpop.permute.xlu1 %411 }
 0x831   :  { %v414_v25 = vsel %vm185_vm3, %v412_v24, 0  ;;  %1757 = vmatmul.mubr.msk.bf16.vlgmr.msra.gmra.mxu1 %vm185_vm3, %v412_v24 }
 0x832   :  { %417 = vst [vmem:[#allocation3 + $0x8] sm:$0xf] %v414_v25  ;;  %1769 = vmatpush3.bf16.msra.mxu1 %v2143_v3  ;;  %1772 = vmatprep.mubr.msk.bf16.mxu1 %vm2085_vm0, %v2084_v0 }
 0x833   :  { %1770 = vmatprep.subr.bf16.mxu1 %v2084_v0 }
 0x836   :  { %1771 = vmatpush3.bf16.msra.mxu1 %v2158_v6 }
 0x837   :  { %1784 = vmatprep.subr.bf16.mxu1 %v2084_v0 }
 0x8f1   :  { %v456_v27 = vpop.f32.mrf.mxu1 }
 0x8f2   :  { %v462_v28 = vadd.f32 %v456_v27, %v141_v26  ;;  %v1895_v27 = vld [vmem:[#allocation4 + $0x38] sm:$0xff]  }
 0x8f3   :  { %v1758_v29 = vpop.f32.mrf.mxu1 }
 0x8f4   :  { %1933 = vtanh.f32 %v462_v28  ;;  %v1614_v34 = vmul.f32 -1.442695, %v462_v28 }
 0x8f5   :  { %v459_v30 = vpop.f32.mrf.mxu1 }
 0x8f6   :  { %1935 = vpow2.f32 %v1614_v34 }
 0x8f7   :  { %v1759_v31 = vpop.f32.mrf.mxu1 }
 0x901   :  { %v1934_v32 = vpop.eup %1933 }
 0x902   :  { %472 = vrot.lane.b32.xlu0 %v1934_v32, %s2087_s17  ;;  %v1897_v32 = vld [vmem:[#allocation4 + $0x30] sm:$0xff]  }
 0x903   :  { %v1936_v35 = vpop.eup %1935 }
 0x904   :  { %v466_v36 = vadd.f32 1.0, %v1936_v35  ;;  %v1896_v35 = vld [vmem:[#allocation3] sm:$0xff]  }
 0x906   :  { %1937 = vrcp.f32 %v466_v36 }
 0x913   :  { %v1938_v37 = vpop.eup %1937 }
 0x914   :  { %v470_v33 = vmul.f32 %v1938_v37, %v402_v19 }
 0x974   :  { %v473_v38 = vpop.permute.xlu0 %472 }
 0x975   :  { %v475_v39 = vmul.f32 %v1938_v37, %v473_v38  ;;  %v1899_v38 = vld [vmem:[#allocation4 + $0x20] sm:$0xff]  }
 0x977   :  { %477 = vrot.lane.b32.xlu1 %v475_v39, %s2087_s17  ;;  %v1900_v39 = vld [vmem:[#allocation4 + $0x18] sm:$0xff]  }
 0x9e9   :  { %v478_v40 = vpop.permute.xlu1 %477 }
 0x9ea   :  { %v480_v41 = vadd.f32 %v478_v40, %v470_v33  ;;  %v1901_v33 = vld [vmem:[#allocation4 + $0x10] sm:$0xff]   ;;  %v1902_v40 = vld [vmem:[#allocation4 + $0x8] sm:$0xff]  }
 0x9ec   :  { %1939 = vtanh.f32 %v480_v41 }
 0x9f9   :  { %v1940_v42 = vpop.eup %1939 }
 0x9fa   :  { %483 = vrot.lane.b32.xlu0 %v1940_v42, %s2087_s17 }
 0xa6c   :  { %v484_v43 = vpop.permute.xlu0 %483 }
 0xa6d   :  { %v486_v44 = vmul.f32 %v1938_v37, %v484_v43  ;;  %v1898_v37 = vld [vmem:[#allocation4 + $0x28] sm:$0xff]  }
 0xa6f   :  { %v487_v45 = vpack.c.bf16 %v486_v44, %v486_v44  ;;  %v154_v44 = vadd.f32 %v2219_v59, %v2179_v9 }
 0xa71   :  { %489 = vrot.lane.b32.xlu1 %v487_v45, %s2082_s27 }
 0xae3   :  { %v490_v46 = vpop.permute.xlu1 %489 }
 0xae4   :  { %v492_v47 = vsel %vm185_vm3, %v490_v46, 0  ;;  %1765 = vmatmul.mubr.msk.bf16.vlgmr.msra.gmra.mxu0 %vm185_vm3, %v490_v46 }
 0xae5   :  { %495 = vst [vmem:[#allocation3 + $0xc] sm:$0xf] %v492_v47  ;;  %1777 = vmatpush3.bf16.msra.mxu0 %v2143_v3  ;;  %1780 = vmatprep.mubr.msk.bf16.mxu0 %vm2085_vm0, %v2084_v0 }
 0xae6   :  { %1778 = vmatprep.subr.bf16.mxu0 %v2084_v0 }
 0xae9   :  { %1779 = vmatpush3.bf16.msra.mxu0 %v2158_v6 }
 0xaea   :  { %1792 = vmatprep.subr.bf16.mxu0 %v1895_v27 }
 0xaec   :  { %v1904_v42 = vld [vmem:[#allocation3 + $0x8] sm:$0xff]  }
 0xba4   :  { %v534_v49 = vpop.f32.mrf.mxu0 }
 0xba5   :  { %v540_v50 = vadd.f32 %v534_v49, %v146_v48 }
 0xba6   :  { %v1766_v51 = vpop.f32.mrf.mxu0 }
 0xba7   :  { %1941 = vtanh.f32 %v540_v50  ;;  %v1616_v55 = vmul.f32 -1.442695, %v540_v50 }
 0xba8   :  { %v537_v52 = vpop.f32.mrf.mxu0 }
 0xba9   :  { %1943 = vpow2.f32 %v1616_v55 }
 0xbaa   :  { %v1767_v53 = vpop.f32.mrf.mxu0 }
 0xbb4   :  { %v1942_v54 = vpop.eup %1941 }
 0xbb5   :  { %550 = vrot.lane.b32.xlu0 %v1942_v54, %s2087_s17 }
 0xbb6   :  { %v1944_v56 = vpop.eup %1943 }
 0xbb7   :  { %v544_v57 = vadd.f32 1.0, %v1944_v56 }
 0xbb9   :  { %1945 = vrcp.f32 %v544_v57 }
 0xbc6   :  { %v1946_v58 = vpop.eup %1945 }
 0xbc7   :  { %v548_v60 = vmul.f32 %v1946_v58, %v480_v41  ;;  %v1903_v41 = vld [vmem:[#allocation4] sm:$0xff]  }
 0xc27   :  { %v551_v63 = vpop.permute.xlu0 %550 }
 0xc28   :  { %v553_v1 = vmul.f32 %v1946_v58, %v551_v63 }
 0xc2a   :  { %555 = vrot.lane.b32.xlu1 %v553_v1, %s2087_s17  ;;  %v2288_v1 = vld [vmem:[%s2427_s5 + $0x8] sm:$0xff]  }
 0xc9c   :  { %v556_v2 = vpop.permute.xlu1 %555 }
 0xc9d   :  { %v558_v4 = vadd.f32 %v556_v2, %v548_v60  ;;  %v2295_v60 = vld [vmem:[%s2427_s5] sm:$0xff]  }
 0xc9f   :  { %1947 = vtanh.f32 %v558_v4 }
 0xcac   :  { %v1948_v5 = vpop.eup %1947 }
 0xcad   :  { %561 = vrot.lane.b32.xlu0 %v1948_v5, %s2087_s17 }
 0xd1f   :  { %v562_v10 = vpop.permute.xlu0 %561 }
 0xd20   :  { %v564_v11 = vmul.f32 %v1946_v58, %v562_v10 }
 0xd22   :  { %v565_v12 = vpack.c.bf16 %v564_v11, %v564_v11 }
 0xd24   :  { %567 = vrot.lane.b32.xlu1 %v565_v12, %s2082_s27  ;;  %v157_v12 = vadd.f32 %v2223_v61, %v2179_v9 }
 0xd96   :  { %v568_v13 = vpop.permute.xlu1 %567 }
 0xd97   :  { %v570_v14 = vsel %vm185_vm3, %v568_v13, 0  ;;  %1773 = vmatmul.mubr.msk.bf16.vlgmr.msra.gmra.mxu1 %vm185_vm3, %v568_v13 }
 0xd98   :  { %573 = vst [vmem:[#allocation3 + $0x10] sm:$0xf] %v570_v14  ;;  %1785 = vmatpush3.bf16.msra.mxu1 %v2143_v3  ;;  %1788 = vmatprep.mubr.msk.bf16.mxu1 %vm2085_vm0, %v2084_v0 }
 0xd99   :  { %1786 = vmatprep.subr.bf16.mxu1 %v2084_v0 }
 0xd9c   :  { %1787 = vmatpush3.bf16.msra.mxu1 %v2158_v6 }
 0xd9d   :  { %1816 = vmatprep.subr.bf16.mxu1 %v2084_v0 }
 0xe57   :  { %v612_v16 = vpop.f32.mrf.mxu1 }
 0xe58   :  { %v618_v17 = vadd.f32 %v612_v16, %v149_v15 }
 0xe59   :  { %v1774_v8 = vpop.f32.mrf.mxu1 }
 0xe5a   :  { %1949 = vtanh.f32 %v618_v17  ;;  %v1618_v3 = vmul.f32 -1.442695, %v618_v17  ;;  %v2324_v8 = vld [vmem:[%s2428_s6] ss:$0 sm:$0xff]  ;;  %s2088_s6 = smov [#allocation7]  }
 0xe5b   :  { %v615_v18 = vpop.f32.mrf.mxu1  ;;  %s1588_s25 = sshll.u32 %s2088_s6, 4  ;;  %s1589_s25 = int_to_ptr.vmem [resolvable:$true] %s1588_s25 }
 0xe5c   :  { %1951 = vpow2.f32 %v1618_v3  ;;  %s2057_s26 = scalar_lea.vmem %s1589_s25, 128  ;;  %p2062_p6 = scmp.lt.s32.totalorder %s1589_s25, %s1589_s25 }
 0xe5d   :  { %v1775_v19 = vpop.f32.mrf.mxu1  ;;  %p2058_p5 = scmp.ne.s32.totalorder %s1589_s25, %s2057_s26  ;;  %p2063_p7 = scmp.lt.s32.totalorder %s2057_s26, %s2057_s26 }
 0xe5f   :  { %p2064_p8 = por %p2063_p7, %p2062_p6 }
 0xe61   :  { %p2065_p9 = pnand %p2064_p8, %p2058_p5 }
 0xe67   :  { %v1950_v20 = vpop.eup %1949 }
 0xe68   :  { %628 = vrot.lane.b32.xlu0 %v1950_v20, %s2087_s17 }
 0xe69   :  { %v1952_v21 = vpop.eup %1951 }
 0xe6a   :  { %v622_v22 = vadd.f32 1.0, %v1952_v21 }
 0xe6c   :  { %1953 = vrcp.f32 %v622_v22 }
 0xe79   :  { %v1954_v6 = vpop.eup %1953 }
 0xe7a   :  { %v626_v62 = vmul.f32 %v1954_v6, %v558_v4 }
 0xeda   :  { %v629_v23 = vpop.permute.xlu0 %628 }
 0xedb   :  { %v631_v24 = vmul.f32 %v1954_v6, %v629_v23 }
 0xedd   :  { %633 = vrot.lane.b32.xlu1 %v631_v24, %s2087_s17 }
 0xf4f   :  { %v634_v25 = vpop.permute.xlu1 %633 }
 0xf50   :  { %v636_v26 = vadd.f32 %v634_v25, %v626_v62 }
 0xf52   :  { %1955 = vtanh.f32 %v636_v26 }
 0xf5f   :  { %v1956_v28 = vpop.eup %1955 }
 0xf60   :  { %639 = vrot.lane.b32.xlu0 %v1956_v28, %s2087_s17 }
 0xfd2   :  { %v640_v29 = vpop.permute.xlu0 %639 }
 0xfd3   :  { %v642_v30 = vmul.f32 %v1954_v6, %v640_v29 }
 0xfd5   :  { %v643_v31 = vpack.c.bf16 %v642_v30, %v642_v30 }
 0xfd7   :  { %645 = vrot.lane.b32.xlu1 %v643_v31, %s2082_s27 }
0x1049   :  { %v646_v34 = vpop.permute.xlu1 %645 }
0x104a   :  { %v648_v36 = vsel %vm185_vm3, %v646_v34, 0  ;;  %1781 = vmatmul.mubr.msk.bf16.vlgmr.msra.gmra.mxu0 %vm185_vm3, %v646_v34 }
0x104b   :  { %651 = vst [vmem:[#allocation3 + $0x14] sm:$0xf] %v648_v36  ;;  %1793 = vmatpush3.bf16.msra.mxu0 %v1895_v27  ;;  %1808 = vmatprep.mubr.bf16.mxu0 %v1896_v35 }
0x104c   :  { %1794 = vmatprep.subr.bf16.mxu0 %v1897_v32 }
0x104f   :  { %1795 = vmatpush3.bf16.msra.mxu0 %v1897_v32 }
0x1050   :  { %1796 = vmatprep.subr.bf16.mxu0 %v1898_v37 }
0x1052   :  { %v1905_v43 = vld [vmem:[#allocation3 + $0x10] sm:$0xff]  }
0x1053   :  { %1797 = vmatpush3.bf16.msra.mxu0 %v1898_v37 }
0x1054   :  { %1798 = vmatprep.subr.bf16.mxu0 %v1899_v38 }
0x1057   :  { %1799 = vmatpush3.bf16.msra.mxu0 %v1899_v38 }
0x1058   :  { %1800 = vmatprep.subr.bf16.mxu0 %v1900_v39 }
0x105b   :  { %1801 = vmatpush3.bf16.msra.mxu0 %v1900_v39 }
0x105c   :  { %1802 = vmatprep.subr.bf16.mxu0 %v1901_v33 }
0x105f   :  { %1803 = vmatpush3.bf16.msra.mxu0 %v1901_v33 }
0x1060   :  { %1804 = vmatprep.subr.bf16.mxu0 %v1902_v40 }
0x1063   :  { %1805 = vmatpush3.bf16.msra.mxu0 %v1902_v40 }
0x1064   :  { %1806 = vmatprep.subr.bf16.mxu0 %v1903_v41 }
0x1067   :  { %1807 = vmatpush3.bf16.msra.mxu0 %v1903_v41 }
0x1068   :  { %1856 = vmatprep.subr.bf16.mxu0 %v2084_v0 }
0x106a   :  { %1809 = vmatmul.mubr.bf16.vlgmr.msra.gmra.mxu0 %v1904_v42 }
0x106b   :  { %1812 = vmatprep.mubr.bf16.mxu0 %v1905_v43  ;;  %1857 = vmatpush3.bf16.msra.mxu0 %v2288_v1 }
0x106c   :  { %1858 = vmatprep.subr.bf16.mxu0 %v2084_v0 }
0x106f   :  { %1859 = vmatpush3.bf16.msra.mxu0 %v2295_v60 }
0x1070   :  { %1872 = vmatprep.subr.bf16.mxu0 %v2084_v0 }
0x110a   :  { %v690_v45 = vpop.f32.mrf.mxu0 }
0x110b   :  { %v696_v46 = vadd.f32 %v690_v45, %v154_v44 }
0x110c   :  { %v1782_v47 = vpop.f32.mrf.mxu0 }
0x110d   :  { %1957 = vtanh.f32 %v696_v46  ;;  %v1620_v51 = vmul.f32 -1.442695, %v696_v46 }
0x110e   :  { %v693_v48 = vpop.f32.mrf.mxu0 }
0x110f   :  { %1959 = vpow2.f32 %v1620_v51 }
0x1110   :  { %v1783_v49 = vpop.f32.mrf.mxu0 }
0x111a   :  { %v1958_v50 = vpop.eup %1957 }
0x111b   :  { %706 = vrot.lane.b32.xlu0 %v1958_v50, %s2087_s17 }
0x111c   :  { %v1960_v52 = vpop.eup %1959 }
0x111d   :  { %v700_v53 = vadd.f32 1.0, %v1960_v52 }
0x111f   :  { %1961 = vrcp.f32 %v700_v53 }
0x112a   :  { %v2317_v13 = vpop.f32.mrf.mxu0 }
0x112c   :  { %v1962_v54 = vpop.eup %1961  ;;  %v945_v16 = vpop.f32.mrf.mxu0 }
0x112d   :  { %v704_v59 = vmul.f32 %v1962_v54, %v636_v26  ;;  %v946_v19 = vadd.f32 %v2324_v8, %v945_v16 }
0x112e   :  { %v2338_v36 = vpop.f32.mrf.mxu0 }
0x1130   :  { %v948_v37 = vpop.f32.mrf.mxu0 }
0x1131   :  { %v949_v38 = vadd.f32 %v2324_v8, %v948_v37 }
0x118d   :  { %v707_v55 = vpop.permute.xlu0 %706 }
0x118e   :  { %v709_v56 = vmul.f32 %v1962_v54, %v707_v55 }
0x1190   :  { %711 = vrot.lane.b32.xlu1 %v709_v56, %s2087_s17 }
0x1202   :  { %v712_v57 = vpop.permute.xlu1 %711 }
0x1203   :  { %v2281_v58 = vadd.f32 %v712_v57, %v704_v59  ;;  %v954_v57 = vadd.f32 %v2317_v13, %v2324_v8 }
0x1205   :  { %1963 = vtanh.f32 %v2281_v58 }
0x1212   :  { %v1964_v63 = vpop.eup %1963 }
0x1213   :  { %717 = vrot.lane.b32.xlu0 %v1964_v63, %s2087_s17 }
0x1285   :  { %v718_v2 = vpop.permute.xlu0 %717 }
0x1286   :  { %v720_v4 = vmul.f32 %v1962_v54, %v718_v2 }
0x1288   :  { %v721_v5 = vpack.c.bf16 %v720_v4, %v720_v4 }
0x128a   :  { %723 = vrot.lane.b32.xlu1 %v721_v5, %s2082_s27 }
0x12fc   :  { %v724_v10 = vpop.permute.xlu1 %723 }
0x12fd   :  { %v726_v11 = vsel %vm185_vm3, %v724_v10, 0  ;;  %1789 = vmatmul.mubr.msk.bf16.vlgmr.msra.gmra.mxu1 %vm185_vm3, %v724_v10 }
0x12fe   :  { %729 = vst [vmem:[#allocation3 + $0x18] sm:$0xf] %v726_v11  ;;  %1817 = vmatpush3.bf16.msra.mxu1 %v2288_v1  ;;  %1820 = vmatprep.mubr.msk.bf16.mxu1 %vm2085_vm0, %v2084_v0 }
0x12ff   :  { %1818 = vmatprep.subr.bf16.mxu1 %v2084_v0 }
0x1302   :  { %1819 = vmatpush3.bf16.msra.mxu1 %v2295_v60 }
0x1303   :  { %1824 = vmatprep.subr.bf16.mxu1 %v2084_v0 }
0x1305   :  { %1821 = vmatmul.mubr.bf16.vlgmr.msra.gmra.mxu1 %v2086_v7 }
0x1306   :  { %1825 = vmatpush3.bf16.msra.mxu1 %v2288_v1  ;;  %1828 = vmatprep.mubr.msk.bf16.mxu1 %vm2085_vm0, %v2084_v0 }
0x1307   :  { %1826 = vmatprep.subr.bf16.mxu1 %v2084_v0 }
0x130a   :  { %1827 = vmatpush3.bf16.msra.mxu1 %v2295_v60 }
0x130b   :  { %1832 = vmatprep.subr.bf16.mxu1 %v2084_v0 }
0x13bd   :  { %v768_v14 = vpop.f32.mrf.mxu1 }
0x13be   :  { %v2319_v15 = vadd.f32 %v768_v14, %v157_v12 }
0x13bf   :  { %v1790_v7 = vpop.f32.mrf.mxu1 }
0x13c1   :  { %v771_v17 = vpop.f32.mrf.mxu1 }
0x13c3   :  { %v1791_v18 = vpop.f32.mrf.mxu1 }
0x13c5   :  { %v1035_v20 = vpop.f32.mrf.mxu1 }
0x13c6   :  { %v1041_v3 = vadd.f32 %v1035_v20, %v946_v19 }
0x13c7   :  { %v1822_v21 = vpop.f32.mrf.mxu1 }
0x13c8   :  { %1965 = vtanh.f32 %v1041_v3  ;;  %v1638_v6 = vmul.f32 -1.442695, %v1041_v3 }
0x13c9   :  { %v1038_v9 = vpop.f32.mrf.mxu1 }
0x13ca   :  { %1967 = vpow2.f32 %v1638_v6  ;;  %v1622_v9 = vmul.f32 -1.442695, %v2319_v15 }
0x13cb   :  { %v1823_v61 = vpop.f32.mrf.mxu1 }
0x13d5   :  { %v1966_v22 = vpop.eup %1965 }
0x13d6   :  { %1051 = vrot.lane.b32.xlu0 %v1966_v22, %s2087_s17 }
0x13d7   :  { %v1968_v23 = vpop.eup %1967 }
0x13d8   :  { %v1045_v24 = vadd.f32 1.0, %v1968_v23 }
0x13da   :  { %1969 = vrcp.f32 %v1045_v24 }
0x13e7   :  { %v1970_v62 = vpop.eup %1969 }
0x13e8   :  { %v1049_v27 = vmul.f32 0.0, %v1970_v62 }
0x1448   :  { %v1052_v25 = vpop.permute.xlu0 %1051 }
0x1449   :  { %v1054_v26 = vmul.f32 %v1970_v62, %v1052_v25 }
0x144b   :  { %1056 = vrot.lane.b32.xlu1 %v1054_v26, %s2087_s17 }
0x14bd   :  { %v1057_v28 = vpop.permute.xlu1 %1056 }
0x14be   :  { %v1059_v29 = vadd.f32 %v1057_v28, %v1049_v27 }
0x14c0   :  { %1971 = vtanh.f32 %v1059_v29 }
0x14cd   :  { %v1972_v30 = vpop.eup %1971 }
0x14ce   :  { %1062 = vrot.lane.b32.xlu0 %v1972_v30, %s2087_s17 }
0x1540   :  { %v1063_v31 = vpop.permute.xlu0 %1062 }
0x1541   :  { %v1065_v32 = vmul.f32 %v1970_v62, %v1063_v31 }
0x1543   :  { %v1066_v34 = vpack.c.bf16 %v1065_v32, %v1065_v32 }
0x1545   :  { %1069 = vrot.lane.b32.xlu1 %v1066_v34, %s2082_s27  ;;  %v957_v34 = vadd.f32 %v2338_v36, %v2324_v8 }
0x15b7   :  { %v1070_v35 = vpop.permute.xlu1 %1069 }
0x15b8   :  { %1829 = vmatmul.mubr.msk.bf16.vlgmr.msra.gmra.mxu1 %vm185_vm3, %v1070_v35 }
0x15b9   :  { %1833 = vmatpush3.bf16.msra.mxu1 %v2288_v1  ;;  %1836 = vmatprep.mubr.msk.bf16.mxu1 %vm2085_vm0, %v2084_v0 }
0x15ba   :  { %1834 = vmatprep.subr.bf16.mxu1 %v2084_v0 }
0x15bd   :  { %1835 = vmatpush3.bf16.msra.mxu1 %v2295_v60 }
0x15be   :  { %1840 = vmatprep.subr.bf16.mxu1 %v2084_v0 }
0x1678   :  { %v1108_v39 = vpop.f32.mrf.mxu1 }
0x1679   :  { %v1114_v33 = vadd.f32 %v1108_v39, %v949_v38 }
0x167a   :  { %v1830_v40 = vpop.f32.mrf.mxu1 }
0x167b   :  { %1973 = vtanh.f32 %v1114_v33  ;;  %v1640_v44 = vmul.f32 -1.442695, %v1114_v33 }
0x167c   :  { %v1111_v41 = vpop.f32.mrf.mxu1 }
0x167d   :  { %1975 = vpow2.f32 %v1640_v44 }
0x167e   :  { %v1831_v42 = vpop.f32.mrf.mxu1 }
0x1688   :  { %v1974_v43 = vpop.eup %1973 }
0x1689   :  { %1124 = vrot.lane.b32.xlu0 %v1974_v43, %s2087_s17 }
0x168a   :  { %v1976_v45 = vpop.eup %1975 }
0x168b   :  { %v1118_v46 = vadd.f32 1.0, %v1976_v45 }
0x168d   :  { %1977 = vrcp.f32 %v1118_v46 }
0x169a   :  { %v1978_v47 = vpop.eup %1977 }
0x169b   :  { %v1122_v50 = vmul.f32 %v1978_v47, %v1059_v29 }
0x16fb   :  { %v1125_v48 = vpop.permute.xlu0 %1124 }
0x16fc   :  { %v1127_v49 = vmul.f32 %v1978_v47, %v1125_v48 }
0x16fe   :  { %1129 = vrot.lane.b32.xlu1 %v1127_v49, %s2087_s17 }
0x1770   :  { %v1130_v51 = vpop.permute.xlu1 %1129 }
0x1771   :  { %v1132_v52 = vadd.f32 %v1130_v51, %v1122_v50 }
0x1773   :  { %1979 = vtanh.f32 %v1132_v52 }
0x1780   :  { %v1980_v53 = vpop.eup %1979 }
0x1781   :  { %1135 = vrot.lane.b32.xlu0 %v1980_v53, %s2087_s17 }
0x17f3   :  { %v1136_v54 = vpop.permute.xlu0 %1135 }
0x17f4   :  { %v1138_v55 = vmul.f32 %v1978_v47, %v1136_v54 }
0x17f6   :  { %v1139_v56 = vpack.c.bf16 %v1138_v55, %v1138_v55 }
0x17f8   :  { %1142 = vrot.lane.b32.xlu1 %v1139_v56, %s2082_s27 }
0x186a   :  { %v1143_v59 = vpop.permute.xlu1 %1142 }
0x186b   :  { %1837 = vmatmul.mubr.msk.bf16.vlgmr.msra.gmra.mxu1 %vm185_vm3, %v1143_v59 }
0x186c   :  { %1841 = vmatpush3.bf16.msra.mxu1 %v2288_v1  ;;  %1844 = vmatprep.mubr.msk.bf16.mxu1 %vm2085_vm0, %v2084_v0 }
0x186d   :  { %1842 = vmatprep.subr.bf16.mxu1 %v2084_v0 }
0x1870   :  { %1843 = vmatpush3.bf16.msra.mxu1 %v2295_v60 }
0x1871   :  { %1848 = vmatprep.subr.bf16.mxu1 %v2084_v0 }
0x192b   :  { %v1181_v63 = vpop.f32.mrf.mxu1 }
0x192c   :  { %v1187_v2 = vadd.f32 %v1181_v63, %v954_v57 }
0x192d   :  { %v1838_v4 = vpop.f32.mrf.mxu1 }
0x192e   :  { %1981 = vtanh.f32 %v1187_v2  ;;  %v1642_v12 = vmul.f32 -1.442695, %v1187_v2 }
0x192f   :  { %v1184_v5 = vpop.f32.mrf.mxu1 }
0x1930   :  { %1983 = vpow2.f32 %v1642_v12 }
0x1931   :  { %v1839_v10 = vpop.f32.mrf.mxu1 }
0x193b   :  { %v1982_v11 = vpop.eup %1981 }
0x193c   :  { %1197 = vrot.lane.b32.xlu0 %v1982_v11, %s2087_s17 }
0x193d   :  { %v1984_v14 = vpop.eup %1983 }
0x193e   :  { %v1191_v7 = vadd.f32 1.0, %v1984_v14 }
0x1940   :  { %1985 = vrcp.f32 %v1191_v7 }
0x194d   :  { %v1986_v16 = vpop.eup %1985 }
0x194e   :  { %v1195_v13 = vmul.f32 %v1986_v16, %v1132_v52 }
0x19ae   :  { %v1198_v17 = vpop.permute.xlu0 %1197 }
0x19af   :  { %v1200_v18 = vmul.f32 %v1986_v16, %v1198_v17 }
0x19b1   :  { %1202 = vrot.lane.b32.xlu1 %v1200_v18, %s2087_s17 }
0x1a23   :  { %v1203_v19 = vpop.permute.xlu1 %1202 }
0x1a24   :  { %v1205_v20 = vadd.f32 %v1203_v19, %v1195_v13 }
0x1a26   :  { %1987 = vtanh.f32 %v1205_v20 }
0x1a27   :  { %1989 = vtanh.f32 %v2319_v15 }
0x1a28   :  { %1991 = vpow2.f32 %v1622_v9 }
0x1a33   :  { %v1988_v3 = vpop.eup %1987 }
0x1a34   :  { %1208 = vrot.lane.b32.xlu0 %v1988_v3, %s2087_s17  ;;  %v1990_v21 = vpop.eup %1989 }
0x1a35   :  { %v1992_v61 = vpop.eup %1991 }
0x1a36   :  { %v778_v22 = vadd.f32 1.0, %v1992_v61 }
0x1a38   :  { %784 = vrot.lane.b32.xlu0 %v1990_v21, %s2087_s17  ;;  %1993 = vrcp.f32 %v778_v22 }
0x1a45   :  { %v1994_v62 = vpop.eup %1993 }
0x1a46   :  { %v782_v28 = vmul.f32 %v1994_v62, %v2281_v58 }
0x1aa6   :  { %v1209_v6 = vpop.permute.xlu0 %1208 }
0x1aa7   :  { %v1211_v23 = vmul.f32 %v1986_v16, %v1209_v6 }
0x1aa9   :  { %v1212_v24 = vpack.c.bf16 %v1211_v23, %v1211_v23 }
0x1aaa   :  { %v785_v25 = vpop.permute.xlu0 %784 }
0x1aab   :  { %v787_v26 = vmul.f32 %v1994_v62, %v785_v25  ;;  %1215 = vrot.lane.b32.xlu1 %v1212_v24, %s2082_s27 }
0x1aad   :  { %789 = vrot.lane.b32.xlu0 %v787_v26, %s2087_s17 }
0x1b1d   :  { %v1216_v27 = vpop.permute.xlu1 %1215 }
0x1b1e   :  { %1845 = vmatmul.mubr.msk.bf16.vlgmr.msra.gmra.mxu1 %vm185_vm3, %v1216_v27 }
0x1b1f   :  { %v790_v15 = vpop.permute.xlu0 %789  ;;  %1849 = vmatpush3.bf16.msra.mxu1 %v2288_v1  ;;  %1852 = vmatprep.mubr.msk.bf16.mxu1 %vm2085_vm0, %v2084_v0 }
0x1b20   :  { %v792_v29 = vadd.f32 %v790_v15, %v782_v28  ;;  %1850 = vmatprep.subr.bf16.mxu1 %v2084_v0 }
0x1b22   :  { %1995 = vtanh.f32 %v792_v29 }
0x1b23   :  { %1851 = vmatpush3.bf16.msra.mxu1 %v2295_v60 }
0x1b24   :  { %1864 = vmatprep.subr.bf16.mxu1 %v2084_v0 }
0x1b2f   :  { %v1996_v30 = vpop.eup %1995 }
0x1b30   :  { %795 = vrot.lane.b32.xlu0 %v1996_v30, %s2087_s17 }
0x1ba2   :  { %v796_v31 = vpop.permute.xlu0 %795 }
0x1ba3   :  { %v798_v32 = vmul.f32 %v1994_v62, %v796_v31 }
0x1ba5   :  { %v799_v58 = vpack.c.bf16 %v798_v32, %v798_v32 }
0x1ba7   :  { %801 = vrot.lane.b32.xlu0 %v799_v58, %s2082_s27 }
0x1bde   :  { %v1254_v35 = vpop.f32.mrf.mxu1 }
0x1bdf   :  { %v1260_v37 = vadd.f32 %v1254_v35, %v957_v34 }
0x1be0   :  { %v1846_v38 = vpop.f32.mrf.mxu1 }
0x1be1   :  { %1997 = vtanh.f32 %v1260_v37  ;;  %v1644_v44 = vmul.f32 -1.442695, %v1260_v37 }
0x1be2   :  { %v1257_v39 = vpop.f32.mrf.mxu1 }
0x1be3   :  { %1999 = vpow2.f32 %v1644_v44 }
0x1be4   :  { %v1847_v33 = vpop.f32.mrf.mxu1 }
0x1bee   :  { %v1998_v40 = vpop.eup %1997 }
0x1bef   :  { %1270 = vrot.lane.b32.xlu1 %v1998_v40, %s2087_s17 }
0x1bf0   :  { %v2000_v36 = vpop.eup %1999 }
0x1bf1   :  { %v1264_v45 = vadd.f32 1.0, %v2000_v36 }
0x1bf3   :  { %2001 = vrcp.f32 %v1264_v45 }
0x1c00   :  { %v2002_v46 = vpop.eup %2001 }
0x1c01   :  { %v1268_v49 = vmul.f32 %v2002_v46, %v1205_v20 }
0x1c19   :  { %v802_v41 = vpop.permute.xlu0 %801 }
0x1c1a   :  { %v804_v42 = vsel %vm185_vm3, %v802_v41, 0 }
0x1c1b   :  { %807 = vst [vmem:[#allocation3 + $0x1c] sm:$0xf] %v804_v42 }
0x1c22   :  { %v1908_v43 = vld [vmem:[#allocation3 + $0x18] sm:$0xff]  }
0x1c23   :  { %1813 = vmatmul.mubr.bf16.gmra.mxu0 %v1908_v43 }
0x1c24   :  { %1860 = vmatprep.mubr.msk.bf16.mxu0 %vm2085_vm0, %v2084_v0 }
0x1c61   :  { %v1271_v47 = vpop.permute.xlu1 %1270 }
0x1c62   :  { %v1273_v48 = vmul.f32 %v2002_v46, %v1271_v47 }
0x1c64   :  { %1275 = vrot.lane.b32.xlu1 %v1273_v48, %s2087_s17 }
0x1cd6   :  { %v1276_v50 = vpop.permute.xlu1 %1275 }
0x1cd7   :  { %v1278_v51 = vadd.f32 %v1276_v50, %v1268_v49 }
0x1cd9   :  { %2003 = vtanh.f32 %v1278_v51 }
0x1ce3   :  { %v2387_v59 = vpop.f32.mrf.mxu0 }
0x1ce4   :  { %v970_v41 = vadd.f32 %v2387_v59, %v2324_v8 }
0x1ce5   :  { %v961_v57 = vpop.f32.mrf.mxu0 }
0x1ce6   :  { %v2004_v52 = vpop.eup %2003  ;;  %v962_v63 = vadd.f32 %v2324_v8, %v961_v57 }
0x1ce7   :  { %1281 = vrot.lane.b32.xlu1 %v2004_v52, %s2087_s17  ;;  %v1815_v23 = vpop.f32.mrf.mxu0 }
0x1ce9   :  { %v964_v24 = vpop.f32.mrf.mxu0 }
0x1cea   :  { %v965_v62 = vadd.f32 %v2324_v8, %v964_v24 }
0x1d59   :  { %v1282_v53 = vpop.permute.xlu1 %1281 }
0x1d5a   :  { %v1284_v54 = vmul.f32 %v2002_v46, %v1282_v53 }
0x1d5c   :  { %v1285_v55 = vpack.c.bf16 %v1284_v54, %v1284_v54 }
0x1d5e   :  { %1288 = vrot.lane.b32.xlu1 %v1285_v55, %s2082_s27 }
0x1dd0   :  { %v1289_v56 = vpop.permute.xlu1 %1288 }
0x1dd1   :  { %1853 = vmatmul.mubr.msk.bf16.vlgmr.msra.gmra.mxu1 %vm185_vm3, %v1289_v56 }
0x1dd2   :  { %1865 = vmatpush3.bf16.msra.mxu1 %v2288_v1  ;;  %1868 = vmatprep.mubr.msk.bf16.mxu1 %vm2085_vm0, %v2084_v0 }
0x1dd3   :  { %1866 = vmatprep.subr.bf16.mxu1 %v2084_v0 }
0x1dd6   :  { %1867 = vmatpush3.bf16.msra.mxu1 %v2295_v60 }
0x1e91   :  { %v1327_v2 = vpop.f32.mrf.mxu1 }
0x1e92   :  { %v1333_v4 = vadd.f32 %v1327_v2, %v962_v63 }
0x1e93   :  { %v1854_v5 = vpop.f32.mrf.mxu1 }
0x1e94   :  { %2005 = vtanh.f32 %v1333_v4  ;;  %v1646_v14 = vmul.f32 -1.442695, %v1333_v4  ;;  %v973_v4 = vadd.f32 %v1815_v23, %v2324_v8 }
0x1e95   :  { %v1330_v10 = vpop.f32.mrf.mxu1 }
0x1e96   :  { %2007 = vpow2.f32 %v1646_v14 }
0x1e97   :  { %v1855_v11 = vpop.f32.mrf.mxu1 }
0x1ea1   :  { %v2006_v12 = vpop.eup %2005 }
0x1ea2   :  { %1343 = vrot.lane.b32.xlu0 %v2006_v12, %s2087_s17 }
0x1ea3   :  { %v2008_v7 = vpop.eup %2007 }
0x1ea4   :  { %v1337_v16 = vadd.f32 1.0, %v2008_v7 }
0x1ea6   :  { %2009 = vrcp.f32 %v1337_v16 }
0x1eb3   :  { %v2010_v17 = vpop.eup %2009 }
0x1eb4   :  { %v1341_v19 = vmul.f32 %v2010_v17, %v1278_v51 }
0x1f14   :  { %v1344_v18 = vpop.permute.xlu0 %1343 }
0x1f15   :  { %v1346_v13 = vmul.f32 %v2010_v17, %v1344_v18 }
0x1f17   :  { %1348 = vrot.lane.b32.xlu1 %v1346_v13, %s2087_s17 }
0x1f89   :  { %v1349_v20 = vpop.permute.xlu1 %1348 }
0x1f8a   :  { %v1351_v3 = vadd.f32 %v1349_v20, %v1341_v19 }
0x1f8c   :  { %2011 = vtanh.f32 %v1351_v3 }
0x1f99   :  { %v2012_v21 = vpop.eup %2011 }
0x1f9a   :  { %1354 = vrot.lane.b32.xlu0 %v2012_v21, %s2087_s17 }
0x200c   :  { %v1355_v9 = vpop.permute.xlu0 %1354 }
0x200d   :  { %v1357_v61 = vmul.f32 %v2010_v17, %v1355_v9 }
0x200f   :  { %v1358_v22 = vpack.c.bf16 %v1357_v61, %v1357_v61 }
0x2011   :  { %1361 = vrot.lane.b32.xlu1 %v1358_v22, %s2082_s27 }
0x2083   :  { %v1362_v6 = vpop.permute.xlu1 %1361 }
0x2084   :  { %1861 = vmatmul.mubr.msk.bf16.vlgmr.msra.gmra.mxu0 %vm185_vm3, %v1362_v6 }
0x2085   :  { %1873 = vmatpush3.bf16.msra.mxu0 %v2288_v1  ;;  %1876 = vmatprep.mubr.msk.bf16.mxu0 %vm2085_vm0, %v2084_v0 }
0x2086   :  { %1874 = vmatprep.subr.bf16.mxu0 %v2084_v0 }
0x2089   :  { %1875 = vmatpush3.bf16.msra.mxu0 %v2295_v60 }
0x2144   :  { %v1400_v25 = vpop.f32.mrf.mxu0 }
0x2145   :  { %v1406_v26 = vadd.f32 %v1400_v25, %v965_v62 }
0x2146   :  { %v1862_v27 = vpop.f32.mrf.mxu0 }
0x2147   :  { %2013 = vtanh.f32 %v1406_v26  ;;  %v1648_v1 = vmul.f32 -1.442695, %v1406_v26 }
0x2148   :  { %v1403_v28 = vpop.f32.mrf.mxu0 }
0x2149   :  { %2015 = vpow2.f32 %v1648_v1 }
0x214a   :  { %v1863_v15 = vpop.f32.mrf.mxu0 }
0x2154   :  { %v2014_v29 = vpop.eup %2013 }
0x2155   :  { %1416 = vrot.lane.b32.xlu0 %v2014_v29, %s2087_s17 }
0x2156   :  { %v2016_v30 = vpop.eup %2015 }
0x2157   :  { %v1410_v31 = vadd.f32 1.0, %v2016_v30 }
0x2159   :  { %2017 = vrcp.f32 %v1410_v31 }
0x2166   :  { %v2018_v0 = vpop.eup %2017 }
0x2167   :  { %v1414_v58 = vmul.f32 %v2018_v0, %v1351_v3 }
0x21c7   :  { %v1417_v60 = vpop.permute.xlu0 %1416 }
0x21c8   :  { %v1419_v32 = vmul.f32 %v2018_v0, %v1417_v60 }
0x21ca   :  { %1421 = vrot.lane.b32.xlu1 %v1419_v32, %s2087_s17 }
0x223c   :  { %v1422_v34 = vpop.permute.xlu1 %1421 }
0x223d   :  { %v1424_v35 = vadd.f32 %v1422_v34, %v1414_v58 }
0x223f   :  { %2019 = vtanh.f32 %v1424_v35 }
0x224c   :  { %v2020_v37 = vpop.eup %2019 }
0x224d   :  { %1427 = vrot.lane.b32.xlu0 %v2020_v37, %s2087_s17 }
0x22bf   :  { %v1428_v38 = vpop.permute.xlu0 %1427 }
0x22c0   :  { %v1430_v39 = vmul.f32 %v2018_v0, %v1428_v38 }
0x22c2   :  { %v1431_v33 = vpack.c.bf16 %v1430_v39, %v1430_v39 }
0x22c4   :  { %1434 = vrot.lane.b32.xlu1 %v1431_v33, %s2082_s27 }
0x2336   :  { %v1435_v40 = vpop.permute.xlu1 %1434 }
0x2337   :  { %1869 = vmatmul.mubr.msk.bf16.vlgmr.msra.gmra.mxu1 %vm185_vm3, %v1435_v40 }
0x23f7   :  { %v1473_v42 = vpop.f32.mrf.mxu1 }
0x23f8   :  { %v1479_v43 = vadd.f32 %v1473_v42, %v970_v41 }
0x23f9   :  { %v1870_v44 = vpop.f32.mrf.mxu1 }
0x23fa   :  { %2021 = vtanh.f32 %v1479_v43  ;;  %v1650_v47 = vmul.f32 -1.442695, %v1479_v43 }
0x23fb   :  { %v1476_v36 = vpop.f32.mrf.mxu1 }
0x23fc   :  { %2023 = vpow2.f32 %v1650_v47 }
0x23fd   :  { %v1871_v45 = vpop.f32.mrf.mxu1 }
0x2407   :  { %v2022_v46 = vpop.eup %2021 }
0x2408   :  { %1489 = vrot.lane.b32.xlu0 %v2022_v46, %s2087_s17 }
0x2409   :  { %v2024_v48 = vpop.eup %2023 }
0x240a   :  { %v1483_v49 = vadd.f32 1.0, %v2024_v48 }
0x240c   :  { %2025 = vrcp.f32 %v1483_v49 }
0x2419   :  { %v2026_v50 = vpop.eup %2025 }
0x241a   :  { %v1487_v53 = vmul.f32 %v2026_v50, %v1424_v35 }
0x247a   :  { %v1490_v51 = vpop.permute.xlu0 %1489 }
0x247b   :  { %v1492_v52 = vmul.f32 %v2026_v50, %v1490_v51 }
0x247d   :  { %1494 = vrot.lane.b32.xlu1 %v1492_v52, %s2087_s17 }
0x24ef   :  { %v1495_v54 = vpop.permute.xlu1 %1494 }
0x24f0   :  { %v1497_v55 = vadd.f32 %v1495_v54, %v1487_v53 }
0x24f2   :  { %2027 = vtanh.f32 %v1497_v55 }
0x24ff   :  { %v2028_v56 = vpop.eup %2027 }
0x2500   :  { %1500 = vrot.lane.b32.xlu0 %v2028_v56, %s2087_s17 }
0x2572   :  { %v1501_v59 = vpop.permute.xlu0 %1500 }
0x2573   :  { %v1503_v57 = vmul.f32 %v2026_v50, %v1501_v59 }
0x2575   :  { %v1504_v63 = vpack.c.bf16 %v1503_v57, %v1503_v57 }
0x2577   :  { %1507 = vrot.lane.b32.xlu1 %v1504_v63, %s2082_s27 }
0x25e9   :  { %v1508_v2 = vpop.permute.xlu1 %1507 }
0x25ea   :  { %1877 = vmatmul.mubr.msk.bf16.vlgmr.msra.gmra.mxu0 %vm185_vm3, %v1508_v2 }
0x26aa   :  { %v1546_v5 = vpop.f32.mrf.mxu0 }
0x26ab   :  { %v1552_v10 = vadd.f32 %v1546_v5, %v973_v4 }
0x26ac   :  { %v1878_v11 = vpop.f32.mrf.mxu0 }
0x26ad   :  { %2029 = vtanh.f32 %v1552_v10  ;;  %v1652_v16 = vmul.f32 -1.442695, %v1552_v10 }
0x26ae   :  { %v1549_v12 = vpop.f32.mrf.mxu0 }
0x26af   :  { %2031 = vpow2.f32 %v1652_v16 }
0x26b0   :  { %v1879_v14 = vpop.f32.mrf.mxu0 }
0x26ba   :  { %v2030_v7 = vpop.eup %2029 }
0x26bb   :  { %1562 = vrot.lane.b32.xlu0 %v2030_v7, %s2087_s17 }
0x26bc   :  { %v2032_v17 = vpop.eup %2031 }
0x26bd   :  { %v1556_v18 = vadd.f32 1.0, %v2032_v17 }
0x26bf   :  { %2033 = vrcp.f32 %v1556_v18 }
0x26cc   :  { %v2034_v13 = vpop.eup %2033 }
0x26cd   :  { %v1560_v8 = vmul.f32 %v2034_v13, %v1497_v55 }
0x272d   :  { %v1563_v19 = vpop.permute.xlu0 %1562 }
0x272e   :  { %v1565_v20 = vmul.f32 %v2034_v13, %v1563_v19 }
0x2730   :  { %1567 = vrot.lane.b32.xlu1 %v1565_v20, %s2087_s17 }
0x27a2   :  { %v1568_v3 = vpop.permute.xlu1 %1567 }
0x27a3   :  { %v1570_v21 = vadd.f32 %v1568_v3, %v1560_v8 }
0x27a5   :  { %2035 = vtanh.f32 %v1570_v21 }
0x27b2   :  { %v2036_v9 = vpop.eup %2035 }
0x27b3   :  { %1573 = vrot.lane.b32.xlu0 %v2036_v9, %s2087_s17 }
0x2825   :  { %v1574_v61 = vpop.permute.xlu0 %1573 }
0x2826   :  { %v1576_v22 = vmul.f32 %v2034_v13, %v1574_v61 }
0x2828   :  { %1578 = vrot.lane.b32.xlu1 %v1576_v22, %s2082_s27 }
0x289a   :  { %v1579_v6 = vpop.permute.xlu1 %1578 }
0x289b   :  { %1581 = vst.msk [vmem:[#allocation7] sm:$0xff] %vm185_vm3, %v1579_v6 }
0x289c   :  { %2068 = shalt.err (!%p2065_p9)
}
0x289d   :  { %1591 = dma.vmem_to_hbm [thread:$0]  %s1589_s25, 128, %s2429_s7, [#allocation6]  }
0x289e   :  { %2079 = dma.done.wait [#allocation6], 128  }
0x289f   :  { %2080 = vsyncadd [#allocation6], 4294967168 }
0x28a0   :  { %1595 = vsyncpa [#allocation5], 1 }
0x28a1   :  { %1596 = vsyncpa [#allocation6], 1 }

// kernel: tpu_custom_call.1
= control target key start
LH: loop header
LB: loop body
LE: loop exit
PB: predicated region body
PF: predicated region fallthrough
CT: control target
= control target key end

     0   :  { %12 = vsyncpa [#allocation5], 0  ;;  %s2422_s0 = inlined_call_operand.vmem [shape: bf16[1,64,4], index: 0, kind: input, shape index: {}]   ;;  %s2423_s1 = inlined_call_operand.vmem [shape: bf16[4,128], index: 1, kind: input, shape index: {}]   ;;  %s2424_s2 = inlined_call_operand.vmem [shape: bf16[32,128], index: 2, kind: input, shape index: {}]   ;;  %s2425_s3 = inlined_call_operand.vmem [shape: f32[1,128], index: 3, kind: input, shape index: {}]   ;;  %s2426_s4 = inlined_call_operand.hbm [shape: bf16[128,128], index: 4, kind: input, shape index: {}]   ;;  %s2427_s5 = inlined_call_operand.vmem [shape: bf16[32,128], index: 5, kind: input, shape index: {}]   ;;  %s2428_s6 = inlined_call_operand.vmem [shape: f32[1,128], index: 6, kind: input, shape index: {}]   ;;  %s2429_s7 = inlined_call_operand.hbm [shape: f32[8,32], index: 7, kind: output, shape index: {}]  }
   0x1   :  { %13 = vsyncpa [#allocation6], 0  ;;  %s2081_s24 = smov [#allocation4]  }
   0x2   :  { %s27_s25 = sshll.u32 %s2081_s24, 4  ;;  %s28_s25 = int_to_ptr.vmem [resolvable:$true] %s27_s25 }
   0x3   :  { %s2045_s26 = scalar_lea.vmem %s28_s25, 1024  ;;  %p2050_p1 = scmp.lt.s32.totalorder %s28_s25, %s28_s25 }
   0x4   :  { %p2046_p0 = scmp.ne.s32.totalorder %s28_s25, %s2045_s26  ;;  %p2051_p2 = scmp.lt.s32.totalorder %s2045_s26, %s2045_s26 }
   0x6   :  { %p2052_p3 = por %p2051_p2, %p2050_p1 }
   0x8   :  { %p2053_p4 = pnand %p2052_p3, %p2046_p0 }
   0xa   :  { %2056 = shalt.err (!%p2053_p4)
}
   0xb   :  { %s2082_s27 = smov 64   ;;  %s2083_s28 = smov 4  }
   0xc   :  { %33 = dma.hbm_to_vmem [thread:$0]  %s2426_s4, 1024, %s28_s25, [#allocation5], %s2082_s27, %s2082_s27, %s2083_s28  }
   0xd   :  { %2077 = dma.done.wait [#allocation5], 1024  }
   0xe   :  { %2078 = vsyncadd [#allocation5], 4294966272  ;;  %v2084_v0 = vmov 0.0   ;;  %vm2085_vm0 = vmmov 0   ;;  %vm91_vm1 = vcmask 1041408   ;;  %vm78_vm2 = vcmask 31744  }
   0xf   :  { %1728 = vmatprep.subr.bf16.mxu1 %v2084_v0  ;;  %1732 = vmatprep.mubr.msk.bf16.mxu1 %vm2085_vm0, %v2084_v0  ;;  %v50_v1 = vld [vmem:[%s2423_s1] sm:$0x3]  ;;  %v2143_v3 = vld [vmem:[%s2424_s2 + $0x8] sm:$0xff]   ;;  %v2086_v7 = vmov 0   ;;  %s2087_s17 = smov 32   ;;  %vm185_vm3 = vcmask 261120  }
  0x10   :  { %1880 = vmatprep.subr.msk.bf16.mxu0 %vm91_vm1, %v50_v1  ;;  %v93_v2 = vsel %vm91_vm1, %v50_v1, 0  ;;  %v1890_v4 = vld [vmem:[%s2422_s0] sm:$0xff]   ;;  %1729 = vmatpush3.bf16.msra.mxu1 %v2143_v3  ;;  %v1891_v5 = vld [vmem:[%s2422_s0 + $0x8] sm:$0xff]   ;;  %v1893_v51 = vld [vmem:[%s2422_s0 + $0x10] sm:$0xff]  }
  0x11   :  { %1719 = vmatpush3.bf16.msra.mxu0 %v93_v2  ;;  %1720 = vmatprep.mubr.msk.bf16.mxu0 %vm78_vm2, %v1890_v4  ;;  %v2158_v6 = vld [vmem:[%s2424_s2] sm:$0xff]   ;;  %v1894_v52 = vld [vmem:[%s2422_s0 + $0x18] sm:$0xff]  }
  0x12   :  { %1744 = vmatprep.subr.bf16.mxu0 %v2084_v0  ;;  %1730 = vmatprep.subr.bf16.mxu1 %v2084_v0  ;;  %v2179_v9 = vld [vmem:[%s2425_s3] ss:$0 sm:$0xff] }
  0x14   :  { %1721 = vmatmul.mubr.msk.bf16.vlgmr.msra.gmra.mxu0 %vm78_vm2, %v1891_v5  ;;  %1731 = vmatpush3.bf16.msra.mxu1 %v2158_v6 }
  0x15   :  { %1745 = vmatpush3.bf16.msra.mxu0 %v2143_v3  ;;  %1736 = vmatprep.subr.bf16.mxu1 %v2084_v0 }
  0x16   :  { %1746 = vmatprep.subr.bf16.mxu0 %v2084_v0  ;;  %1724 = vmatprep.mubr.msk.bf16.mxu0 %vm78_vm2, %v1893_v51 }
  0x17   :  { %1733 = vmatmul.mubr.bf16.vlgmr.msra.gmra.mxu1 %v2086_v7 }
  0x18   :  { %1737 = vmatpush3.bf16.msra.mxu1 %v2143_v3  ;;  %1740 = vmatprep.mubr.msk.bf16.mxu1 %vm2085_vm0, %v2084_v0 }
  0x19   :  { %1747 = vmatpush3.bf16.msra.mxu0 %v2158_v6  ;;  %1738 = vmatprep.subr.bf16.mxu1 %v2084_v0 }
  0x1a   :  { %1760 = vmatprep.subr.bf16.mxu0 %v2084_v0 }
  0x1c   :  { %1739 = vmatpush3.bf16.msra.mxu1 %v2158_v6  ;;  %1725 = vmatmul.mubr.msk.bf16.gmra.mxu0 %vm78_vm2, %v1894_v52 }
  0x1d   :  { %1752 = vmatprep.subr.bf16.mxu1 %v2084_v0  ;;  %1748 = vmatprep.mubr.msk.bf16.mxu0 %vm2085_vm0, %v2084_v0 }
  0xd4   :  { %v2174_v8 = vpop.f32.mrf.mxu0 }
  0xd5   :  { %v138_v63 = vadd.f32 %v2174_v8, %v2179_v9 }
  0xd6   :  { %v129_v10 = vpop.f32.mrf.mxu0 }
  0xd7   :  { %v130_v11 = vadd.f32 %v2179_v9, %v129_v10  ;;  %v223_v12 = vpop.f32.mrf.mxu1 }
  0xd8   :  { %v2194_v33 = vpop.f32.mrf.mxu0 }
  0xd9   :  { %v229_v13 = vadd.f32 %v223_v12, %v130_v11  ;;  %v1734_v14 = vpop.f32.mrf.mxu1 }
  0xda   :  { %v132_v34 = vpop.f32.mrf.mxu0 }
  0xdb   :  { %1909 = vtanh.f32 %v229_v13  ;;  %v226_v15 = vpop.f32.mrf.mxu1  ;;  %v1608_v18 = vmul.f32 -1.442695, %v229_v13  ;;  %v133_v35 = vadd.f32 %v2179_v9, %v132_v34 }
  0xdc   :  { %v2219_v59 = vpop.f32.mrf.mxu0 }
  0xdd   :  { %v1735_v16 = vpop.f32.mrf.mxu1  ;;  %1911 = vpow2.f32 %v1608_v18 }
  0xde   :  { %v2221_v60 = vpop.f32.mrf.mxu0 }
  0xe0   :  { %v2223_v61 = vpop.f32.mrf.mxu0 }
  0xe2   :  { %v2225_v62 = vpop.f32.mrf.mxu0 }
  0xe8   :  { %v1910_v17 = vpop.eup %1909 }
  0xe9   :  { %239 = vrot.lane.b32.xlu0 %v1910_v17, %s2087_s17 }
  0xea   :  { %v1912_v19 = vpop.eup %1911 }
  0xeb   :  { %v233_v20 = vadd.f32 1.0, %v1912_v19 }
  0xed   :  { %1913 = vrcp.f32 %v233_v20 }
  0xfa   :  { %v1914_v21 = vpop.eup %1913 }
  0xfb   :  { %v237_v24 = vmul.f32 0.0, %v1914_v21 }
 0x15b   :  { %v240_v22 = vpop.permute.xlu0 %239 }
 0x15c   :  { %v242_v23 = vmul.f32 %v1914_v21, %v240_v22 }
 0x15e   :  { %244 = vrot.lane.b32.xlu0 %v242_v23, %s2087_s17 }
 0x1d0   :  { %v245_v25 = vpop.permute.xlu0 %244 }
 0x1d1   :  { %v247_v26 = vadd.f32 %v245_v25, %v237_v24 }
 0x1d3   :  { %1915 = vtanh.f32 %v247_v26 }
 0x1e0   :  { %v1916_v27 = vpop.eup %1915 }
 0x1e1   :  { %250 = vrot.lane.b32.xlu1 %v1916_v27, %s2087_s17 }
 0x253   :  { %v251_v28 = vpop.permute.xlu1 %250 }
 0x254   :  { %v253_v29 = vmul.f32 %v1914_v21, %v251_v28 }
 0x256   :  { %v254_v30 = vpack.c.bf16 %v253_v29, %v253_v29 }
 0x258   :  { %256 = vrot.lane.b32.xlu1 %v254_v30, %s2082_s27 }
 0x2ca   :  { %v257_v31 = vpop.permute.xlu1 %256 }
 0x2cb   :  { %v259_v32 = vsel %vm185_vm3, %v257_v31, 0  ;;  %1741 = vmatmul.mubr.msk.bf16.vlgmr.msra.gmra.mxu1 %vm185_vm3, %v257_v31 }
 0x2cc   :  { %261 = vst [vmem:[#allocation3] sm:$0xf] %v259_v32  ;;  %1753 = vmatpush3.bf16.msra.mxu1 %v2143_v3  ;;  %1756 = vmatprep.mubr.msk.bf16.mxu1 %vm2085_vm0, %v2084_v0 }
 0x2cd   :  { %1754 = vmatprep.subr.bf16.mxu1 %v2084_v0 }
 0x2d0   :  { %1755 = vmatpush3.bf16.msra.mxu1 %v2158_v6 }
 0x2d1   :  { %1768 = vmatprep.subr.bf16.mxu1 %v2084_v0 }
 0x38b   :  { %v300_v36 = vpop.f32.mrf.mxu1 }
 0x38c   :  { %v306_v37 = vadd.f32 %v300_v36, %v133_v35 }
 0x38d   :  { %v1742_v38 = vpop.f32.mrf.mxu1 }
 0x38e   :  { %1917 = vtanh.f32 %v306_v37  ;;  %v1610_v42 = vmul.f32 -1.442695, %v306_v37 }
 0x38f   :  { %v303_v39 = vpop.f32.mrf.mxu1 }
 0x390   :  { %1919 = vpow2.f32 %v1610_v42 }
 0x391   :  { %v1743_v40 = vpop.f32.mrf.mxu1 }
 0x39b   :  { %v1918_v41 = vpop.eup %1917 }
 0x39c   :  { %316 = vrot.lane.b32.xlu0 %v1918_v41, %s2087_s17 }
 0x39d   :  { %v1920_v43 = vpop.eup %1919 }
 0x39e   :  { %v310_v44 = vadd.f32 1.0, %v1920_v43 }
 0x3a0   :  { %1921 = vrcp.f32 %v310_v44 }
 0x3ad   :  { %v1922_v45 = vpop.eup %1921 }
 0x3ae   :  { %v314_v48 = vmul.f32 %v1922_v45, %v247_v26  ;;  %v141_v26 = vadd.f32 %v2194_v33, %v2179_v9 }
 0x40e   :  { %v317_v46 = vpop.permute.xlu0 %316 }
 0x40f   :  { %v319_v47 = vmul.f32 %v1922_v45, %v317_v46 }
 0x411   :  { %321 = vrot.lane.b32.xlu1 %v319_v47, %s2087_s17 }
 0x483   :  { %v322_v49 = vpop.permute.xlu1 %321 }
 0x484   :  { %v324_v50 = vadd.f32 %v322_v49, %v314_v48  ;;  %v146_v48 = vadd.f32 %v2179_v9, %v2221_v60 }
 0x486   :  { %1923 = vtanh.f32 %v324_v50 }
 0x493   :  { %v1924_v53 = vpop.eup %1923 }
 0x494   :  { %327 = vrot.lane.b32.xlu0 %v1924_v53, %s2087_s17 }
 0x506   :  { %v328_v54 = vpop.permute.xlu0 %327 }
 0x507   :  { %v330_v55 = vmul.f32 %v1922_v45, %v328_v54 }
 0x509   :  { %v331_v56 = vpack.c.bf16 %v330_v55, %v330_v55 }
 0x50b   :  { %333 = vrot.lane.b32.xlu1 %v331_v56, %s2082_s27 }
 0x57d   :  { %v334_v57 = vpop.permute.xlu1 %333 }
 0x57e   :  { %v336_v58 = vsel %vm185_vm3, %v334_v57, 0  ;;  %1749 = vmatmul.mubr.msk.bf16.vlgmr.msra.gmra.mxu0 %vm185_vm3, %v334_v57 }
 0x57f   :  { %339 = vst [vmem:[#allocation3 + $0x4] sm:$0xf] %v336_v58  ;;  %1761 = vmatpush3.bf16.msra.mxu0 %v2143_v3  ;;  %1764 = vmatprep.mubr.msk.bf16.mxu0 %vm2085_vm0, %v2084_v0 }
 0x580   :  { %1762 = vmatprep.subr.bf16.mxu0 %v2084_v0 }
 0x583   :  { %1763 = vmatpush3.bf16.msra.mxu0 %v2158_v6 }
 0x584   :  { %1776 = vmatprep.subr.bf16.mxu0 %v2084_v0 }
 0x63e   :  { %v378_v1 = vpop.f32.mrf.mxu0 }
 0x63f   :  { %v384_v2 = vadd.f32 %v378_v1, %v138_v63 }
 0x640   :  { %v1750_v4 = vpop.f32.mrf.mxu0 }
 0x641   :  { %1925 = vtanh.f32 %v384_v2  ;;  %v1612_v12 = vmul.f32 -1.442695, %v384_v2 }
 0x642   :  { %v381_v5 = vpop.f32.mrf.mxu0 }
 0x643   :  { %1927 = vpow2.f32 %v1612_v12 }
 0x644   :  { %v1751_v10 = vpop.f32.mrf.mxu0 }
 0x64e   :  { %v1926_v11 = vpop.eup %1925 }
 0x64f   :  { %394 = vrot.lane.b32.xlu0 %v1926_v11, %s2087_s17 }
 0x650   :  { %v1928_v13 = vpop.eup %1927 }
 0x651   :  { %v388_v14 = vadd.f32 1.0, %v1928_v13 }
 0x653   :  { %1929 = vrcp.f32 %v388_v14 }
 0x660   :  { %v1930_v15 = vpop.eup %1929 }
 0x661   :  { %v392_v8 = vmul.f32 %v1930_v15, %v324_v50 }
 0x6c1   :  { %v395_v16 = vpop.permute.xlu0 %394 }
 0x6c2   :  { %v397_v17 = vmul.f32 %v1930_v15, %v395_v16 }
 0x6c4   :  { %399 = vrot.lane.b32.xlu1 %v397_v17, %s2087_s17 }
 0x736   :  { %v400_v18 = vpop.permute.xlu1 %399 }
 0x737   :  { %v402_v19 = vadd.f32 %v400_v18, %v392_v8 }
 0x739   :  { %1931 = vtanh.f32 %v402_v19 }
 0x746   :  { %v1932_v20 = vpop.eup %1931 }
 0x747   :  { %405 = vrot.lane.b32.xlu0 %v1932_v20, %s2087_s17 }
 0x7b9   :  { %v406_v21 = vpop.permute.xlu0 %405 }
 0x7ba   :  { %v408_v22 = vmul.f32 %v1930_v15, %v406_v21  ;;  %v149_v15 = vadd.f32 %v2179_v9, %v2225_v62 }
 0x7bc   :  { %v409_v23 = vpack.c.bf16 %v408_v22, %v408_v22 }
 0x7be   :  { %411 = vrot.lane.b32.xlu1 %v409_v23, %s2082_s27 }
 0x830   :  { %v412_v24 = vpop.permute.xlu1 %411 }
 0x831   :  { %v414_v25 = vsel %vm185_vm3, %v412_v24, 0  ;;  %1757 = vmatmul.mubr.msk.bf16.vlgmr.msra.gmra.mxu1 %vm185_vm3, %v412_v24 }
 0x832   :  { %417 = vst [vmem:[#allocation3 + $0x8] sm:$0xf] %v414_v25  ;;  %1769 = vmatpush3.bf16.msra.mxu1 %v2143_v3  ;;  %1772 = vmatprep.mubr.msk.bf16.mxu1 %vm2085_vm0, %v2084_v0 }
 0x833   :  { %1770 = vmatprep.subr.bf16.mxu1 %v2084_v0 }
 0x836   :  { %1771 = vmatpush3.bf16.msra.mxu1 %v2158_v6 }
 0x837   :  { %1784 = vmatprep.subr.bf16.mxu1 %v2084_v0 }
 0x8f1   :  { %v456_v27 = vpop.f32.mrf.mxu1 }
 0x8f2   :  { %v462_v28 = vadd.f32 %v456_v27, %v141_v26  ;;  %v1895_v27 = vld [vmem:[#allocation4 + $0x38] sm:$0xff]  }
 0x8f3   :  { %v1758_v29 = vpop.f32.mrf.mxu1 }
 0x8f4   :  { %1933 = vtanh.f32 %v462_v28  ;;  %v1614_v34 = vmul.f32 -1.442695, %v462_v28 }
 0x8f5   :  { %v459_v30 = vpop.f32.mrf.mxu1 }
 0x8f6   :  { %1935 = vpow2.f32 %v1614_v34 }
 0x8f7   :  { %v1759_v31 = vpop.f32.mrf.mxu1 }
 0x901   :  { %v1934_v32 = vpop.eup %1933 }
 0x902   :  { %472 = vrot.lane.b32.xlu0 %v1934_v32, %s2087_s17  ;;  %v1897_v32 = vld [vmem:[#allocation4 + $0x30] sm:$0xff]  }
 0x903   :  { %v1936_v35 = vpop.eup %1935 }
 0x904   :  { %v466_v36 = vadd.f32 1.0, %v1936_v35  ;;  %v1896_v35 = vld [vmem:[#allocation3] sm:$0xff]  }
 0x906   :  { %1937 = vrcp.f32 %v466_v36 }
 0x913   :  { %v1938_v37 = vpop.eup %1937 }
 0x914   :  { %v470_v33 = vmul.f32 %v1938_v37, %v402_v19 }
 0x974   :  { %v473_v38 = vpop.permute.xlu0 %472 }
 0x975   :  { %v475_v39 = vmul.f32 %v1938_v37, %v473_v38  ;;  %v1899_v38 = vld [vmem:[#allocation4 + $0x20] sm:$0xff]  }
 0x977   :  { %477 = vrot.lane.b32.xlu1 %v475_v39, %s2087_s17  ;;  %v1900_v39 = vld [vmem:[#allocation4 + $0x18] sm:$0xff]  }
 0x9e9   :  { %v478_v40 = vpop.permute.xlu1 %477 }
 0x9ea   :  { %v480_v41 = vadd.f32 %v478_v40, %v470_v33  ;;  %v1901_v33 = vld [vmem:[#allocation4 + $0x10] sm:$0xff]   ;;  %v1902_v40 = vld [vmem:[#allocation4 + $0x8] sm:$0xff]  }
 0x9ec   :  { %1939 = vtanh.f32 %v480_v41 }
 0x9f9   :  { %v1940_v42 = vpop.eup %1939 }
 0x9fa   :  { %483 = vrot.lane.b32.xlu0 %v1940_v42, %s2087_s17 }
 0xa6c   :  { %v484_v43 = vpop.permute.xlu0 %483 }
 0xa6d   :  { %v486_v44 = vmul.f32 %v1938_v37, %v484_v43  ;;  %v1898_v37 = vld [vmem:[#allocation4 + $0x28] sm:$0xff]  }
 0xa6f   :  { %v487_v45 = vpack.c.bf16 %v486_v44, %v486_v44  ;;  %v154_v44 = vadd.f32 %v2219_v59, %v2179_v9 }
 0xa71   :  { %489 = vrot.lane.b32.xlu1 %v487_v45, %s2082_s27 }
 0xae3   :  { %v490_v46 = vpop.permute.xlu1 %489 }
 0xae4   :  { %v492_v47 = vsel %vm185_vm3, %v490_v46, 0  ;;  %1765 = vmatmul.mubr.msk.bf16.vlgmr.msra.gmra.mxu0 %vm185_vm3, %v490_v46 }
 0xae5   :  { %495 = vst [vmem:[#allocation3 + $0xc] sm:$0xf] %v492_v47  ;;  %1777 = vmatpush3.bf16.msra.mxu0 %v2143_v3  ;;  %1780 = vmatprep.mubr.msk.bf16.mxu0 %vm2085_vm0, %v2084_v0 }
 0xae6   :  { %1778 = vmatprep.subr.bf16.mxu0 %v2084_v0 }
 0xae9   :  { %1779 = vmatpush3.bf16.msra.mxu0 %v2158_v6 }
 0xaea   :  { %1792 = vmatprep.subr.bf16.mxu0 %v1895_v27 }
 0xaec   :  { %v1904_v42 = vld [vmem:[#allocation3 + $0x8] sm:$0xff]  }
 0xba4   :  { %v534_v49 = vpop.f32.mrf.mxu0 }
 0xba5   :  { %v540_v50 = vadd.f32 %v534_v49, %v146_v48 }
 0xba6   :  { %v1766_v51 = vpop.f32.mrf.mxu0 }
 0xba7   :  { %1941 = vtanh.f32 %v540_v50  ;;  %v1616_v55 = vmul.f32 -1.442695, %v540_v50 }
 0xba8   :  { %v537_v52 = vpop.f32.mrf.mxu0 }
 0xba9   :  { %1943 = vpow2.f32 %v1616_v55 }
 0xbaa   :  { %v1767_v53 = vpop.f32.mrf.mxu0 }
 0xbb4   :  { %v1942_v54 = vpop.eup %1941 }
 0xbb5   :  { %550 = vrot.lane.b32.xlu0 %v1942_v54, %s2087_s17 }
 0xbb6   :  { %v1944_v56 = vpop.eup %1943 }
 0xbb7   :  { %v544_v57 = vadd.f32 1.0, %v1944_v56 }
 0xbb9   :  { %1945 = vrcp.f32 %v544_v57 }
 0xbc6   :  { %v1946_v58 = vpop.eup %1945 }
 0xbc7   :  { %v548_v60 = vmul.f32 %v1946_v58, %v480_v41  ;;  %v1903_v41 = vld [vmem:[#allocation4] sm:$0xff]  }
 0xc27   :  { %v551_v63 = vpop.permute.xlu0 %550 }
 0xc28   :  { %v553_v1 = vmul.f32 %v1946_v58, %v551_v63 }
 0xc2a   :  { %555 = vrot.lane.b32.xlu1 %v553_v1, %s2087_s17  ;;  %v2288_v1 = vld [vmem:[%s2427_s5 + $0x8] sm:$0xff]  }
 0xc9c   :  { %v556_v2 = vpop.permute.xlu1 %555 }
 0xc9d   :  { %v558_v4 = vadd.f32 %v556_v2, %v548_v60  ;;  %v2295_v60 = vld [vmem:[%s2427_s5] sm:$0xff]  }
 0xc9f   :  { %1947 = vtanh.f32 %v558_v4 }
 0xcac   :  { %v1948_v5 = vpop.eup %1947 }
 0xcad   :  { %561 = vrot.lane.b32.xlu0 %v1948_v5, %s2087_s17 }
 0xd1f   :  { %v562_v10 = vpop.permute.xlu0 %561 }
 0xd20   :  { %v564_v11 = vmul.f32 %v1946_v58, %v562_v10 }
 0xd22   :  { %v565_v12 = vpack.c.bf16 %v564_v11, %v564_v11 }
 0xd24   :  { %567 = vrot.lane.b32.xlu1 %v565_v12, %s2082_s27  ;;  %v157_v12 = vadd.f32 %v2223_v61, %v2179_v9 }
 0xd96   :  { %v568_v13 = vpop.permute.xlu1 %567 }
 0xd97   :  { %v570_v14 = vsel %vm185_vm3, %v568_v13, 0  ;;  %1773 = vmatmul.mubr.msk.bf16.vlgmr.msra.gmra.mxu1 %vm185_vm3, %v568_v13 }
 0xd98   :  { %573 = vst [vmem:[#allocation3 + $0x10] sm:$0xf] %v570_v14  ;;  %1785 = vmatpush3.bf16.msra.mxu1 %v2143_v3  ;;  %1788 = vmatprep.mubr.msk.bf16.mxu1 %vm2085_vm0, %v2084_v0 }
 0xd99   :  { %1786 = vmatprep.subr.bf16.mxu1 %v2084_v0 }
 0xd9c   :  { %1787 = vmatpush3.bf16.msra.mxu1 %v2158_v6 }
 0xd9d   :  { %1816 = vmatprep.subr.bf16.mxu1 %v2084_v0 }
 0xe57   :  { %v612_v16 = vpop.f32.mrf.mxu1 }
 0xe58   :  { %v618_v17 = vadd.f32 %v612_v16, %v149_v15 }
 0xe59   :  { %v1774_v8 = vpop.f32.mrf.mxu1 }
 0xe5a   :  { %1949 = vtanh.f32 %v618_v17  ;;  %v1618_v3 = vmul.f32 -1.442695, %v618_v17  ;;  %v2324_v8 = vld [vmem:[%s2428_s6] ss:$0 sm:$0xff]  ;;  %s2088_s6 = smov [#allocation7]  }
 0xe5b   :  { %v615_v18 = vpop.f32.mrf.mxu1  ;;  %s1588_s25 = sshll.u32 %s2088_s6, 4  ;;  %s1589_s25 = int_to_ptr.vmem [resolvable:$true] %s1588_s25 }
 0xe5c   :  { %1951 = vpow2.f32 %v1618_v3  ;;  %s2057_s26 = scalar_lea.vmem %s1589_s25, 128  ;;  %p2062_p6 = scmp.lt.s32.totalorder %s1589_s25, %s1589_s25 }
 0xe5d   :  { %v1775_v19 = vpop.f32.mrf.mxu1  ;;  %p2058_p5 = scmp.ne.s32.totalorder %s1589_s25, %s2057_s26  ;;  %p2063_p7 = scmp.lt.s32.totalorder %s2057_s26, %s2057_s26 }
 0xe5f   :  { %p2064_p8 = por %p2063_p7, %p2062_p6 }
 0xe61   :  { %p2065_p9 = pnand %p2064_p8, %p2058_p5 }
 0xe67   :  { %v1950_v20 = vpop.eup %1949 }
 0xe68   :  { %628 = vrot.lane.b32.xlu0 %v1950_v20, %s2087_s17 }
 0xe69   :  { %v1952_v21 = vpop.eup %1951 }
 0xe6a   :  { %v622_v22 = vadd.f32 1.0, %v1952_v21 }
 0xe6c   :  { %1953 = vrcp.f32 %v622_v22 }
 0xe79   :  { %v1954_v6 = vpop.eup %1953 }
 0xe7a   :  { %v626_v62 = vmul.f32 %v1954_v6, %v558_v4 }
 0xeda   :  { %v629_v23 = vpop.permute.xlu0 %628 }
 0xedb   :  { %v631_v24 = vmul.f32 %v1954_v6, %v629_v23 }
 0xedd   :  { %633 = vrot.lane.b32.xlu1 %v631_v24, %s2087_s17 }
 0xf4f   :  { %v634_v25 = vpop.permute.xlu1 %633 }
 0xf50   :  { %v636_v26 = vadd.f32 %v634_v25, %v626_v62 }
 0xf52   :  { %1955 = vtanh.f32 %v636_v26 }
 0xf5f   :  { %v1956_v28 = vpop.eup %1955 }
 0xf60   :  { %639 = vrot.lane.b32.xlu0 %v1956_v28, %s2087_s17 }
 0xfd2   :  { %v640_v29 = vpop.permute.xlu0 %639 }
 0xfd3   :  { %v642_v30 = vmul.f32 %v1954_v6, %v640_v29 }
 0xfd5   :  { %v643_v31 = vpack.c.bf16 %v642_v30, %v642_v30 }
 0xfd7   :  { %645 = vrot.lane.b32.xlu1 %v643_v31, %s2082_s27 }
0x1049   :  { %v646_v34 = vpop.permute.xlu1 %645 }
0x104a   :  { %v648_v36 = vsel %vm185_vm3, %v646_v34, 0  ;;  %1781 = vmatmul.mubr.msk.bf16.vlgmr.msra.gmra.mxu0 %vm185_vm3, %v646_v34 }
0x104b   :  { %651 = vst [vmem:[#allocation3 + $0x14] sm:$0xf] %v648_v36  ;;  %1793 = vmatpush3.bf16.msra.mxu0 %v1895_v27  ;;  %1808 = vmatprep.mubr.bf16.mxu0 %v1896_v35 }
0x104c   :  { %1794 = vmatprep.subr.bf16.mxu0 %v1897_v32 }
0x104f   :  { %1795 = vmatpush3.bf16.msra.mxu0 %v1897_v32 }
0x1050   :  { %1796 = vmatprep.subr.bf16.mxu0 %v1898_v37 }
0x1052   :  { %v1905_v43 = vld [vmem:[#allocation3 + $0x10] sm:$0xff]  }
0x1053   :  { %1797 = vmatpush3.bf16.msra.mxu0 %v1898_v37 }
0x1054   :  { %1798 = vmatprep.subr.bf16.mxu0 %v1899_v38 }
0x1057   :  { %1799 = vmatpush3.bf16.msra.mxu0 %v1899_v38 }
0x1058   :  { %1800 = vmatprep.subr.bf16.mxu0 %v1900_v39 }
0x105b   :  { %1801 = vmatpush3.bf16.msra.mxu0 %v1900_v39 }
0x105c   :  { %1802 = vmatprep.subr.bf16.mxu0 %v1901_v33 }
0x105f   :  { %1803 = vmatpush3.bf16.msra.mxu0 %v1901_v33 }
0x1060   :  { %1804 = vmatprep.subr.bf16.mxu0 %v1902_v40 }
0x1063   :  { %1805 = vmatpush3.bf16.msra.mxu0 %v1902_v40 }
0x1064   :  { %1806 = vmatprep.subr.bf16.mxu0 %v1903_v41 }
0x1067   :  { %1807 = vmatpush3.bf16.msra.mxu0 %v1903_v41 }
0x1068   :  { %1856 = vmatprep.subr.bf16.mxu0 %v2084_v0 }
0x106a   :  { %1809 = vmatmul.mubr.bf16.vlgmr.msra.gmra.mxu0 %v1904_v42 }
0x106b   :  { %1812 = vmatprep.mubr.bf16.mxu0 %v1905_v43  ;;  %1857 = vmatpush3.bf16.msra.mxu0 %v2288_v1 }
0x106c   :  { %1858 = vmatprep.subr.bf16.mxu0 %v2084_v0 }
0x106f   :  { %1859 = vmatpush3.bf16.msra.mxu0 %v2295_v60 }
0x1070   :  { %1872 = vmatprep.subr.bf16.mxu0 %v2084_v0 }
0x110a   :  { %v690_v45 = vpop.f32.mrf.mxu0 }
0x110b   :  { %v696_v46 = vadd.f32 %v690_v45, %v154_v44 }
0x110c   :  { %v1782_v47 = vpop.f32.mrf.mxu0 }
0x110d   :  { %1957 = vtanh.f32 %v696_v46  ;;  %v1620_v51 = vmul.f32 -1.442695, %v696_v46 }
0x110e   :  { %v693_v48 = vpop.f32.mrf.mxu0 }
0x110f   :  { %1959 = vpow2.f32 %v1620_v51 }
0x1110   :  { %v1783_v49 = vpop.f32.mrf.mxu0 }
0x111a   :  { %v1958_v50 = vpop.eup %1957 }
0x111b   :  { %706 = vrot.lane.b32.xlu0 %v1958_v50, %s2087_s17 }
0x111c   :  { %v1960_v52 = vpop.eup %1959 }
0x111d   :  { %v700_v53 = vadd.f32 1.0, %v1960_v52 }
0x111f   :  { %1961 = vrcp.f32 %v700_v53 }
0x112a   :  { %v2317_v13 = vpop.f32.mrf.mxu0 }
0x112c   :  { %v1962_v54 = vpop.eup %1961  ;;  %v945_v16 = vpop.f32.mrf.mxu0 }
0x112d   :  { %v704_v59 = vmul.f32 %v1962_v54, %v636_v26  ;;  %v946_v19 = vadd.f32 %v2324_v8, %v945_v16 }
0x112e   :  { %v2338_v36 = vpop.f32.mrf.mxu0 }
0x1130   :  { %v948_v37 = vpop.f32.mrf.mxu0 }
0x1131   :  { %v949_v38 = vadd.f32 %v2324_v8, %v948_v37 }
0x118d   :  { %v707_v55 = vpop.permute.xlu0 %706 }
0x118e   :  { %v709_v56 = vmul.f32 %v1962_v54, %v707_v55 }
0x1190   :  { %711 = vrot.lane.b32.xlu1 %v709_v56, %s2087_s17 }
0x1202   :  { %v712_v57 = vpop.permute.xlu1 %711 }
0x1203   :  { %v2281_v58 = vadd.f32 %v712_v57, %v704_v59  ;;  %v954_v57 = vadd.f32 %v2317_v13, %v2324_v8 }
0x1205   :  { %1963 = vtanh.f32 %v2281_v58 }
0x1212   :  { %v1964_v63 = vpop.eup %1963 }
0x1213   :  { %717 = vrot.lane.b32.xlu0 %v1964_v63, %s2087_s17 }
0x1285   :  { %v718_v2 = vpop.permute.xlu0 %717 }
0x1286   :  { %v720_v4 = vmul.f32 %v1962_v54, %v718_v2 }
0x1288   :  { %v721_v5 = vpack.c.bf16 %v720_v4, %v720_v4 }
0x128a   :  { %723 = vrot.lane.b32.xlu1 %v721_v5, %s2082_s27 }
0x12fc   :  { %v724_v10 = vpop.permute.xlu1 %723 }
0x12fd   :  { %v726_v11 = vsel %vm185_vm3, %v724_v10, 0  ;;  %1789 = vmatmul.mubr.msk.bf16.vlgmr.msra.gmra.mxu1 %vm185_vm3, %v724_v10 }
0x12fe   :  { %729 = vst [vmem:[#allocation3 + $0x18] sm:$0xf] %v726_v11  ;;  %1817 = vmatpush3.bf16.msra.mxu1 %v2288_v1  ;;  %1820 = vmatprep.mubr.msk.bf16.mxu1 %vm2085_vm0, %v2084_v0 }
0x12ff   :  { %1818 = vmatprep.subr.bf16.mxu1 %v2084_v0 }
0x1302   :  { %1819 = vmatpush3.bf16.msra.mxu1 %v2295_v60 }
0x1303   :  { %1824 = vmatprep.subr.bf16.mxu1 %v2084_v0 }
0x1305   :  { %1821 = vmatmul.mubr.bf16.vlgmr.msra.gmra.mxu1 %v2086_v7 }
0x1306   :  { %1825 = vmatpush3.bf16.msra.mxu1 %v2288_v1  ;;  %1828 = vmatprep.mubr.msk.bf16.mxu1 %vm2085_vm0, %v2084_v0 }
0x1307   :  { %1826 = vmatprep.subr.bf16.mxu1 %v2084_v0 }
0x130a   :  { %1827 = vmatpush3.bf16.msra.mxu1 %v2295_v60 }
0x130b   :  { %1832 = vmatprep.subr.bf16.mxu1 %v2084_v0 }
0x13bd   :  { %v768_v14 = vpop.f32.mrf.mxu1 }
0x13be   :  { %v2319_v15 = vadd.f32 %v768_v14, %v157_v12 }
0x13bf   :  { %v1790_v7 = vpop.f32.mrf.mxu1 }
0x13c1   :  { %v771_v17 = vpop.f32.mrf.mxu1 }
0x13c3   :  { %v1791_v18 = vpop.f32.mrf.mxu1 }
0x13c5   :  { %v1035_v20 = vpop.f32.mrf.mxu1 }
0x13c6   :  { %v1041_v3 = vadd.f32 %v1035_v20, %v946_v19 }
0x13c7   :  { %v1822_v21 = vpop.f32.mrf.mxu1 }
0x13c8   :  { %1965 = vtanh.f32 %v1041_v3  ;;  %v1638_v6 = vmul.f32 -1.442695, %v1041_v3 }
0x13c9   :  { %v1038_v9 = vpop.f32.mrf.mxu1 }
0x13ca   :  { %1967 = vpow2.f32 %v1638_v6  ;;  %v1622_v9 = vmul.f32 -1.442695, %v2319_v15 }
0x13cb   :  { %v1823_v61 = vpop.f32.mrf.mxu1 }
0x13d5   :  { %v1966_v22 = vpop.eup %1965 }
0x13d6   :  { %1051 = vrot.lane.b32.xlu0 %v1966_v22, %s2087_s17 }
0x13d7   :  { %v1968_v23 = vpop.eup %1967 }
0x13d8   :  { %v1045_v24 = vadd.f32 1.0, %v1968_v23 }
0x13da   :  { %1969 = vrcp.f32 %v1045_v24 }
0x13e7   :  { %v1970_v62 = vpop.eup %1969 }
0x13e8   :  { %v1049_v27 = vmul.f32 0.0, %v1970_v62 }
0x1448   :  { %v1052_v25 = vpop.permute.xlu0 %1051 }
0x1449   :  { %v1054_v26 = vmul.f32 %v1970_v62, %v1052_v25 }
0x144b   :  { %1056 = vrot.lane.b32.xlu1 %v1054_v26, %s2087_s17 }
0x14bd   :  { %v1057_v28 = vpop.permute.xlu1 %1056 }
0x14be   :  { %v1059_v29 = vadd.f32 %v1057_v28, %v1049_v27 }
0x14c0   :  { %1971 = vtanh.f32 %v1059_v29 }
0x14cd   :  { %v1972_v30 = vpop.eup %1971 }
0x14ce   :  { %1062 = vrot.lane.b32.xlu0 %v1972_v30, %s2087_s17 }
0x1540   :  { %v1063_v31 = vpop.permute.xlu0 %1062 }
0x1541   :  { %v1065_v32 = vmul.f32 %v1970_v62, %v1063_v31 }
0x1543   :  { %v1066_v34 = vpack.c.bf16 %v1065_v32, %v1065_v32 }
0x1545   :  { %1069 = vrot.lane.b32.xlu1 %v1066_v34, %s2082_s27  ;;  %v957_v34 = vadd.f32 %v2338_v36, %v2324_v8 }
0x15b7   :  { %v1070_v35 = vpop.permute.xlu1 %1069 }
0x15b8   :  { %1829 = vmatmul.mubr.msk.bf16.vlgmr.msra.gmra.mxu1 %vm185_vm3, %v1070_v35 }
0x15b9   :  { %1833 = vmatpush3.bf16.msra.mxu1 %v2288_v1  ;;  %1836 = vmatprep.mubr.msk.bf16.mxu1 %vm2085_vm0, %v2084_v0 }
0x15ba   :  { %1834 = vmatprep.subr.bf16.mxu1 %v2084_v0 }
0x15bd   :  { %1835 = vmatpush3.bf16.msra.mxu1 %v2295_v60 }
0x15be   :  { %1840 = vmatprep.subr.bf16.mxu1 %v2084_v0 }
0x1678   :  { %v1108_v39 = vpop.f32.mrf.mxu1 }
0x1679   :  { %v1114_v33 = vadd.f32 %v1108_v39, %v949_v38 }
0x167a   :  { %v1830_v40 = vpop.f32.mrf.mxu1 }
0x167b   :  { %1973 = vtanh.f32 %v1114_v33  ;;  %v1640_v44 = vmul.f32 -1.442695, %v1114_v33 }
0x167c   :  { %v1111_v41 = vpop.f32.mrf.mxu1 }
0x167d   :  { %1975 = vpow2.f32 %v1640_v44 }
0x167e   :  { %v1831_v42 = vpop.f32.mrf.mxu1 }
0x1688   :  { %v1974_v43 = vpop.eup %1973 }
0x1689   :  { %1124 = vrot.lane.b32.xlu0 %v1974_v43, %s2087_s17 }
0x168a   :  { %v1976_v45 = vpop.eup %1975 }
0x168b   :  { %v1118_v46 = vadd.f32 1.0, %v1976_v45 }
0x168d   :  { %1977 = vrcp.f32 %v1118_v46 }
0x169a   :  { %v1978_v47 = vpop.eup %1977 }
0x169b   :  { %v1122_v50 = vmul.f32 %v1978_v47, %v1059_v29 }
0x16fb   :  { %v1125_v48 = vpop.permute.xlu0 %1124 }
0x16fc   :  { %v1127_v49 = vmul.f32 %v1978_v47, %v1125_v48 }
0x16fe   :  { %1129 = vrot.lane.b32.xlu1 %v1127_v49, %s2087_s17 }
0x1770   :  { %v1130_v51 = vpop.permute.xlu1 %1129 }
0x1771   :  { %v1132_v52 = vadd.f32 %v1130_v51, %v1122_v50 }
0x1773   :  { %1979 = vtanh.f32 %v1132_v52 }
0x1780   :  { %v1980_v53 = vpop.eup %1979 }
0x1781   :  { %1135 = vrot.lane.b32.xlu0 %v1980_v53, %s2087_s17 }
0x17f3   :  { %v1136_v54 = vpop.permute.xlu0 %1135 }
0x17f4   :  { %v1138_v55 = vmul.f32 %v1978_v47, %v1136_v54 }
0x17f6   :  { %v1139_v56 = vpack.c.bf16 %v1138_v55, %v1138_v55 }
0x17f8   :  { %1142 = vrot.lane.b32.xlu1 %v1139_v56, %s2082_s27 }
0x186a   :  { %v1143_v59 = vpop.permute.xlu1 %1142 }
0x186b   :  { %1837 = vmatmul.mubr.msk.bf16.vlgmr.msra.gmra.mxu1 %vm185_vm3, %v1143_v59 }
0x186c   :  { %1841 = vmatpush3.bf16.msra.mxu1 %v2288_v1  ;;  %1844 = vmatprep.mubr.msk.bf16.mxu1 %vm2085_vm0, %v2084_v0 }
0x186d   :  { %1842 = vmatprep.subr.bf16.mxu1 %v2084_v0 }
0x1870   :  { %1843 = vmatpush3.bf16.msra.mxu1 %v2295_v60 }
0x1871   :  { %1848 = vmatprep.subr.bf16.mxu1 %v2084_v0 }
0x192b   :  { %v1181_v63 = vpop.f32.mrf.mxu1 }
0x192c   :  { %v1187_v2 = vadd.f32 %v1181_v63, %v954_v57 }
0x192d   :  { %v1838_v4 = vpop.f32.mrf.mxu1 }
0x192e   :  { %1981 = vtanh.f32 %v1187_v2  ;;  %v1642_v12 = vmul.f32 -1.442695, %v1187_v2 }
0x192f   :  { %v1184_v5 = vpop.f32.mrf.mxu1 }
0x1930   :  { %1983 = vpow2.f32 %v1642_v12 }
0x1931   :  { %v1839_v10 = vpop.f32.mrf.mxu1 }
0x193b   :  { %v1982_v11 = vpop.eup %1981 }
0x193c   :  { %1197 = vrot.lane.b32.xlu0 %v1982_v11, %s2087_s17 }
0x193d   :  { %v1984_v14 = vpop.eup %1983 }
0x193e   :  { %v1191_v7 = vadd.f32 1.0, %v1984_v14 }
0x1940   :  { %1985 = vrcp.f32 %v1191_v7 }
0x194d   :  { %v1986_v16 = vpop.eup %1985 }
0x194e   :  { %v1195_v13 = vmul.f32 %v1986_v16, %v1132_v52 }
0x19ae   :  { %v1198_v17 = vpop.permute.xlu0 %1197 }
0x19af   :  { %v1200_v18 = vmul.f32 %v1986_v16, %v1198_v17 }
0x19b1   :  { %1202 = vrot.lane.b32.xlu1 %v1200_v18, %s2087_s17 }
0x1a23   :  { %v1203_v19 = vpop.permute.xlu1 %1202 }
0x1a24   :  { %v1205_v20 = vadd.f32 %v1203_v19, %v1195_v13 }
0x1a26   :  { %1987 = vtanh.f32 %v1205_v20 }
0x1a27   :  { %1989 = vtanh.f32 %v2319_v15 }
0x1a28   :  { %1991 = vpow2.f32 %v1622_v9 }
0x1a33   :  { %v1988_v3 = vpop.eup %1987 }
0x1a34   :  { %1208 = vrot.lane.b32.xlu0 %v1988_v3, %s2087_s17  ;;  %v1990_v21 = vpop.eup %1989 }
0x1a35   :  { %v1992_v61 = vpop.eup %1991 }
0x1a36   :  { %v778_v22 = vadd.f32 1.0, %v1992_v61 }
0x1a38   :  { %784 = vrot.lane.b32.xlu0 %v1990_v21, %s2087_s17  ;;  %1993 = vrcp.f32 %v778_v22 }
0x1a45   :  { %v1994_v62 = vpop.eup %1993 }
0x1a46   :  { %v782_v28 = vmul.f32 %v1994_v62, %v2281_v58 }
0x1aa6   :  { %v1209_v6 = vpop.permute.xlu0 %1208 }
0x1aa7   :  { %v1211_v23 = vmul.f32 %v1986_v16, %v1209_v6 }
0x1aa9   :  { %v1212_v24 = vpack.c.bf16 %v1211_v23, %v1211_v23 }
0x1aaa   :  { %v785_v25 = vpop.permute.xlu0 %784 }
0x1aab   :  { %v787_v26 = vmul.f32 %v1994_v62, %v785_v25  ;;  %1215 = vrot.lane.b32.xlu1 %v1212_v24, %s2082_s27 }
0x1aad   :  { %789 = vrot.lane.b32.xlu0 %v787_v26, %s2087_s17 }
0x1b1d   :  { %v1216_v27 = vpop.permute.xlu1 %1215 }
0x1b1e   :  { %1845 = vmatmul.mubr.msk.bf16.vlgmr.msra.gmra.mxu1 %vm185_vm3, %v1216_v27 }
0x1b1f   :  { %v790_v15 = vpop.permute.xlu0 %789  ;;  %1849 = vmatpush3.bf16.msra.mxu1 %v2288_v1  ;;  %1852 = vmatprep.mubr.msk.bf16.mxu1 %vm2085_vm0, %v2084_v0 }
0x1b20   :  { %v792_v29 = vadd.f32 %v790_v15, %v782_v28  ;;  %1850 = vmatprep.subr.bf16.mxu1 %v2084_v0 }
0x1b22   :  { %1995 = vtanh.f32 %v792_v29 }
0x1b23   :  { %1851 = vmatpush3.bf16.msra.mxu1 %v2295_v60 }
0x1b24   :  { %1864 = vmatprep.subr.bf16.mxu1 %v2084_v0 }
0x1b2f   :  { %v1996_v30 = vpop.eup %1995 }
0x1b30   :  { %795 = vrot.lane.b32.xlu0 %v1996_v30, %s2087_s17 }
0x1ba2   :  { %v796_v31 = vpop.permute.xlu0 %795 }
0x1ba3   :  { %v798_v32 = vmul.f32 %v1994_v62, %v796_v31 }
0x1ba5   :  { %v799_v58 = vpack.c.bf16 %v798_v32, %v798_v32 }
0x1ba7   :  { %801 = vrot.lane.b32.xlu0 %v799_v58, %s2082_s27 }
0x1bde   :  { %v1254_v35 = vpop.f32.mrf.mxu1 }
0x1bdf   :  { %v1260_v37 = vadd.f32 %v1254_v35, %v957_v34 }
0x1be0   :  { %v1846_v38 = vpop.f32.mrf.mxu1 }
0x1be1   :  { %1997 = vtanh.f32 %v1260_v37  ;;  %v1644_v44 = vmul.f32 -1.442695, %v1260_v37 }
0x1be2   :  { %v1257_v39 = vpop.f32.mrf.mxu1 }
0x1be3   :  { %1999 = vpow2.f32 %v1644_v44 }
0x1be4   :  { %v1847_v33 = vpop.f32.mrf.mxu1 }
0x1bee   :  { %v1998_v40 = vpop.eup %1997 }
0x1bef   :  { %1270 = vrot.lane.b32.xlu1 %v1998_v40, %s2087_s17 }
0x1bf0   :  { %v2000_v36 = vpop.eup %1999 }
0x1bf1   :  { %v1264_v45 = vadd.f32 1.0, %v2000_v36 }
0x1bf3   :  { %2001 = vrcp.f32 %v1264_v45 }
0x1c00   :  { %v2002_v46 = vpop.eup %2001 }
0x1c01   :  { %v1268_v49 = vmul.f32 %v2002_v46, %v1205_v20 }
0x1c19   :  { %v802_v41 = vpop.permute.xlu0 %801 }
0x1c1a   :  { %v804_v42 = vsel %vm185_vm3, %v802_v41, 0 }
0x1c1b   :  { %807 = vst [vmem:[#allocation3 + $0x1c] sm:$0xf] %v804_v42 }
0x1c22   :  { %v1908_v43 = vld [vmem:[#allocation3 + $0x18] sm:$0xff]  }
0x1c23   :  { %1813 = vmatmul.mubr.bf16.gmra.mxu0 %v1908_v43 }
0x1c24   :  { %1860 = vmatprep.mubr.msk.bf16.mxu0 %vm2085_vm0, %v2084_v0 }
0x1c61   :  { %v1271_v47 = vpop.permute.xlu1 %1270 }
0x1c62   :  { %v1273_v48 = vmul.f32 %v2002_v46, %v1271_v47 }
0x1c64   :  { %1275 = vrot.lane.b32.xlu1 %v1273_v48, %s2087_s17 }
0x1cd6   :  { %v1276_v50 = vpop.permute.xlu1 %1275 }
0x1cd7   :  { %v1278_v51 = vadd.f32 %v1276_v50, %v1268_v49 }
0x1cd9   :  { %2003 = vtanh.f32 %v1278_v51 }
0x1ce3   :  { %v2387_v59 = vpop.f32.mrf.mxu0 }
0x1ce4   :  { %v970_v41 = vadd.f32 %v2387_v59, %v2324_v8 }
0x1ce5   :  { %v961_v57 = vpop.f32.mrf.mxu0 }
0x1ce6   :  { %v2004_v52 = vpop.eup %2003  ;;  %v962_v63 = vadd.f32 %v2324_v8, %v961_v57 }
0x1ce7   :  { %1281 = vrot.lane.b32.xlu1 %v2004_v52, %s2087_s17  ;;  %v1815_v23 = vpop.f32.mrf.mxu0 }
0x1ce9   :  { %v964_v24 = vpop.f32.mrf.mxu0 }
0x1cea   :  { %v965_v62 = vadd.f32 %v2324_v8, %v964_v24 }
0x1d59   :  { %v1282_v53 = vpop.permute.xlu1 %1281 }
0x1d5a   :  { %v1284_v54 = vmul.f32 %v2002_v46, %v1282_v53 }
0x1d5c   :  { %v1285_v55 = vpack.c.bf16 %v1284_v54, %v1284_v54 }
0x1d5e   :  { %1288 = vrot.lane.b32.xlu1 %v1285_v55, %s2082_s27 }
0x1dd0   :  { %v1289_v56 = vpop.permute.xlu1 %1288 }
0x1dd1   :  { %1853 = vmatmul.mubr.msk.bf16.vlgmr.msra.gmra.mxu1 %vm185_vm3, %v1289_v56 }
0x1dd2   :  { %1865 = vmatpush3.bf16.msra.mxu1 %v2288_v1  ;;  %1868 = vmatprep.mubr.msk.bf16.mxu1 %vm2085_vm0, %v2084_v0 }
0x1dd3   :  { %1866 = vmatprep.subr.bf16.mxu1 %v2084_v0 }
0x1dd6   :  { %1867 = vmatpush3.bf16.msra.mxu1 %v2295_v60 }
0x1e91   :  { %v1327_v2 = vpop.f32.mrf.mxu1 }
0x1e92   :  { %v1333_v4 = vadd.f32 %v1327_v2, %v962_v63 }
0x1e93   :  { %v1854_v5 = vpop.f32.mrf.mxu1 }
0x1e94   :  { %2005 = vtanh.f32 %v1333_v4  ;;  %v1646_v14 = vmul.f32 -1.442695, %v1333_v4  ;;  %v973_v4 = vadd.f32 %v1815_v23, %v2324_v8 }
0x1e95   :  { %v1330_v10 = vpop.f32.mrf.mxu1 }
0x1e96   :  { %2007 = vpow2.f32 %v1646_v14 }
0x1e97   :  { %v1855_v11 = vpop.f32.mrf.mxu1 }
0x1ea1   :  { %v2006_v12 = vpop.eup %2005 }
0x1ea2   :  { %1343 = vrot.lane.b32.xlu0 %v2006_v12, %s2087_s17 }
0x1ea3   :  { %v2008_v7 = vpop.eup %2007 }
0x1ea4   :  { %v1337_v16 = vadd.f32 1.0, %v2008_v7 }
0x1ea6   :  { %2009 = vrcp.f32 %v1337_v16 }
0x1eb3   :  { %v2010_v17 = vpop.eup %2009 }
0x1eb4   :  { %v1341_v19 = vmul.f32 %v2010_v17, %v1278_v51 }
0x1f14   :  { %v1344_v18 = vpop.permute.xlu0 %1343 }
0x1f15   :  { %v1346_v13 = vmul.f32 %v2010_v17, %v1344_v18 }
0x1f17   :  { %1348 = vrot.lane.b32.xlu1 %v1346_v13, %s2087_s17 }
0x1f89   :  { %v1349_v20 = vpop.permute.xlu1 %1348 }
0x1f8a   :  { %v1351_v3 = vadd.f32 %v1349_v20, %v1341_v19 }
0x1f8c   :  { %2011 = vtanh.f32 %v1351_v3 }
0x1f99   :  { %v2012_v21 = vpop.eup %2011 }
0x1f9a   :  { %1354 = vrot.lane.b32.xlu0 %v2012_v21, %s2087_s17 }
0x200c   :  { %v1355_v9 = vpop.permute.xlu0 %1354 }
0x200d   :  { %v1357_v61 = vmul.f32 %v2010_v17, %v1355_v9 }
0x200f   :  { %v1358_v22 = vpack.c.bf16 %v1357_v61, %v1357_v61 }
0x2011   :  { %1361 = vrot.lane.b32.xlu1 %v1358_v22, %s2082_s27 }
0x2083   :  { %v1362_v6 = vpop.permute.xlu1 %1361 }
0x2084   :  { %1861 = vmatmul.mubr.msk.bf16.vlgmr.msra.gmra.mxu0 %vm185_vm3, %v1362_v6 }
0x2085   :  { %1873 = vmatpush3.bf16.msra.mxu0 %v2288_v1  ;;  %1876 = vmatprep.mubr.msk.bf16.mxu0 %vm2085_vm0, %v2084_v0 }
0x2086   :  { %1874 = vmatprep.subr.bf16.mxu0 %v2084_v0 }
0x2089   :  { %1875 = vmatpush3.bf16.msra.mxu0 %v2295_v60 }
0x2144   :  { %v1400_v25 = vpop.f32.mrf.mxu0 }
0x2145   :  { %v1406_v26 = vadd.f32 %v1400_v25, %v965_v62 }
0x2146   :  { %v1862_v27 = vpop.f32.mrf.mxu0 }
0x2147   :  { %2013 = vtanh.f32 %v1406_v26  ;;  %v1648_v1 = vmul.f32 -1.442695, %v1406_v26 }
0x2148   :  { %v1403_v28 = vpop.f32.mrf.mxu0 }
0x2149   :  { %2015 = vpow2.f32 %v1648_v1 }
0x214a   :  { %v1863_v15 = vpop.f32.mrf.mxu0 }
0x2154   :  { %v2014_v29 = vpop.eup %2013 }
0x2155   :  { %1416 = vrot.lane.b32.xlu0 %v2014_v29, %s2087_s17 }
0x2156   :  { %v2016_v30 = vpop.eup %2015 }
0x2157   :  { %v1410_v31 = vadd.f32 1.0, %v2016_v30 }
0x2159   :  { %2017 = vrcp.f32 %v1410_v31 }
0x2166   :  { %v2018_v0 = vpop.eup %2017 }
0x2167   :  { %v1414_v58 = vmul.f32 %v2018_v0, %v1351_v3 }
0x21c7   :  { %v1417_v60 = vpop.permute.xlu0 %1416 }
0x21c8   :  { %v1419_v32 = vmul.f32 %v2018_v0, %v1417_v60 }
0x21ca   :  { %1421 = vrot.lane.b32.xlu1 %v1419_v32, %s2087_s17 }
0x223c   :  { %v1422_v34 = vpop.permute.xlu1 %1421 }
0x223d   :  { %v1424_v35 = vadd.f32 %v1422_v34, %v1414_v58 }
0x223f   :  { %2019 = vtanh.f32 %v1424_v35 }
0x224c   :  { %v2020_v37 = vpop.eup %2019 }
0x224d   :  { %1427 = vrot.lane.b32.xlu0 %v2020_v37, %s2087_s17 }
0x22bf   :  { %v1428_v38 = vpop.permute.xlu0 %1427 }
0x22c0   :  { %v1430_v39 = vmul.f32 %v2018_v0, %v1428_v38 }
0x22c2   :  { %v1431_v33 = vpack.c.bf16 %v1430_v39, %v1430_v39 }
0x22c4   :  { %1434 = vrot.lane.b32.xlu1 %v1431_v33, %s2082_s27 }
0x2336   :  { %v1435_v40 = vpop.permute.xlu1 %1434 }
0x2337   :  { %1869 = vmatmul.mubr.msk.bf16.vlgmr.msra.gmra.mxu1 %vm185_vm3, %v1435_v40 }
0x23f7   :  { %v1473_v42 = vpop.f32.mrf.mxu1 }
0x23f8   :  { %v1479_v43 = vadd.f32 %v1473_v42, %v970_v41 }
0x23f9   :  { %v1870_v44 = vpop.f32.mrf.mxu1 }
0x23fa   :  { %2021 = vtanh.f32 %v1479_v43  ;;  %v1650_v47 = vmul.f32 -1.442695, %v1479_v43 }
0x23fb   :  { %v1476_v36 = vpop.f32.mrf.mxu1 }
0x23fc   :  { %2023 = vpow2.f32 %v1650_v47 }
0x23fd   :  { %v1871_v45 = vpop.f32.mrf.mxu1 }
0x2407   :  { %v2022_v46 = vpop.eup %2021 }
0x2408   :  { %1489 = vrot.lane.b32.xlu0 %v2022_v46, %s2087_s17 }
0x2409   :  { %v2024_v48 = vpop.eup %2023 }
0x240a   :  { %v1483_v49 = vadd.f32 1.0, %v2024_v48 }
0x240c   :  { %2025 = vrcp.f32 %v1483_v49 }
0x2419   :  { %v2026_v50 = vpop.eup %2025 }
0x241a   :  { %v1487_v53 = vmul.f32 %v2026_v50, %v1424_v35 }
0x247a   :  { %v1490_v51 = vpop.permute.xlu0 %1489 }
0x247b   :  { %v1492_v52 = vmul.f32 %v2026_v50, %v1490_v51 }
0x247d   :  { %1494 = vrot.lane.b32.xlu1 %v1492_v52, %s2087_s17 }
0x24ef   :  { %v1495_v54 = vpop.permute.xlu1 %1494 }
0x24f0   :  { %v1497_v55 = vadd.f32 %v1495_v54, %v1487_v53 }
0x24f2   :  { %2027 = vtanh.f32 %v1497_v55 }
0x24ff   :  { %v2028_v56 = vpop.eup %2027 }
0x2500   :  { %1500 = vrot.lane.b32.xlu0 %v2028_v56, %s2087_s17 }
0x2572   :  { %v1501_v59 = vpop.permute.xlu0 %1500 }
0x2573   :  { %v1503_v57 = vmul.f32 %v2026_v50, %v1501_v59 }
0x2575   :  { %v1504_v63 = vpack.c.bf16 %v1503_v57, %v1503_v57 }
0x2577   :  { %1507 = vrot.lane.b32.xlu1 %v1504_v63, %s2082_s27 }
0x25e9   :  { %v1508_v2 = vpop.permute.xlu1 %1507 }
0x25ea   :  { %1877 = vmatmul.mubr.msk.bf16.vlgmr.msra.gmra.mxu0 %vm185_vm3, %v1508_v2 }
0x26aa   :  { %v1546_v5 = vpop.f32.mrf.mxu0 }
0x26ab   :  { %v1552_v10 = vadd.f32 %v1546_v5, %v973_v4 }
0x26ac   :  { %v1878_v11 = vpop.f32.mrf.mxu0 }
0x26ad   :  { %2029 = vtanh.f32 %v1552_v10  ;;  %v1652_v16 = vmul.f32 -1.442695, %v1552_v10 }
0x26ae   :  { %v1549_v12 = vpop.f32.mrf.mxu0 }
0x26af   :  { %2031 = vpow2.f32 %v1652_v16 }
0x26b0   :  { %v1879_v14 = vpop.f32.mrf.mxu0 }
0x26ba   :  { %v2030_v7 = vpop.eup %2029 }
0x26bb   :  { %1562 = vrot.lane.b32.xlu0 %v2030_v7, %s2087_s17 }
0x26bc   :  { %v2032_v17 = vpop.eup %2031 }
0x26bd   :  { %v1556_v18 = vadd.f32 1.0, %v2032_v17 }
0x26bf   :  { %2033 = vrcp.f32 %v1556_v18 }
0x26cc   :  { %v2034_v13 = vpop.eup %2033 }
0x26cd   :  { %v1560_v8 = vmul.f32 %v2034_v13, %v1497_v55 }
0x272d   :  { %v1563_v19 = vpop.permute.xlu0 %1562 }
0x272e   :  { %v1565_v20 = vmul.f32 %v2034_v13, %v1563_v19 }
0x2730   :  { %1567 = vrot.lane.b32.xlu1 %v1565_v20, %s2087_s17 }
0x27a2   :  { %v1568_v3 = vpop.permute.xlu1 %1567 }
0x27a3   :  { %v1570_v21 = vadd.f32 %v1568_v3, %v1560_v8 }
0x27a5   :  { %2035 = vtanh.f32 %v1570_v21 }
0x27b2   :  { %v2036_v9 = vpop.eup %2035 }
0x27b3   :  { %1573 = vrot.lane.b32.xlu0 %v2036_v9, %s2087_s17 }
0x2825   :  { %v1574_v61 = vpop.permute.xlu0 %1573 }
0x2826   :  { %v1576_v22 = vmul.f32 %v2034_v13, %v1574_v61 }
0x2828   :  { %1578 = vrot.lane.b32.xlu1 %v1576_v22, %s2082_s27 }
0x289a   :  { %v1579_v6 = vpop.permute.xlu1 %1578 }
0x289b   :  { %1581 = vst.msk [vmem:[#allocation7] sm:$0xff] %vm185_vm3, %v1579_v6 }
0x289c   :  { %2068 = shalt.err (!%p2065_p9)
}
0x289d   :  { %1591 = dma.vmem_to_hbm [thread:$0]  %s1589_s25, 128, %s2429_s7, [#allocation6]  }
0x289e   :  { %2079 = dma.done.wait [#allocation6], 128  }
0x289f   :  { %2080 = vsyncadd [#allocation6], 4294967168 }
0x28a0   :  { %1595 = vsyncpa [#allocation5], 1 }
0x28a1   :  { %1596 = vsyncpa [#allocation6], 1 }

</bundles_post_ra>
